<compile_context>
chip_gen: v7x
topology: tpu7x:2x2x1
jax: 0.10.0
libtpu: 0.0.40
codegen_flags: <defaults>
</compile_context>

<pallas_src>
import functools

import jax
import jax.numpy as jnp
from jax.experimental import pallas as pl
from jax.experimental.pallas import tpu as pltpu


def _round_up(v, m):
    return -(-v // m) * m


def cross_attention_kernel(x_ref, emb_ref, w1_ref, w2_ref, wp_ref, bp_ref,
                           wsp_ref, o_ref, pad_ref,
                           *, Bt, H, W, K, OFF, PAD_LEN):
    """One block of Bt batch elements per grid step.

    x_ref   : (Bt, C, HW)      input feature map, channel-major (VMEM)
    emb_ref : (E, Bt*HW)       embedding, E on sublanes, batch*pixels on lanes
    w1_ref  : (Cr, C)          channel-attention fc1 weight (native OIHW layout)
    w2_ref  : (C, Cr)          channel-attention fc2 weight (native)
    wp_ref  : (C, E)           1x1 embedding-projection weight (native)
    bp_ref  : (C, 1)           projection bias
    wsp_ref : (2*K*K,)         KxK spatial-attention conv weight, flat, in SMEM
    o_ref   : (Bt, C, HW)      output
    pad_ref : (2, Bt, PAD_LEN) flat zero-padded avg/max spatial maps (f32 scratch)
    """
    HW = H * W
    P = K // 2
    WIN = HW + K - 1                 # window width covering all kw taps of one kh
    BASE = OFF - P * W - P           # lane of tap (kh=0, kw=0) for output pixel 0
    f32 = jnp.float32
    highest = jax.lax.Precision.HIGHEST

    # ---------------- pools (x dies right after; re-read per-b in the combine) --
    x = x_ref[...].astype(f32)                       # (Bt, C, HW)
    avg_c = jnp.mean(x, axis=2)                      # (Bt, C)
    max_c = jnp.max(x, axis=2)                       # (Bt, C)
    avg_s = jnp.mean(x, axis=1)                      # (Bt, HW)  lane-dense
    max_s = jnp.max(x, axis=1)                       # (Bt, HW)

    # ---------------- channel attention: two tiny MXU dots (column form) --------
    pooled = jnp.concatenate([avg_c, max_c], axis=0)              # (2Bt, C)
    # hT = relu(W1 @ pooled^T): contract the C axes directly (A.B^T dot_general).
    hT = jax.lax.dot_general(w1_ref[...], pooled, (((1,), (1,)), ((), ())),
                             preferred_element_type=f32,
                             precision=highest)                   # (Cr, 2Bt)
    hT = jnp.maximum(hT, 0.0)
    attnT = jnp.dot(w2_ref[...], hT, preferred_element_type=f32,
                    precision=highest)                            # (C, 2Bt)
    caT = jax.nn.sigmoid(attnT[:, :Bt] + attnT[:, Bt:])           # (C, Bt)

    # ---------------- spatial attention: KxK conv on flat zero-padded maps ------
    # Only the halo lane ranges are re-zeroed (interior is fully overwritten and
    # pixel (0,0) sits at a 128-aligned lane -> aligned full-vreg interior stores).
    left = OFF
    right = PAD_LEN - OFF - HW
    if left > 0:
        pad_ref[:, :, pl.ds(0, left)] = jnp.zeros((2, Bt, left), f32)
    if right > 0:
        pad_ref[:, :, pl.ds(OFF + HW, right)] = jnp.zeros((2, Bt, right), f32)
    pad_ref[0, :, pl.ds(OFF, HW)] = avg_s
    pad_ref[1, :, pl.ds(OFF, HW)] = max_s

    # One (Bt, WIN) window load per (channel, kh): 2*K loads total. The kw taps
    # are accumulated at full window width on the VPU and extracted afterwards
    # with a single static lane shift + horizontal-validity mask per kw.
    xpos = jax.lax.broadcasted_iota(jnp.int32, (Bt, HW), 1) % W
    s_kw = [jnp.zeros((Bt, WIN), f32) for _ in range(K)]
    for c in range(2):
        for kh in range(K):
            win = pad_ref[c, :, pl.ds(BASE + kh * W, WIN)]        # (Bt, WIN)
            for kw in range(K):
                s_kw[kw] = s_kw[kw] + wsp_ref[c * K * K + kh * K + kw] * win
    acc = jnp.zeros((Bt, HW), f32)
    for kw in range(K):
        dx = kw - P
        tap = s_kw[kw][:, kw:kw + HW]                             # static lane shift
        if dx == 0:
            acc = acc + tap
        elif dx > 0:
            acc = acc + jnp.where(xpos < (W - dx), tap, 0.0)
        else:
            acc = acc + jnp.where(xpos >= (-dx), tap, 0.0)
    sa = jax.nn.sigmoid(acc)                                      # (Bt, HW)

    # ---------------- embedding projection: ONE MXU dot for the whole block -----
    embf = emb_ref[...]                                           # (E, Bt*HW)
    prec = highest if embf.dtype == f32 else jax.lax.Precision.DEFAULT
    proj = jnp.dot(wp_ref[...].astype(embf.dtype), embf,
                   preferred_element_type=f32, precision=prec)    # (C, Bt*HW)
    proj = proj + bp_ref[...]                                     # bias added once

    # ---------------- combine: out = x * (ca + sa) + proj -----------------------
    for b in range(Bt):
        xb = x_ref[b].astype(f32)                                 # (C, HW) reload
        gate = caT[:, b:b + 1] + sa[b:b + 1, :]                   # (C, HW)
        o_ref[b] = (xb * gate + proj[:, b * HW:(b + 1) * HW]).astype(o_ref.dtype)


def _tpu_vmem_and_cores():
    try:
        vmem = int(pltpu.get_tpu_info().vmem_capacity_bytes)
    except Exception:
        vmem = 64 << 20                              # conservative (v7x per-TC)
    try:
        kind = jax.devices()[0].device_kind.lower()
        dual = any(t in kind for t in ("v7", "7x"))  # v7x: 2 TensorCores/chip
    except Exception:
        dual = False
    return vmem, dual


def cross_attention_pallas(x, emb, fc1_w, fc2_w, sp_w, proj_w, proj_b,
                           batch_block=None):
    """x: (B, C, H, W), emb: (B, E, H, W); weights in PyTorch (OIHW) layout.
    Returns (B, C, H, W)."""
    B, C, H, W = x.shape
    E = emb.shape[1]
    K = sp_w.shape[-1]
    Cr = fc1_w.shape[0]
    HW = H * W
    P = K // 2
    assert K % 2 == 1 and P < W

    # channel-major, lane-dense activations: x / out are free reshapes; emb is
    # restaged once to (E, B*HW) so the 1x1 projection is one MXU dot per step.
    x_flat = x.reshape(B, C, HW)
    emb_flat = jnp.transpose(emb.reshape(B, E, HW), (1, 0, 2)).reshape(E, B * HW)

    w1 = fc1_w[:, :, 0, 0].astype(jnp.float32)       # (Cr, C), native layout
    w2 = fc2_w[:, :, 0, 0].astype(jnp.float32)       # (C, Cr), native layout
    wp = proj_w[:, :, 0, 0].astype(jnp.float32)      # (C, E),  native layout
    bp = proj_b.reshape(C, 1).astype(jnp.float32)
    wsp = sp_w.reshape(-1).astype(jnp.float32)       # (2*K*K,)

    # pad scratch: pixel (0,0) at a 128-aligned lane, halo covers every conv tap
    OFF = _round_up(P * W + P, 128)
    pad_len = _round_up(OFF + HW + P * W + P, 128)

    vmem_cap, dual_core = _tpu_vmem_and_cores()
    # per-step VMEM per batch element: x + emb + out blocks (double-buffered by
    # the BlockSpec pipeline) plus the f32 pad scratch.
    per_b = 2 * (2 * C + E) * HW * x.dtype.itemsize + 2 * pad_len * 4
    if batch_block is None:
        budget = max(8 << 20, int(vmem_cap * 0.4))   # leave compiler headroom
        # single-TC parts (v5e/v6e): one big grid step when it fits VMEM;
        # dual-TC (v7x): at least two steps so the "parallel" axis feeds both TCs.
        bt = B // 2 if (dual_core and B % 2 == 0 and B >= 2) else B
        bt = min(bt, 64)                             # keep conv accumulators sane
        while bt > 1 and (bt * per_b > budget or B % bt):
            bt -= 1
        batch_block = bt
    Bt = batch_block
    assert B % Bt == 0
    vmem_limit = int(min(vmem_cap, max(32 << 20, Bt * per_b + (8 << 20))))

    kernel = functools.partial(cross_attention_kernel, Bt=Bt, H=H, W=W, K=K,
                               OFF=OFF, PAD_LEN=pad_len)

    out_flat = pl.pallas_call(
        kernel,
        out_shape=jax.ShapeDtypeStruct((B, C, HW), x.dtype),
        grid_spec=pltpu.PrefetchScalarGridSpec(
            num_scalar_prefetch=0,
            grid=(B // Bt,),
            in_specs=[
                pl.BlockSpec((Bt, C, HW), lambda b: (b, 0, 0)),       # x
                pl.BlockSpec((E, Bt * HW), lambda b: (0, b)),         # embedding
                pl.BlockSpec((Cr, C), lambda b: (0, 0)),              # fc1 weight
                pl.BlockSpec((C, Cr), lambda b: (0, 0)),              # fc2 weight
                pl.BlockSpec((C, E), lambda b: (0, 0)),               # proj weight
                pl.BlockSpec((C, 1), lambda b: (0, 0)),               # proj bias
                pl.BlockSpec(memory_space=pltpu.MemorySpace.SMEM),    # conv weight
            ],
            out_specs=pl.BlockSpec((Bt, C, HW), lambda b: (b, 0, 0)),
            scratch_shapes=[pltpu.VMEM((2, Bt, pad_len), jnp.float32)],
        ),
        compiler_params=pltpu.CompilerParams(
            dimension_semantics=("parallel",),
            vmem_limit_bytes=vmem_limit),
    )(x_flat, emb_flat, w1, w2, wp, bp, wsp)

    return out_flat.reshape(B, C, H, W)


def reference_nchw(x, emb, fc1_w, fc2_w, sp_w, proj_w, proj_b):
    """Pure-JAX NCHW reference matching the PyTorch module."""
    hp = jax.lax.Precision.HIGHEST
    # channel attention
    avg = jnp.mean(x, axis=(2, 3), keepdims=True)
    mx = jnp.max(x, axis=(2, 3), keepdims=True)

    def fc(v):
        h = jnp.einsum('bchw,oc->bohw', v, fc1_w[:, :, 0, 0], precision=hp)
        h = jnp.maximum(h, 0.0)
        return jnp.einsum('bchw,oc->bohw', h, fc2_w[:, :, 0, 0], precision=hp)

    ca = jax.nn.sigmoid(fc(avg) + fc(mx))
    x_ca = x * ca
    # spatial attention
    avg_s = jnp.mean(x, axis=1, keepdims=True)
    max_s = jnp.max(x, axis=1, keepdims=True)
    cat = jnp.concatenate([avg_s, max_s], axis=1)
    sa = jax.lax.conv_general_dilated(
        cat, sp_w, window_strides=(1, 1), padding='SAME',
        dimension_numbers=('NCHW', 'OIHW', 'NCHW'), precision=hp)
    sa = jax.nn.sigmoid(sa)
    x_sa = x * sa
    # embedding projection
    proj = jnp.einsum('behw,ce->bchw', emb, proj_w[:, :, 0, 0], precision=hp)
    proj = proj + proj_b[None, :, None, None]
    return x_ca + x_sa + proj


if __name__ == "__main__":
    B, C, H, W = 2, 32, 16, 16       # in_channels = 32
    E = 8                            # embedding_channels = 8
    reduction = 16
    K = 7
    Cr = C // reduction

    key = jax.random.PRNGKey(0)
    ks = jax.random.split(key, 7)
    x_nchw = jax.random.normal(ks[0], (B, C, H, W), jnp.float32)
    emb_nchw = jax.random.normal(ks[1], (B, E, H, W), jnp.float32)
    fc1_w = 0.1 * jax.random.normal(ks[2], (Cr, C, 1, 1), jnp.float32)
    fc2_w = 0.1 * jax.random.normal(ks[3], (C, Cr, 1, 1), jnp.float32)
    sp_w = 0.1 * jax.random.normal(ks[4], (1, 2, K, K), jnp.float32)
    proj_w = 0.1 * jax.random.normal(ks[5], (C, E, 1, 1), jnp.float32)
    proj_b = 0.1 * jax.random.normal(ks[6], (C,), jnp.float32)

    # f32 path (HIGHEST-precision MXU dots -> tight tolerance)
    out = cross_attention_pallas(x_nchw, emb_nchw, fc1_w, fc2_w,
                                 sp_w, proj_w, proj_b)
    out = jax.block_until_ready(out)
    ref = reference_nchw(x_nchw, emb_nchw, fc1_w, fc2_w, sp_w, proj_w, proj_b)
    if not jnp.allclose(out, ref, rtol=1e-3, atol=1e-3):
        raise AssertionError(
            f"f32 mismatch: max abs err = {float(jnp.max(jnp.abs(out - ref)))}")

    # bf16 activation path (memory-bound kernel -> ~halves HBM traffic)
    x_bf = x_nchw.astype(jnp.bfloat16)
    emb_bf = emb_nchw.astype(jnp.bfloat16)
    out_bf = cross_attention_pallas(x_bf, emb_bf, fc1_w, fc2_w,
                                    sp_w, proj_w, proj_b)
    out_bf = jax.block_until_ready(out_bf)
    ref_bf = reference_nchw(x_bf.astype(jnp.float32), emb_bf.astype(jnp.float32),
                            fc1_w, fc2_w, sp_w, proj_w, proj_b)
    if not jnp.allclose(out_bf.astype(jnp.float32), ref_bf, rtol=8e-2, atol=8e-2):
        err = float(jnp.max(jnp.abs(out_bf.astype(jnp.float32) - ref_bf)))
        raise AssertionError(f"bf16 mismatch: max abs err = {err}")

    print("KERNEL_OK")
</pallas_src>

<mosaic_0001>
module attributes {stable_mosaic.version = 11 : i64} {
  func.func @cross_attention_kernel(%arg0: i32, %arg1: memref<2x32x256xf32, #tpu.memory_space<vmem>>, %arg2: memref<8x512xf32, #tpu.memory_space<vmem>>, %arg3: memref<2x32xf32, #tpu.memory_space<vmem>>, %arg4: memref<32x2xf32, #tpu.memory_space<vmem>>, %arg5: memref<32x8xf32, #tpu.memory_space<vmem>>, %arg6: memref<32x1xf32, #tpu.memory_space<vmem>>, %arg7: memref<98xf32, #tpu.memory_space<smem>>, %arg8: memref<2x32x256xf32, #tpu.memory_space<vmem>>, %arg9: memref<2x2x512xf32, #tpu.memory_space<vmem>>) attributes {dimension_semantics = [#tpu.dimension_semantics<parallel>], iteration_bounds = array<i64: 1>, scalar_prefetch = 0 : i64, scratch_operands = 1 : i64, tpu.core_type = #tpu.core_type<tc>, window_params = [{transform_indices = @transform_0, window_bounds = array<i64: 2, 32, 256>}, {transform_indices = @transform_1, window_bounds = array<i64: 8, 512>}, {pipeline_mode = #tpu.pipeline_mode<synchronous>, transform_indices = @transform_2, window_bounds = array<i64: 2, 32>}, {pipeline_mode = #tpu.pipeline_mode<synchronous>, transform_indices = @transform_3, window_bounds = array<i64: 32, 2>}, {pipeline_mode = #tpu.pipeline_mode<synchronous>, transform_indices = @transform_4, window_bounds = array<i64: 32, 8>}, {pipeline_mode = #tpu.pipeline_mode<synchronous>, transform_indices = @transform_5, window_bounds = array<i64: 32, 1>}, {transform_indices = @transform_6, window_bounds = array<i64: 98>}, {transform_indices = @transform_7, window_bounds = array<i64: 2, 32, 256>}]} {
    %c0 = arith.constant 0 : index
    %c0_0 = arith.constant 0 : index
    %c0_1 = arith.constant 0 : index
    %0 = vector.load %arg1[%c0, %c0_0, %c0_1] : memref<2x32x256xf32, #tpu.memory_space<vmem>>, vector<2x32x256xf32>
    %cst = arith.constant dense<0.000000e+00> : vector<2x32xf32>
    %1 = vector.multi_reduction <add>, %0, %cst [2] : vector<2x32x256xf32> to vector<2x32xf32>
    %cst_2 = arith.constant 2.560000e+02 : f32
    %2 = vector.broadcast %cst_2 : f32 to vector<2x32xf32>
    %3 = arith.divf %1, %2 : vector<2x32xf32>
    %cst_3 = arith.constant dense<0xFF800000> : vector<2x32xf32>
    %4 = vector.multi_reduction <maximumf>, %0, %cst_3 [2] : vector<2x32x256xf32> to vector<2x32xf32>
    %cst_4 = arith.constant dense<0.000000e+00> : vector<2x256xf32>
    %5 = vector.multi_reduction <add>, %0, %cst_4 [1] : vector<2x32x256xf32> to vector<2x256xf32>
    %cst_5 = arith.constant 3.200000e+01 : f32
    %6 = vector.broadcast %cst_5 : f32 to vector<2x256xf32>
    %7 = arith.divf %5, %6 : vector<2x256xf32>
    %cst_6 = arith.constant dense<0xFF800000> : vector<2x256xf32>
    %8 = vector.multi_reduction <maximumf>, %0, %cst_6 [1] : vector<2x32x256xf32> to vector<2x256xf32>
    %9 = tpu.concatenate %3, %4 in 0 : vector<2x32xf32>, vector<2x32xf32> -> vector<4x32xf32>
    %c0_7 = arith.constant 0 : index
    %c0_8 = arith.constant 0 : index
    %10 = vector.load %arg3[%c0_7, %c0_8] : memref<2x32xf32, #tpu.memory_space<vmem>>, vector<2x32xf32>
    %cst_9 = arith.constant dense<0.000000e+00> : vector<2x4xf32>
    %11 = tpu.matmul %10, %9, %cst_9 {dimension_numbers = #tpu.dot_dimension_numbers<[1], [1], [0], [0], [0, 0, 1, 0], [], []>, precision = #tpu.contract_precision<fp32>} : vector<2x32xf32>, vector<4x32xf32>, vector<2x4xf32> -> vector<2x4xf32>
    %cst_10 = arith.constant 0.000000e+00 : f32
    %12 = vector.broadcast %cst_10 : f32 to vector<2x4xf32>
    %13 = arith.maximumf %11, %12 : vector<2x4xf32>
    %c0_11 = arith.constant 0 : index
    %c0_12 = arith.constant 0 : index
    %14 = vector.load %arg4[%c0_11, %c0_12] : memref<32x2xf32, #tpu.memory_space<vmem>>, vector<32x2xf32>
    %cst_13 = arith.constant dense<0.000000e+00> : vector<32x4xf32>
    %15 = tpu.matmul %14, %13, %cst_13 {dimension_numbers = #tpu.dot_dimension_numbers<[1], [0], [0], [1], [0, 0, 1, 1], [], []>, precision = #tpu.contract_precision<fp32>} : vector<32x2xf32>, vector<2x4xf32>, vector<32x4xf32> -> vector<32x4xf32>
    %16 = vector.extract_strided_slice %15 {offsets = [0, 0], sizes = [32, 2], strides = [1, 1]} : vector<32x4xf32> to vector<32x2xf32>
    %17 = vector.extract_strided_slice %15 {offsets = [0, 2], sizes = [32, 2], strides = [1, 1]} : vector<32x4xf32> to vector<32x2xf32>
    %18 = arith.addf %16, %17 : vector<32x2xf32>
    %19 = arith.negf %18 : vector<32x2xf32>
    %20 = math.exp %19 : vector<32x2xf32>
    %cst_14 = arith.constant 1.000000e+00 : f32
    %21 = vector.broadcast %cst_14 : f32 to vector<32x2xf32>
    %22 = arith.addf %21, %20 : vector<32x2xf32>
    %23 = arith.divf %21, %22 : vector<32x2xf32>
    %cst_15 = arith.constant 0.000000e+00 : f32
    %24 = vector.broadcast %cst_15 : f32 to vector<2x2x128xf32>
    %c0_16 = arith.constant 0 : index
    %c0_17 = arith.constant 0 : index
    %c0_18 = arith.constant 0 : index
    %25 = vector.load %arg9[%c0_16, %c0_17, %c0_18] : memref<2x2x512xf32, #tpu.memory_space<vmem>>, vector<2x2x128xf32>
    tpu.vector_store %arg9[%c0_16, %c0_17, %c0_18], %24 {strides = array<i32>} : memref<2x2x512xf32, #tpu.memory_space<vmem>>, vector<2x2x128xf32>,
    %cst_19 = arith.constant 0.000000e+00 : f32
    %26 = vector.broadcast %cst_19 : f32 to vector<2x2x128xf32>
    %c0_20 = arith.constant 0 : index
    %c0_21 = arith.constant 0 : index
    %c384 = arith.constant 384 : index
    %27 = vector.load %arg9[%c0_20, %c0_21, %c384] : memref<2x2x512xf32, #tpu.memory_space<vmem>>, vector<2x2x128xf32>
    tpu.vector_store %arg9[%c0_20, %c0_21, %c384], %26 {strides = array<i32>} : memref<2x2x512xf32, #tpu.memory_space<vmem>>, vector<2x2x128xf32>,
    %c0_22 = arith.constant 0 : index
    %c0_23 = arith.constant 0 : index
    %c128 = arith.constant 128 : index
    %28 = vector.load %arg9[%c0_22, %c0_23, %c128] : memref<2x2x512xf32, #tpu.memory_space<vmem>>, vector<1x2x256xf32>
    %29 = vector.shape_cast %28 : vector<1x2x256xf32> to vector<2x256xf32>
    %30 = vector.shape_cast %7 : vector<2x256xf32> to vector<1x2x256xf32>
    tpu.vector_store %arg9[%c0_22, %c0_23, %c128], %30 {strides = array<i32>} : memref<2x2x512xf32, #tpu.memory_space<vmem>>, vector<1x2x256xf32>,
    %c1 = arith.constant 1 : index
    %c0_24 = arith.constant 0 : index
    %c128_25 = arith.constant 128 : index
    %31 = vector.load %arg9[%c1, %c0_24, %c128_25] : memref<2x2x512xf32, #tpu.memory_space<vmem>>, vector<1x2x256xf32>
    %32 = vector.shape_cast %31 : vector<1x2x256xf32> to vector<2x256xf32>
    %33 = vector.shape_cast %8 : vector<2x256xf32> to vector<1x2x256xf32>
    tpu.vector_store %arg9[%c1, %c0_24, %c128_25], %33 {strides = array<i32>} : memref<2x2x512xf32, #tpu.memory_space<vmem>>, vector<1x2x256xf32>,
    %34 = tpu.iota {dimensions = array<i32: 1>} : vector<2x256xi32>
    %c16_i32 = arith.constant 16 : i32
    %c0_i32 = arith.constant 0 : i32
    %35 = arith.cmpi eq, %c16_i32, %c0_i32 : i32
    %c1_i32 = arith.constant 1 : i32
    %36 = arith.select %35, %c1_i32, %c16_i32 : i32
    %37 = vector.broadcast %36 : i32 to vector<2x256xi32>
    %38 = arith.remsi %34, %37 : vector<2x256xi32>
    %c0_i32_26 = arith.constant 0 : i32
    %39 = vector.broadcast %c0_i32_26 : i32 to vector<2x256xi32>
    %40 = arith.cmpi ne, %38, %39 : vector<2x256xi32>
    %c0_i32_27 = arith.constant 0 : i32
    %41 = vector.broadcast %c0_i32_27 : i32 to vector<2x256xi32>
    %42 = arith.cmpi slt, %38, %41 : vector<2x256xi32>
    %c0_i32_28 = arith.constant 0 : i32
    %43 = arith.cmpi slt, %36, %c0_i32_28 : i32
    %44 = vector.broadcast %43 : i1 to vector<2x256xi1>
    %45 = vector.broadcast %44 : vector<2x256xi1> to vector<2x256xi1>
    %46 = arith.xori %42, %45 : vector<2x256xi1>
    %47 = arith.andi %46, %40 : vector<2x256xi1>
    %48 = vector.broadcast %36 : i32 to vector<2x256xi32>
    %49 = arith.addi %38, %48 : vector<2x256xi32>
    %50 = arith.select %47, %49, %38 : vector<2x256xi1>, vector<2x256xi32>
    %cst_29 = arith.constant 0.000000e+00 : f32
    %51 = vector.broadcast %cst_29 : f32 to vector<2x262xf32>
    %cst_30 = arith.constant 0.000000e+00 : f32
    %52 = vector.broadcast %cst_30 : f32 to vector<2x262xf32>
    %cst_31 = arith.constant 0.000000e+00 : f32
    %53 = vector.broadcast %cst_31 : f32 to vector<2x262xf32>
    %cst_32 = arith.constant 0.000000e+00 : f32
    %54 = vector.broadcast %cst_32 : f32 to vector<2x262xf32>
    %cst_33 = arith.constant 0.000000e+00 : f32
    %55 = vector.broadcast %cst_33 : f32 to vector<2x262xf32>
    %cst_34 = arith.constant 0.000000e+00 : f32
    %56 = vector.broadcast %cst_34 : f32 to vector<2x262xf32>
    %cst_35 = arith.constant 0.000000e+00 : f32
    %57 = vector.broadcast %cst_35 : f32 to vector<2x262xf32>
    %c0_36 = arith.constant 0 : index
    %c0_37 = arith.constant 0 : index
    %c77 = arith.constant 77 : index
    %58 = vector.load %arg9[%c0_36, %c0_37, %c77] : memref<2x2x512xf32, #tpu.memory_space<vmem>>, vector<1x2x262xf32>
    %59 = vector.shape_cast %58 : vector<1x2x262xf32> to vector<2x262xf32>
    %c0_38 = arith.constant 0 : index
    %60 = memref.load %arg7[%c0_38] : memref<98xf32, #tpu.memory_space<smem>>
    %61 = vector.broadcast %60 : f32 to vector<2x262xf32>
    %62 = arith.mulf %61, %59 : vector<2x262xf32>
    %63 = arith.addf %51, %62 : vector<2x262xf32>
    %c1_39 = arith.constant 1 : index
    %64 = memref.load %arg7[%c1_39] : memref<98xf32, #tpu.memory_space<smem>>
    %65 = vector.broadcast %64 : f32 to vector<2x262xf32>
    %66 = arith.mulf %65, %59 : vector<2x262xf32>
    %67 = arith.addf %52, %66 : vector<2x262xf32>
    %c2 = arith.constant 2 : index
    %68 = memref.load %arg7[%c2] : memref<98xf32, #tpu.memory_space<smem>>
    %69 = vector.broadcast %68 : f32 to vector<2x262xf32>
    %70 = arith.mulf %69, %59 : vector<2x262xf32>
    %71 = arith.addf %53, %70 : vector<2x262xf32>
    %c3 = arith.constant 3 : index
    %72 = memref.load %arg7[%c3] : memref<98xf32, #tpu.memory_space<smem>>
    %73 = vector.broadcast %72 : f32 to vector<2x262xf32>
    %74 = arith.mulf %73, %59 : vector<2x262xf32>
    %75 = arith.addf %54, %74 : vector<2x262xf32>
    %c4 = arith.constant 4 : index
    %76 = memref.load %arg7[%c4] : memref<98xf32, #tpu.memory_space<smem>>
    %77 = vector.broadcast %76 : f32 to vector<2x262xf32>
    %78 = arith.mulf %77, %59 : vector<2x262xf32>
    %79 = arith.addf %55, %78 : vector<2x262xf32>
    %c5 = arith.constant 5 : index
    %80 = memref.load %arg7[%c5] : memref<98xf32, #tpu.memory_space<smem>>
    %81 = vector.broadcast %80 : f32 to vector<2x262xf32>
    %82 = arith.mulf %81, %59 : vector<2x262xf32>
    %83 = arith.addf %56, %82 : vector<2x262xf32>
    %c6 = arith.constant 6 : index
    %84 = memref.load %arg7[%c6] : memref<98xf32, #tpu.memory_space<smem>>
    %85 = vector.broadcast %84 : f32 to vector<2x262xf32>
    %86 = arith.mulf %85, %59 : vector<2x262xf32>
    %87 = arith.addf %57, %86 : vector<2x262xf32>
    %c0_40 = arith.constant 0 : index
    %c0_41 = arith.constant 0 : index
    %c93 = arith.constant 93 : index
    %88 = vector.load %arg9[%c0_40, %c0_41, %c93] : memref<2x2x512xf32, #tpu.memory_space<vmem>>, vector<1x2x262xf32>
    %89 = vector.shape_cast %88 : vector<1x2x262xf32> to vector<2x262xf32>
    %c7 = arith.constant 7 : index
    %90 = memref.load %arg7[%c7] : memref<98xf32, #tpu.memory_space<smem>>
    %91 = vector.broadcast %90 : f32 to vector<2x262xf32>
    %92 = arith.mulf %91, %89 : vector<2x262xf32>
    %93 = arith.addf %63, %92 : vector<2x262xf32>
    %c8 = arith.constant 8 : index
    %94 = memref.load %arg7[%c8] : memref<98xf32, #tpu.memory_space<smem>>
    %95 = vector.broadcast %94 : f32 to vector<2x262xf32>
    %96 = arith.mulf %95, %89 : vector<2x262xf32>
    %97 = arith.addf %67, %96 : vector<2x262xf32>
    %c9 = arith.constant 9 : index
    %98 = memref.load %arg7[%c9] : memref<98xf32, #tpu.memory_space<smem>>
    %99 = vector.broadcast %98 : f32 to vector<2x262xf32>
    %100 = arith.mulf %99, %89 : vector<2x262xf32>
    %101 = arith.addf %71, %100 : vector<2x262xf32>
    %c10 = arith.constant 10 : index
    %102 = memref.load %arg7[%c10] : memref<98xf32, #tpu.memory_space<smem>>
    %103 = vector.broadcast %102 : f32 to vector<2x262xf32>
    %104 = arith.mulf %103, %89 : vector<2x262xf32>
    %105 = arith.addf %75, %104 : vector<2x262xf32>
    %c11 = arith.constant 11 : index
    %106 = memref.load %arg7[%c11] : memref<98xf32, #tpu.memory_space<smem>>
    %107 = vector.broadcast %106 : f32 to vector<2x262xf32>
    %108 = arith.mulf %107, %89 : vector<2x262xf32>
    %109 = arith.addf %79, %108 : vector<2x262xf32>
    %c12 = arith.constant 12 : index
    %110 = memref.load %arg7[%c12] : memref<98xf32, #tpu.memory_space<smem>>
    %111 = vector.broadcast %110 : f32 to vector<2x262xf32>
    %112 = arith.mulf %111, %89 : vector<2x262xf32>
    %113 = arith.addf %83, %112 : vector<2x262xf32>
    %c13 = arith.constant 13 : index
    %114 = memref.load %arg7[%c13] : memref<98xf32, #tpu.memory_space<smem>>
    %115 = vector.broadcast %114 : f32 to vector<2x262xf32>
    %116 = arith.mulf %115, %89 : vector<2x262xf32>
    %117 = arith.addf %87, %116 : vector<2x262xf32>
    %c0_42 = arith.constant 0 : index
    %c0_43 = arith.constant 0 : index
    %c109 = arith.constant 109 : index
    %118 = vector.load %arg9[%c0_42, %c0_43, %c109] : memref<2x2x512xf32, #tpu.memory_space<vmem>>, vector<1x2x262xf32>
    %119 = vector.shape_cast %118 : vector<1x2x262xf32> to vector<2x262xf32>
    %c14 = arith.constant 14 : index
    %120 = memref.load %arg7[%c14] : memref<98xf32, #tpu.memory_space<smem>>
    %121 = vector.broadcast %120 : f32 to vector<2x262xf32>
    %122 = arith.mulf %121, %119 : vector<2x262xf32>
    %123 = arith.addf %93, %122 : vector<2x262xf32>
    %c15 = arith.constant 15 : index
    %124 = memref.load %arg7[%c15] : memref<98xf32, #tpu.memory_space<smem>>
    %125 = vector.broadcast %124 : f32 to vector<2x262xf32>
    %126 = arith.mulf %125, %119 : vector<2x262xf32>
    %127 = arith.addf %97, %126 : vector<2x262xf32>
    %c16 = arith.constant 16 : index
    %128 = memref.load %arg7[%c16] : memref<98xf32, #tpu.memory_space<smem>>
    %129 = vector.broadcast %128 : f32 to vector<2x262xf32>
    %130 = arith.mulf %129, %119 : vector<2x262xf32>
    %131 = arith.addf %101, %130 : vector<2x262xf32>
    %c17 = arith.constant 17 : index
    %132 = memref.load %arg7[%c17] : memref<98xf32, #tpu.memory_space<smem>>
    %133 = vector.broadcast %132 : f32 to vector<2x262xf32>
    %134 = arith.mulf %133, %119 : vector<2x262xf32>
    %135 = arith.addf %105, %134 : vector<2x262xf32>
    %c18 = arith.constant 18 : index
    %136 = memref.load %arg7[%c18] : memref<98xf32, #tpu.memory_space<smem>>
    %137 = vector.broadcast %136 : f32 to vector<2x262xf32>
    %138 = arith.mulf %137, %119 : vector<2x262xf32>
    %139 = arith.addf %109, %138 : vector<2x262xf32>
    %c19 = arith.constant 19 : index
    %140 = memref.load %arg7[%c19] : memref<98xf32, #tpu.memory_space<smem>>
    %141 = vector.broadcast %140 : f32 to vector<2x262xf32>
    %142 = arith.mulf %141, %119 : vector<2x262xf32>
    %143 = arith.addf %113, %142 : vector<2x262xf32>
    %c20 = arith.constant 20 : index
    %144 = memref.load %arg7[%c20] : memref<98xf32, #tpu.memory_space<smem>>
    %145 = vector.broadcast %144 : f32 to vector<2x262xf32>
    %146 = arith.mulf %145, %119 : vector<2x262xf32>
    %147 = arith.addf %117, %146 : vector<2x262xf32>
    %c0_44 = arith.constant 0 : index
    %c0_45 = arith.constant 0 : index
    %c125 = arith.constant 125 : index
    %148 = vector.load %arg9[%c0_44, %c0_45, %c125] : memref<2x2x512xf32, #tpu.memory_space<vmem>>, vector<1x2x262xf32>
    %149 = vector.shape_cast %148 : vector<1x2x262xf32> to vector<2x262xf32>
    %c21 = arith.constant 21 : index
    %150 = memref.load %arg7[%c21] : memref<98xf32, #tpu.memory_space<smem>>
    %151 = vector.broadcast %150 : f32 to vector<2x262xf32>
    %152 = arith.mulf %151, %149 : vector<2x262xf32>
    %153 = arith.addf %123, %152 : vector<2x262xf32>
    %c22 = arith.constant 22 : index
    %154 = memref.load %arg7[%c22] : memref<98xf32, #tpu.memory_space<smem>>
    %155 = vector.broadcast %154 : f32 to vector<2x262xf32>
    %156 = arith.mulf %155, %149 : vector<2x262xf32>
    %157 = arith.addf %127, %156 : vector<2x262xf32>
    %c23 = arith.constant 23 : index
    %158 = memref.load %arg7[%c23] : memref<98xf32, #tpu.memory_space<smem>>
    %159 = vector.broadcast %158 : f32 to vector<2x262xf32>
    %160 = arith.mulf %159, %149 : vector<2x262xf32>
    %161 = arith.addf %131, %160 : vector<2x262xf32>
    %c24 = arith.constant 24 : index
    %162 = memref.load %arg7[%c24] : memref<98xf32, #tpu.memory_space<smem>>
    %163 = vector.broadcast %162 : f32 to vector<2x262xf32>
    %164 = arith.mulf %163, %149 : vector<2x262xf32>
    %165 = arith.addf %135, %164 : vector<2x262xf32>
    %c25 = arith.constant 25 : index
    %166 = memref.load %arg7[%c25] : memref<98xf32, #tpu.memory_space<smem>>
    %167 = vector.broadcast %166 : f32 to vector<2x262xf32>
    %168 = arith.mulf %167, %149 : vector<2x262xf32>
    %169 = arith.addf %139, %168 : vector<2x262xf32>
    %c26 = arith.constant 26 : index
    %170 = memref.load %arg7[%c26] : memref<98xf32, #tpu.memory_space<smem>>
    %171 = vector.broadcast %170 : f32 to vector<2x262xf32>
    %172 = arith.mulf %171, %149 : vector<2x262xf32>
    %173 = arith.addf %143, %172 : vector<2x262xf32>
    %c27 = arith.constant 27 : index
    %174 = memref.load %arg7[%c27] : memref<98xf32, #tpu.memory_space<smem>>
    %175 = vector.broadcast %174 : f32 to vector<2x262xf32>
    %176 = arith.mulf %175, %149 : vector<2x262xf32>
    %177 = arith.addf %147, %176 : vector<2x262xf32>
    %c0_46 = arith.constant 0 : index
    %c0_47 = arith.constant 0 : index
    %c141 = arith.constant 141 : index
    %178 = vector.load %arg9[%c0_46, %c0_47, %c141] : memref<2x2x512xf32, #tpu.memory_space<vmem>>, vector<1x2x262xf32>
    %179 = vector.shape_cast %178 : vector<1x2x262xf32> to vector<2x262xf32>
    %c28 = arith.constant 28 : index
    %180 = memref.load %arg7[%c28] : memref<98xf32, #tpu.memory_space<smem>>
    %181 = vector.broadcast %180 : f32 to vector<2x262xf32>
    %182 = arith.mulf %181, %179 : vector<2x262xf32>
    %183 = arith.addf %153, %182 : vector<2x262xf32>
    %c29 = arith.constant 29 : index
    %184 = memref.load %arg7[%c29] : memref<98xf32, #tpu.memory_space<smem>>
    %185 = vector.broadcast %184 : f32 to vector<2x262xf32>
    %186 = arith.mulf %185, %179 : vector<2x262xf32>
    %187 = arith.addf %157, %186 : vector<2x262xf32>
    %c30 = arith.constant 30 : index
    %188 = memref.load %arg7[%c30] : memref<98xf32, #tpu.memory_space<smem>>
    %189 = vector.broadcast %188 : f32 to vector<2x262xf32>
    %190 = arith.mulf %189, %179 : vector<2x262xf32>
    %191 = arith.addf %161, %190 : vector<2x262xf32>
    %c31 = arith.constant 31 : index
    %192 = memref.load %arg7[%c31] : memref<98xf32, #tpu.memory_space<smem>>
    %193 = vector.broadcast %192 : f32 to vector<2x262xf32>
    %194 = arith.mulf %193, %179 : vector<2x262xf32>
    %195 = arith.addf %165, %194 : vector<2x262xf32>
    %c32 = arith.constant 32 : index
    %196 = memref.load %arg7[%c32] : memref<98xf32, #tpu.memory_space<smem>>
    %197 = vector.broadcast %196 : f32 to vector<2x262xf32>
    %198 = arith.mulf %197, %179 : vector<2x262xf32>
    %199 = arith.addf %169, %198 : vector<2x262xf32>
    %c33 = arith.constant 33 : index
    %200 = memref.load %arg7[%c33] : memref<98xf32, #tpu.memory_space<smem>>
    %201 = vector.broadcast %200 : f32 to vector<2x262xf32>
    %202 = arith.mulf %201, %179 : vector<2x262xf32>
    %203 = arith.addf %173, %202 : vector<2x262xf32>
    %c34 = arith.constant 34 : index
    %204 = memref.load %arg7[%c34] : memref<98xf32, #tpu.memory_space<smem>>
    %205 = vector.broadcast %204 : f32 to vector<2x262xf32>
    %206 = arith.mulf %205, %179 : vector<2x262xf32>
    %207 = arith.addf %177, %206 : vector<2x262xf32>
    %c0_48 = arith.constant 0 : index
    %c0_49 = arith.constant 0 : index
    %c157 = arith.constant 157 : index
    %208 = vector.load %arg9[%c0_48, %c0_49, %c157] : memref<2x2x512xf32, #tpu.memory_space<vmem>>, vector<1x2x262xf32>
    %209 = vector.shape_cast %208 : vector<1x2x262xf32> to vector<2x262xf32>
    %c35 = arith.constant 35 : index
    %210 = memref.load %arg7[%c35] : memref<98xf32, #tpu.memory_space<smem>>
    %211 = vector.broadcast %210 : f32 to vector<2x262xf32>
    %212 = arith.mulf %211, %209 : vector<2x262xf32>
    %213 = arith.addf %183, %212 : vector<2x262xf32>
    %c36 = arith.constant 36 : index
    %214 = memref.load %arg7[%c36] : memref<98xf32, #tpu.memory_space<smem>>
    %215 = vector.broadcast %214 : f32 to vector<2x262xf32>
    %216 = arith.mulf %215, %209 : vector<2x262xf32>
    %217 = arith.addf %187, %216 : vector<2x262xf32>
    %c37 = arith.constant 37 : index
    %218 = memref.load %arg7[%c37] : memref<98xf32, #tpu.memory_space<smem>>
    %219 = vector.broadcast %218 : f32 to vector<2x262xf32>
    %220 = arith.mulf %219, %209 : vector<2x262xf32>
    %221 = arith.addf %191, %220 : vector<2x262xf32>
    %c38 = arith.constant 38 : index
    %222 = memref.load %arg7[%c38] : memref<98xf32, #tpu.memory_space<smem>>
    %223 = vector.broadcast %222 : f32 to vector<2x262xf32>
    %224 = arith.mulf %223, %209 : vector<2x262xf32>
    %225 = arith.addf %195, %224 : vector<2x262xf32>
    %c39 = arith.constant 39 : index
    %226 = memref.load %arg7[%c39] : memref<98xf32, #tpu.memory_space<smem>>
    %227 = vector.broadcast %226 : f32 to vector<2x262xf32>
    %228 = arith.mulf %227, %209 : vector<2x262xf32>
    %229 = arith.addf %199, %228 : vector<2x262xf32>
    %c40 = arith.constant 40 : index
    %230 = memref.load %arg7[%c40] : memref<98xf32, #tpu.memory_space<smem>>
    %231 = vector.broadcast %230 : f32 to vector<2x262xf32>
    %232 = arith.mulf %231, %209 : vector<2x262xf32>
    %233 = arith.addf %203, %232 : vector<2x262xf32>
    %c41 = arith.constant 41 : index
    %234 = memref.load %arg7[%c41] : memref<98xf32, #tpu.memory_space<smem>>
    %235 = vector.broadcast %234 : f32 to vector<2x262xf32>
    %236 = arith.mulf %235, %209 : vector<2x262xf32>
    %237 = arith.addf %207, %236 : vector<2x262xf32>
    %c0_50 = arith.constant 0 : index
    %c0_51 = arith.constant 0 : index
    %c173 = arith.constant 173 : index
    %238 = vector.load %arg9[%c0_50, %c0_51, %c173] : memref<2x2x512xf32, #tpu.memory_space<vmem>>, vector<1x2x262xf32>
    %239 = vector.shape_cast %238 : vector<1x2x262xf32> to vector<2x262xf32>
    %c42 = arith.constant 42 : index
    %240 = memref.load %arg7[%c42] : memref<98xf32, #tpu.memory_space<smem>>
    %241 = vector.broadcast %240 : f32 to vector<2x262xf32>
    %242 = arith.mulf %241, %239 : vector<2x262xf32>
    %243 = arith.addf %213, %242 : vector<2x262xf32>
    %c43 = arith.constant 43 : index
    %244 = memref.load %arg7[%c43] : memref<98xf32, #tpu.memory_space<smem>>
    %245 = vector.broadcast %244 : f32 to vector<2x262xf32>
    %246 = arith.mulf %245, %239 : vector<2x262xf32>
    %247 = arith.addf %217, %246 : vector<2x262xf32>
    %c44 = arith.constant 44 : index
    %248 = memref.load %arg7[%c44] : memref<98xf32, #tpu.memory_space<smem>>
    %249 = vector.broadcast %248 : f32 to vector<2x262xf32>
    %250 = arith.mulf %249, %239 : vector<2x262xf32>
    %251 = arith.addf %221, %250 : vector<2x262xf32>
    %c45 = arith.constant 45 : index
    %252 = memref.load %arg7[%c45] : memref<98xf32, #tpu.memory_space<smem>>
    %253 = vector.broadcast %252 : f32 to vector<2x262xf32>
    %254 = arith.mulf %253, %239 : vector<2x262xf32>
    %255 = arith.addf %225, %254 : vector<2x262xf32>
    %c46 = arith.constant 46 : index
    %256 = memref.load %arg7[%c46] : memref<98xf32, #tpu.memory_space<smem>>
    %257 = vector.broadcast %256 : f32 to vector<2x262xf32>
    %258 = arith.mulf %257, %239 : vector<2x262xf32>
    %259 = arith.addf %229, %258 : vector<2x262xf32>
    %c47 = arith.constant 47 : index
    %260 = memref.load %arg7[%c47] : memref<98xf32, #tpu.memory_space<smem>>
    %261 = vector.broadcast %260 : f32 to vector<2x262xf32>
    %262 = arith.mulf %261, %239 : vector<2x262xf32>
    %263 = arith.addf %233, %262 : vector<2x262xf32>
    %c48 = arith.constant 48 : index
    %264 = memref.load %arg7[%c48] : memref<98xf32, #tpu.memory_space<smem>>
    %265 = vector.broadcast %264 : f32 to vector<2x262xf32>
    %266 = arith.mulf %265, %239 : vector<2x262xf32>
    %267 = arith.addf %237, %266 : vector<2x262xf32>
    %c1_52 = arith.constant 1 : index
    %c0_53 = arith.constant 0 : index
    %c77_54 = arith.constant 77 : index
    %268 = vector.load %arg9[%c1_52, %c0_53, %c77_54] : memref<2x2x512xf32, #tpu.memory_space<vmem>>, vector<1x2x262xf32>
    %269 = vector.shape_cast %268 : vector<1x2x262xf32> to vector<2x262xf32>
    %c49 = arith.constant 49 : index
    %270 = memref.load %arg7[%c49] : memref<98xf32, #tpu.memory_space<smem>>
    %271 = vector.broadcast %270 : f32 to vector<2x262xf32>
    %272 = arith.mulf %271, %269 : vector<2x262xf32>
    %273 = arith.addf %243, %272 : vector<2x262xf32>
    %c50 = arith.constant 50 : index
    %274 = memref.load %arg7[%c50] : memref<98xf32, #tpu.memory_space<smem>>
    %275 = vector.broadcast %274 : f32 to vector<2x262xf32>
    %276 = arith.mulf %275, %269 : vector<2x262xf32>
    %277 = arith.addf %247, %276 : vector<2x262xf32>
    %c51 = arith.constant 51 : index
    %278 = memref.load %arg7[%c51] : memref<98xf32, #tpu.memory_space<smem>>
    %279 = vector.broadcast %278 : f32 to vector<2x262xf32>
    %280 = arith.mulf %279, %269 : vector<2x262xf32>
    %281 = arith.addf %251, %280 : vector<2x262xf32>
    %c52 = arith.constant 52 : index
    %282 = memref.load %arg7[%c52] : memref<98xf32, #tpu.memory_space<smem>>
    %283 = vector.broadcast %282 : f32 to vector<2x262xf32>
    %284 = arith.mulf %283, %269 : vector<2x262xf32>
    %285 = arith.addf %255, %284 : vector<2x262xf32>
    %c53 = arith.constant 53 : index
    %286 = memref.load %arg7[%c53] : memref<98xf32, #tpu.memory_space<smem>>
    %287 = vector.broadcast %286 : f32 to vector<2x262xf32>
    %288 = arith.mulf %287, %269 : vector<2x262xf32>
    %289 = arith.addf %259, %288 : vector<2x262xf32>
    %c54 = arith.constant 54 : index
    %290 = memref.load %arg7[%c54] : memref<98xf32, #tpu.memory_space<smem>>
    %291 = vector.broadcast %290 : f32 to vector<2x262xf32>
    %292 = arith.mulf %291, %269 : vector<2x262xf32>
    %293 = arith.addf %263, %292 : vector<2x262xf32>
    %c55 = arith.constant 55 : index
    %294 = memref.load %arg7[%c55] : memref<98xf32, #tpu.memory_space<smem>>
    %295 = vector.broadcast %294 : f32 to vector<2x262xf32>
    %296 = arith.mulf %295, %269 : vector<2x262xf32>
    %297 = arith.addf %267, %296 : vector<2x262xf32>
    %c1_55 = arith.constant 1 : index
    %c0_56 = arith.constant 0 : index
    %c93_57 = arith.constant 93 : index
    %298 = vector.load %arg9[%c1_55, %c0_56, %c93_57] : memref<2x2x512xf32, #tpu.memory_space<vmem>>, vector<1x2x262xf32>
    %299 = vector.shape_cast %298 : vector<1x2x262xf32> to vector<2x262xf32>
    %c56 = arith.constant 56 : index
    %300 = memref.load %arg7[%c56] : memref<98xf32, #tpu.memory_space<smem>>
    %301 = vector.broadcast %300 : f32 to vector<2x262xf32>
    %302 = arith.mulf %301, %299 : vector<2x262xf32>
    %303 = arith.addf %273, %302 : vector<2x262xf32>
    %c57 = arith.constant 57 : index
    %304 = memref.load %arg7[%c57] : memref<98xf32, #tpu.memory_space<smem>>
    %305 = vector.broadcast %304 : f32 to vector<2x262xf32>
    %306 = arith.mulf %305, %299 : vector<2x262xf32>
    %307 = arith.addf %277, %306 : vector<2x262xf32>
    %c58 = arith.constant 58 : index
    %308 = memref.load %arg7[%c58] : memref<98xf32, #tpu.memory_space<smem>>
    %309 = vector.broadcast %308 : f32 to vector<2x262xf32>
    %310 = arith.mulf %309, %299 : vector<2x262xf32>
    %311 = arith.addf %281, %310 : vector<2x262xf32>
    %c59 = arith.constant 59 : index
    %312 = memref.load %arg7[%c59] : memref<98xf32, #tpu.memory_space<smem>>
    %313 = vector.broadcast %312 : f32 to vector<2x262xf32>
    %314 = arith.mulf %313, %299 : vector<2x262xf32>
    %315 = arith.addf %285, %314 : vector<2x262xf32>
    %c60 = arith.constant 60 : index
    %316 = memref.load %arg7[%c60] : memref<98xf32, #tpu.memory_space<smem>>
    %317 = vector.broadcast %316 : f32 to vector<2x262xf32>
    %318 = arith.mulf %317, %299 : vector<2x262xf32>
    %319 = arith.addf %289, %318 : vector<2x262xf32>
    %c61 = arith.constant 61 : index
    %320 = memref.load %arg7[%c61] : memref<98xf32, #tpu.memory_space<smem>>
    %321 = vector.broadcast %320 : f32 to vector<2x262xf32>
    %322 = arith.mulf %321, %299 : vector<2x262xf32>
    %323 = arith.addf %293, %322 : vector<2x262xf32>
    %c62 = arith.constant 62 : index
    %324 = memref.load %arg7[%c62] : memref<98xf32, #tpu.memory_space<smem>>
    %325 = vector.broadcast %324 : f32 to vector<2x262xf32>
    %326 = arith.mulf %325, %299 : vector<2x262xf32>
    %327 = arith.addf %297, %326 : vector<2x262xf32>
    %c1_58 = arith.constant 1 : index
    %c0_59 = arith.constant 0 : index
    %c109_60 = arith.constant 109 : index
    %328 = vector.load %arg9[%c1_58, %c0_59, %c109_60] : memref<2x2x512xf32, #tpu.memory_space<vmem>>, vector<1x2x262xf32>
    %329 = vector.shape_cast %328 : vector<1x2x262xf32> to vector<2x262xf32>
    %c63 = arith.constant 63 : index
    %330 = memref.load %arg7[%c63] : memref<98xf32, #tpu.memory_space<smem>>
    %331 = vector.broadcast %330 : f32 to vector<2x262xf32>
    %332 = arith.mulf %331, %329 : vector<2x262xf32>
    %333 = arith.addf %303, %332 : vector<2x262xf32>
    %c64 = arith.constant 64 : index
    %334 = memref.load %arg7[%c64] : memref<98xf32, #tpu.memory_space<smem>>
    %335 = vector.broadcast %334 : f32 to vector<2x262xf32>
    %336 = arith.mulf %335, %329 : vector<2x262xf32>
    %337 = arith.addf %307, %336 : vector<2x262xf32>
    %c65 = arith.constant 65 : index
    %338 = memref.load %arg7[%c65] : memref<98xf32, #tpu.memory_space<smem>>
    %339 = vector.broadcast %338 : f32 to vector<2x262xf32>
    %340 = arith.mulf %339, %329 : vector<2x262xf32>
    %341 = arith.addf %311, %340 : vector<2x262xf32>
    %c66 = arith.constant 66 : index
    %342 = memref.load %arg7[%c66] : memref<98xf32, #tpu.memory_space<smem>>
    %343 = vector.broadcast %342 : f32 to vector<2x262xf32>
    %344 = arith.mulf %343, %329 : vector<2x262xf32>
    %345 = arith.addf %315, %344 : vector<2x262xf32>
    %c67 = arith.constant 67 : index
    %346 = memref.load %arg7[%c67] : memref<98xf32, #tpu.memory_space<smem>>
    %347 = vector.broadcast %346 : f32 to vector<2x262xf32>
    %348 = arith.mulf %347, %329 : vector<2x262xf32>
    %349 = arith.addf %319, %348 : vector<2x262xf32>
    %c68 = arith.constant 68 : index
    %350 = memref.load %arg7[%c68] : memref<98xf32, #tpu.memory_space<smem>>
    %351 = vector.broadcast %350 : f32 to vector<2x262xf32>
    %352 = arith.mulf %351, %329 : vector<2x262xf32>
    %353 = arith.addf %323, %352 : vector<2x262xf32>
    %c69 = arith.constant 69 : index
    %354 = memref.load %arg7[%c69] : memref<98xf32, #tpu.memory_space<smem>>
    %355 = vector.broadcast %354 : f32 to vector<2x262xf32>
    %356 = arith.mulf %355, %329 : vector<2x262xf32>
    %357 = arith.addf %327, %356 : vector<2x262xf32>
    %c1_61 = arith.constant 1 : index
    %c0_62 = arith.constant 0 : index
    %c125_63 = arith.constant 125 : index
    %358 = vector.load %arg9[%c1_61, %c0_62, %c125_63] : memref<2x2x512xf32, #tpu.memory_space<vmem>>, vector<1x2x262xf32>
    %359 = vector.shape_cast %358 : vector<1x2x262xf32> to vector<2x262xf32>
    %c70 = arith.constant 70 : index
    %360 = memref.load %arg7[%c70] : memref<98xf32, #tpu.memory_space<smem>>
    %361 = vector.broadcast %360 : f32 to vector<2x262xf32>
    %362 = arith.mulf %361, %359 : vector<2x262xf32>
    %363 = arith.addf %333, %362 : vector<2x262xf32>
    %c71 = arith.constant 71 : index
    %364 = memref.load %arg7[%c71] : memref<98xf32, #tpu.memory_space<smem>>
    %365 = vector.broadcast %364 : f32 to vector<2x262xf32>
    %366 = arith.mulf %365, %359 : vector<2x262xf32>
    %367 = arith.addf %337, %366 : vector<2x262xf32>
    %c72 = arith.constant 72 : index
    %368 = memref.load %arg7[%c72] : memref<98xf32, #tpu.memory_space<smem>>
    %369 = vector.broadcast %368 : f32 to vector<2x262xf32>
    %370 = arith.mulf %369, %359 : vector<2x262xf32>
    %371 = arith.addf %341, %370 : vector<2x262xf32>
    %c73 = arith.constant 73 : index
    %372 = memref.load %arg7[%c73] : memref<98xf32, #tpu.memory_space<smem>>
    %373 = vector.broadcast %372 : f32 to vector<2x262xf32>
    %374 = arith.mulf %373, %359 : vector<2x262xf32>
    %375 = arith.addf %345, %374 : vector<2x262xf32>
    %c74 = arith.constant 74 : index
    %376 = memref.load %arg7[%c74] : memref<98xf32, #tpu.memory_space<smem>>
    %377 = vector.broadcast %376 : f32 to vector<2x262xf32>
    %378 = arith.mulf %377, %359 : vector<2x262xf32>
    %379 = arith.addf %349, %378 : vector<2x262xf32>
    %c75 = arith.constant 75 : index
    %380 = memref.load %arg7[%c75] : memref<98xf32, #tpu.memory_space<smem>>
    %381 = vector.broadcast %380 : f32 to vector<2x262xf32>
    %382 = arith.mulf %381, %359 : vector<2x262xf32>
    %383 = arith.addf %353, %382 : vector<2x262xf32>
    %c76 = arith.constant 76 : index
    %384 = memref.load %arg7[%c76] : memref<98xf32, #tpu.memory_space<smem>>
    %385 = vector.broadcast %384 : f32 to vector<2x262xf32>
    %386 = arith.mulf %385, %359 : vector<2x262xf32>
    %387 = arith.addf %357, %386 : vector<2x262xf32>
    %c1_64 = arith.constant 1 : index
    %c0_65 = arith.constant 0 : index
    %c141_66 = arith.constant 141 : index
    %388 = vector.load %arg9[%c1_64, %c0_65, %c141_66] : memref<2x2x512xf32, #tpu.memory_space<vmem>>, vector<1x2x262xf32>
    %389 = vector.shape_cast %388 : vector<1x2x262xf32> to vector<2x262xf32>
    %c77_67 = arith.constant 77 : index
    %390 = memref.load %arg7[%c77_67] : memref<98xf32, #tpu.memory_space<smem>>
    %391 = vector.broadcast %390 : f32 to vector<2x262xf32>
    %392 = arith.mulf %391, %389 : vector<2x262xf32>
    %393 = arith.addf %363, %392 : vector<2x262xf32>
    %c78 = arith.constant 78 : index
    %394 = memref.load %arg7[%c78] : memref<98xf32, #tpu.memory_space<smem>>
    %395 = vector.broadcast %394 : f32 to vector<2x262xf32>
    %396 = arith.mulf %395, %389 : vector<2x262xf32>
    %397 = arith.addf %367, %396 : vector<2x262xf32>
    %c79 = arith.constant 79 : index
    %398 = memref.load %arg7[%c79] : memref<98xf32, #tpu.memory_space<smem>>
    %399 = vector.broadcast %398 : f32 to vector<2x262xf32>
    %400 = arith.mulf %399, %389 : vector<2x262xf32>
    %401 = arith.addf %371, %400 : vector<2x262xf32>
    %c80 = arith.constant 80 : index
    %402 = memref.load %arg7[%c80] : memref<98xf32, #tpu.memory_space<smem>>
    %403 = vector.broadcast %402 : f32 to vector<2x262xf32>
    %404 = arith.mulf %403, %389 : vector<2x262xf32>
    %405 = arith.addf %375, %404 : vector<2x262xf32>
    %c81 = arith.constant 81 : index
    %406 = memref.load %arg7[%c81] : memref<98xf32, #tpu.memory_space<smem>>
    %407 = vector.broadcast %406 : f32 to vector<2x262xf32>
    %408 = arith.mulf %407, %389 : vector<2x262xf32>
    %409 = arith.addf %379, %408 : vector<2x262xf32>
    %c82 = arith.constant 82 : index
    %410 = memref.load %arg7[%c82] : memref<98xf32, #tpu.memory_space<smem>>
    %411 = vector.broadcast %410 : f32 to vector<2x262xf32>
    %412 = arith.mulf %411, %389 : vector<2x262xf32>
    %413 = arith.addf %383, %412 : vector<2x262xf32>
    %c83 = arith.constant 83 : index
    %414 = memref.load %arg7[%c83] : memref<98xf32, #tpu.memory_space<smem>>
    %415 = vector.broadcast %414 : f32 to vector<2x262xf32>
    %416 = arith.mulf %415, %389 : vector<2x262xf32>
    %417 = arith.addf %387, %416 : vector<2x262xf32>
    %c1_68 = arith.constant 1 : index
    %c0_69 = arith.constant 0 : index
    %c157_70 = arith.constant 157 : index
    %418 = vector.load %arg9[%c1_68, %c0_69, %c157_70] : memref<2x2x512xf32, #tpu.memory_space<vmem>>, vector<1x2x262xf32>
    %419 = vector.shape_cast %418 : vector<1x2x262xf32> to vector<2x262xf32>
    %c84 = arith.constant 84 : index
    %420 = memref.load %arg7[%c84] : memref<98xf32, #tpu.memory_space<smem>>
    %421 = vector.broadcast %420 : f32 to vector<2x262xf32>
    %422 = arith.mulf %421, %419 : vector<2x262xf32>
    %423 = arith.addf %393, %422 : vector<2x262xf32>
    %c85 = arith.constant 85 : index
    %424 = memref.load %arg7[%c85] : memref<98xf32, #tpu.memory_space<smem>>
    %425 = vector.broadcast %424 : f32 to vector<2x262xf32>
    %426 = arith.mulf %425, %419 : vector<2x262xf32>
    %427 = arith.addf %397, %426 : vector<2x262xf32>
    %c86 = arith.constant 86 : index
    %428 = memref.load %arg7[%c86] : memref<98xf32, #tpu.memory_space<smem>>
    %429 = vector.broadcast %428 : f32 to vector<2x262xf32>
    %430 = arith.mulf %429, %419 : vector<2x262xf32>
    %431 = arith.addf %401, %430 : vector<2x262xf32>
    %c87 = arith.constant 87 : index
    %432 = memref.load %arg7[%c87] : memref<98xf32, #tpu.memory_space<smem>>
    %433 = vector.broadcast %432 : f32 to vector<2x262xf32>
    %434 = arith.mulf %433, %419 : vector<2x262xf32>
    %435 = arith.addf %405, %434 : vector<2x262xf32>
    %c88 = arith.constant 88 : index
    %436 = memref.load %arg7[%c88] : memref<98xf32, #tpu.memory_space<smem>>
    %437 = vector.broadcast %436 : f32 to vector<2x262xf32>
    %438 = arith.mulf %437, %419 : vector<2x262xf32>
    %439 = arith.addf %409, %438 : vector<2x262xf32>
    %c89 = arith.constant 89 : index
    %440 = memref.load %arg7[%c89] : memref<98xf32, #tpu.memory_space<smem>>
    %441 = vector.broadcast %440 : f32 to vector<2x262xf32>
    %442 = arith.mulf %441, %419 : vector<2x262xf32>
    %443 = arith.addf %413, %442 : vector<2x262xf32>
    %c90 = arith.constant 90 : index
    %444 = memref.load %arg7[%c90] : memref<98xf32, #tpu.memory_space<smem>>
    %445 = vector.broadcast %444 : f32 to vector<2x262xf32>
    %446 = arith.mulf %445, %419 : vector<2x262xf32>
    %447 = arith.addf %417, %446 : vector<2x262xf32>
    %c1_71 = arith.constant 1 : index
    %c0_72 = arith.constant 0 : index
    %c173_73 = arith.constant 173 : index
    %448 = vector.load %arg9[%c1_71, %c0_72, %c173_73] : memref<2x2x512xf32, #tpu.memory_space<vmem>>, vector<1x2x262xf32>
    %449 = vector.shape_cast %448 : vector<1x2x262xf32> to vector<2x262xf32>
    %c91 = arith.constant 91 : index
    %450 = memref.load %arg7[%c91] : memref<98xf32, #tpu.memory_space<smem>>
    %451 = vector.broadcast %450 : f32 to vector<2x262xf32>
    %452 = arith.mulf %451, %449 : vector<2x262xf32>
    %453 = arith.addf %423, %452 : vector<2x262xf32>
    %c92 = arith.constant 92 : index
    %454 = memref.load %arg7[%c92] : memref<98xf32, #tpu.memory_space<smem>>
    %455 = vector.broadcast %454 : f32 to vector<2x262xf32>
    %456 = arith.mulf %455, %449 : vector<2x262xf32>
    %457 = arith.addf %427, %456 : vector<2x262xf32>
    %c93_74 = arith.constant 93 : index
    %458 = memref.load %arg7[%c93_74] : memref<98xf32, #tpu.memory_space<smem>>
    %459 = vector.broadcast %458 : f32 to vector<2x262xf32>
    %460 = arith.mulf %459, %449 : vector<2x262xf32>
    %461 = arith.addf %431, %460 : vector<2x262xf32>
    %c94 = arith.constant 94 : index
    %462 = memref.load %arg7[%c94] : memref<98xf32, #tpu.memory_space<smem>>
    %463 = vector.broadcast %462 : f32 to vector<2x262xf32>
    %464 = arith.mulf %463, %449 : vector<2x262xf32>
    %465 = arith.addf %435, %464 : vector<2x262xf32>
    %c95 = arith.constant 95 : index
    %466 = memref.load %arg7[%c95] : memref<98xf32, #tpu.memory_space<smem>>
    %467 = vector.broadcast %466 : f32 to vector<2x262xf32>
    %468 = arith.mulf %467, %449 : vector<2x262xf32>
    %469 = arith.addf %439, %468 : vector<2x262xf32>
    %c96 = arith.constant 96 : index
    %470 = memref.load %arg7[%c96] : memref<98xf32, #tpu.memory_space<smem>>
    %471 = vector.broadcast %470 : f32 to vector<2x262xf32>
    %472 = arith.mulf %471, %449 : vector<2x262xf32>
    %473 = arith.addf %443, %472 : vector<2x262xf32>
    %c97 = arith.constant 97 : index
    %474 = memref.load %arg7[%c97] : memref<98xf32, #tpu.memory_space<smem>>
    %475 = vector.broadcast %474 : f32 to vector<2x262xf32>
    %476 = arith.mulf %475, %449 : vector<2x262xf32>
    %477 = arith.addf %447, %476 : vector<2x262xf32>
    %cst_75 = arith.constant 0.000000e+00 : f32
    %478 = vector.broadcast %cst_75 : f32 to vector<2x256xf32>
    %479 = vector.extract_strided_slice %453 {offsets = [0, 0], sizes = [2, 256], strides = [1, 1]} : vector<2x262xf32> to vector<2x256xf32>
    %c3_i32 = arith.constant 3 : i32
    %480 = vector.broadcast %c3_i32 : i32 to vector<2x256xi32>
    %481 = arith.cmpi sge, %50, %480 : vector<2x256xi32>
    %cst_76 = arith.constant 0.000000e+00 : f32
    %482 = vector.broadcast %cst_76 : f32 to vector<2x256xf32>
    %483 = arith.select %481, %479, %482 : vector<2x256xi1>, vector<2x256xf32>
    %484 = arith.addf %478, %483 : vector<2x256xf32>
    %485 = vector.extract_strided_slice %457 {offsets = [0, 1], sizes = [2, 256], strides = [1, 1]} : vector<2x262xf32> to vector<2x256xf32>
    %c2_i32 = arith.constant 2 : i32
    %486 = vector.broadcast %c2_i32 : i32 to vector<2x256xi32>
    %487 = arith.cmpi sge, %50, %486 : vector<2x256xi32>
    %cst_77 = arith.constant 0.000000e+00 : f32
    %488 = vector.broadcast %cst_77 : f32 to vector<2x256xf32>
    %489 = arith.select %487, %485, %488 : vector<2x256xi1>, vector<2x256xf32>
    %490 = arith.addf %484, %489 : vector<2x256xf32>
    %491 = vector.extract_strided_slice %461 {offsets = [0, 2], sizes = [2, 256], strides = [1, 1]} : vector<2x262xf32> to vector<2x256xf32>
    %c1_i32_78 = arith.constant 1 : i32
    %492 = vector.broadcast %c1_i32_78 : i32 to vector<2x256xi32>
    %493 = arith.cmpi sge, %50, %492 : vector<2x256xi32>
    %cst_79 = arith.constant 0.000000e+00 : f32
    %494 = vector.broadcast %cst_79 : f32 to vector<2x256xf32>
    %495 = arith.select %493, %491, %494 : vector<2x256xi1>, vector<2x256xf32>
    %496 = arith.addf %490, %495 : vector<2x256xf32>
    %497 = vector.extract_strided_slice %465 {offsets = [0, 3], sizes = [2, 256], strides = [1, 1]} : vector<2x262xf32> to vector<2x256xf32>
    %498 = arith.addf %496, %497 : vector<2x256xf32>
    %499 = vector.extract_strided_slice %469 {offsets = [0, 4], sizes = [2, 256], strides = [1, 1]} : vector<2x262xf32> to vector<2x256xf32>
    %c15_i32 = arith.constant 15 : i32
    %500 = vector.broadcast %c15_i32 : i32 to vector<2x256xi32>
    %501 = arith.cmpi slt, %50, %500 : vector<2x256xi32>
    %cst_80 = arith.constant 0.000000e+00 : f32
    %502 = vector.broadcast %cst_80 : f32 to vector<2x256xf32>
    %503 = arith.select %501, %499, %502 : vector<2x256xi1>, vector<2x256xf32>
    %504 = arith.addf %498, %503 : vector<2x256xf32>
    %505 = vector.extract_strided_slice %473 {offsets = [0, 5], sizes = [2, 256], strides = [1, 1]} : vector<2x262xf32> to vector<2x256xf32>
    %c14_i32 = arith.constant 14 : i32
    %506 = vector.broadcast %c14_i32 : i32 to vector<2x256xi32>
    %507 = arith.cmpi slt, %50, %506 : vector<2x256xi32>
    %cst_81 = arith.constant 0.000000e+00 : f32
    %508 = vector.broadcast %cst_81 : f32 to vector<2x256xf32>
    %509 = arith.select %507, %505, %508 : vector<2x256xi1>, vector<2x256xf32>
    %510 = arith.addf %504, %509 : vector<2x256xf32>
    %511 = vector.extract_strided_slice %477 {offsets = [0, 6], sizes = [2, 256], strides = [1, 1]} : vector<2x262xf32> to vector<2x256xf32>
    %c13_i32 = arith.constant 13 : i32
    %512 = vector.broadcast %c13_i32 : i32 to vector<2x256xi32>
    %513 = arith.cmpi slt, %50, %512 : vector<2x256xi32>
    %cst_82 = arith.constant 0.000000e+00 : f32
    %514 = vector.broadcast %cst_82 : f32 to vector<2x256xf32>
    %515 = arith.select %513, %511, %514 : vector<2x256xi1>, vector<2x256xf32>
    %516 = arith.addf %510, %515 : vector<2x256xf32>
    %517 = arith.negf %516 : vector<2x256xf32>
    %518 = math.exp %517 : vector<2x256xf32>
    %cst_83 = arith.constant 1.000000e+00 : f32
    %519 = vector.broadcast %cst_83 : f32 to vector<2x256xf32>
    %520 = arith.addf %519, %518 : vector<2x256xf32>
    %521 = arith.divf %519, %520 : vector<2x256xf32>
    %c0_84 = arith.constant 0 : index
    %c0_85 = arith.constant 0 : index
    %522 = vector.load %arg2[%c0_84, %c0_85] : memref<8x512xf32, #tpu.memory_space<vmem>>, vector<8x512xf32>
    %c0_86 = arith.constant 0 : index
    %c0_87 = arith.constant 0 : index
    %523 = vector.load %arg5[%c0_86, %c0_87] : memref<32x8xf32, #tpu.memory_space<vmem>>, vector<32x8xf32>
    %cst_88 = arith.constant dense<0.000000e+00> : vector<32x512xf32>
    %524 = tpu.matmul %523, %522, %cst_88 {dimension_numbers = #tpu.dot_dimension_numbers<[1], [0], [0], [1], [0, 0, 1, 1], [], []>, precision = #tpu.contract_precision<fp32>} : vector<32x8xf32>, vector<8x512xf32>, vector<32x512xf32> -> vector<32x512xf32>
    %c0_89 = arith.constant 0 : index
    %c0_90 = arith.constant 0 : index
    %525 = vector.load %arg6[%c0_89, %c0_90] : memref<32x1xf32, #tpu.memory_space<vmem>>, vector<32x1xf32>
    %526 = vector.broadcast %525 : vector<32x1xf32> to vector<32x512xf32>
    %527 = arith.addf %524, %526 : vector<32x512xf32>
    %c0_91 = arith.constant 0 : index
    %c0_92 = arith.constant 0 : index
    %c0_93 = arith.constant 0 : index
    %528 = vector.load %arg1[%c0_91, %c0_92, %c0_93] : memref<2x32x256xf32, #tpu.memory_space<vmem>>, vector<1x32x256xf32>
    %529 = vector.shape_cast %528 : vector<1x32x256xf32> to vector<32x256xf32>
    %530 = vector.extract_strided_slice %23 {offsets = [0, 0], sizes = [32, 1], strides = [1, 1]} : vector<32x2xf32> to vector<32x1xf32>
    %531 = vector.extract_strided_slice %521 {offsets = [0, 0], sizes = [1, 256], strides = [1, 1]} : vector<2x256xf32> to vector<1x256xf32>
    %532 = vector.broadcast %530 : vector<32x1xf32> to vector<32x256xf32>
    %533 = vector.broadcast %531 : vector<1x256xf32> to vector<32x256xf32>
    %534 = arith.addf %532, %533 : vector<32x256xf32>
    %535 = arith.mulf %529, %534 : vector<32x256xf32>
    %536 = vector.extract_strided_slice %527 {offsets = [0, 0], sizes = [32, 256], strides = [1, 1]} : vector<32x512xf32> to vector<32x256xf32>
    %537 = arith.addf %535, %536 : vector<32x256xf32>
    %c0_94 = arith.constant 0 : index
    %c0_95 = arith.constant 0 : index
    %c0_96 = arith.constant 0 : index
    %538 = vector.load %arg8[%c0_94, %c0_95, %c0_96] : memref<2x32x256xf32, #tpu.memory_space<vmem>>, vector<1x32x256xf32>
    %539 = vector.shape_cast %538 : vector<1x32x256xf32> to vector<32x256xf32>
    %540 = vector.shape_cast %537 : vector<32x256xf32> to vector<1x32x256xf32>
    tpu.vector_store %arg8[%c0_94, %c0_95, %c0_96], %540 {strides = array<i32>} : memref<2x32x256xf32, #tpu.memory_space<vmem>>, vector<1x32x256xf32>,
    %c1_97 = arith.constant 1 : index
    %c0_98 = arith.constant 0 : index
    %c0_99 = arith.constant 0 : index
    %541 = vector.load %arg1[%c1_97, %c0_98, %c0_99] : memref<2x32x256xf32, #tpu.memory_space<vmem>>, vector<1x32x256xf32>
    %542 = vector.shape_cast %541 : vector<1x32x256xf32> to vector<32x256xf32>
    %543 = vector.extract_strided_slice %23 {offsets = [0, 1], sizes = [32, 1], strides = [1, 1]} : vector<32x2xf32> to vector<32x1xf32>
    %544 = vector.extract_strided_slice %521 {offsets = [1, 0], sizes = [1, 256], strides = [1, 1]} : vector<2x256xf32> to vector<1x256xf32>
    %545 = vector.broadcast %543 : vector<32x1xf32> to vector<32x256xf32>
    %546 = vector.broadcast %544 : vector<1x256xf32> to vector<32x256xf32>
    %547 = arith.addf %545, %546 : vector<32x256xf32>
    %548 = arith.mulf %542, %547 : vector<32x256xf32>
    %549 = vector.extract_strided_slice %527 {offsets = [0, 256], sizes = [32, 256], strides = [1, 1]} : vector<32x512xf32> to vector<32x256xf32>
    %550 = arith.addf %548, %549 : vector<32x256xf32>
    %c1_100 = arith.constant 1 : index
    %c0_101 = arith.constant 0 : index
    %c0_102 = arith.constant 0 : index
    %551 = vector.load %arg8[%c1_100, %c0_101, %c0_102] : memref<2x32x256xf32, #tpu.memory_space<vmem>>, vector<1x32x256xf32>
    %552 = vector.shape_cast %551 : vector<1x32x256xf32> to vector<32x256xf32>
    %553 = vector.shape_cast %550 : vector<32x256xf32> to vector<1x32x256xf32>
    tpu.vector_store %arg8[%c1_100, %c0_101, %c0_102], %553 {strides = array<i32>} : memref<2x32x256xf32, #tpu.memory_space<vmem>>, vector<1x32x256xf32>,
    return
  }
  func.func @transform_0(%arg0: i32) -> (i32, i32, i32) {
    %c0_i32 = arith.constant 0 : i32
    %c0_i32_0 = arith.constant 0 : i32
    %c0_i32_1 = arith.constant 0 : i32
    return %arg0, %c0_i32, %c0_i32_0 : i32, i32, i32
  }
  func.func @transform_1(%arg0: i32) -> (i32, i32) {
    %c0_i32 = arith.constant 0 : i32
    %c0_i32_0 = arith.constant 0 : i32
    return %c0_i32, %arg0 : i32, i32
  }
  func.func @transform_2(%arg0: i32) -> (i32, i32) {
    %c0_i32 = arith.constant 0 : i32
    %c0_i32_0 = arith.constant 0 : i32
    %c0_i32_1 = arith.constant 0 : i32
    return %c0_i32, %c0_i32_0 : i32, i32
  }
  func.func @transform_3(%arg0: i32) -> (i32, i32) {
    %c0_i32 = arith.constant 0 : i32
    %c0_i32_0 = arith.constant 0 : i32
    %c0_i32_1 = arith.constant 0 : i32
    return %c0_i32, %c0_i32_0 : i32, i32
  }
  func.func @transform_4(%arg0: i32) -> (i32, i32) {
    %c0_i32 = arith.constant 0 : i32
    %c0_i32_0 = arith.constant 0 : i32
    %c0_i32_1 = arith.constant 0 : i32
    return %c0_i32, %c0_i32_0 : i32, i32
  }
  func.func @transform_5(%arg0: i32) -> (i32, i32) {
    %c0_i32 = arith.constant 0 : i32
    %c0_i32_0 = arith.constant 0 : i32
    %c0_i32_1 = arith.constant 0 : i32
    return %c0_i32, %c0_i32_0 : i32, i32
  }
  func.func @transform_6(%arg0: i32) -> i32 {
    %c0_i32 = arith.constant 0 : i32
    %c0_i32_0 = arith.constant 0 : i32
    return %c0_i32 : i32
  }
  func.func @transform_7(%arg0: i32) -> (i32, i32, i32) {
    %c0_i32 = arith.constant 0 : i32
    %c0_i32_0 = arith.constant 0 : i32
    %c0_i32_1 = arith.constant 0 : i32
    return %arg0, %c0_i32, %c0_i32_0 : i32, i32, i32
  }
}

</mosaic_0001>

<bundles_post_ra>
// kernel: tpu_custom_call.1
= control target key start
LH: loop header
LB: loop body
LE: loop exit
PB: predicated region body
PF: predicated region fallthrough
CT: control target
= control target key end

     0   :  { %12 = vsyncpa [#allocation4], 0  ;;  %s5923_s0 = inlined_call_operand.hbm [shape: f32[2,32,256], index: 0, kind: input, shape index: {}]   ;;  %s5924_s1 = inlined_call_operand.vmem [shape: f32[8,512], index: 1, kind: input, shape index: {}]   ;;  %s5925_s2 = inlined_call_operand.vmem [shape: f32[2,32], index: 2, kind: input, shape index: {}]   ;;  %s5926_s3 = inlined_call_operand.vmem [shape: f32[32,2], index: 3, kind: input, shape index: {}]   ;;  %s5927_s4 = inlined_call_operand.vmem [shape: f32[32,8], index: 4, kind: input, shape index: {}]   ;;  %s5928_s5 = inlined_call_operand.vmem [shape: f32[32,1], index: 5, kind: input, shape index: {}]   ;;  %s5929_s6 = inlined_call_operand.vmem [shape: f32[98], index: 6, kind: input, shape index: {}]   ;;  %s5930_s7 = inlined_call_operand.hbm [shape: f32[2,32,256], index: 7, kind: output, shape index: {}]  }
   0x1   :  { %13 = vsyncpa [#allocation6], 0 }
   0x2   :  { %14 = vsyncpa [#allocation5], 0  ;;  %s4542_s24 = smov [#allocation3]   ;;  %s43_s28 = sshll.u32 %s5929_s6, 4  ;;  %s44_s28 = int_to_ptr.vmem [resolvable:$true] %s43_s28 }
   0x3   :  { %s20_s25 = sshll.u32 %s4542_s24, 4  ;;  %s4480_s8 = scalar_lea.hbm %s5923_s0, 2048  ;;  %s21_s25 = int_to_ptr.vmem [resolvable:$true] %s20_s25 }
   0x4   :  { %p4481_p0 = scmp.ne.s32.totalorder %s5923_s0, %s4480_s8  ;;  %p4484_p1 = scmp.lt.u32.totalorder %s4480_s8, %s5923_s0 }
   0x6   :  { %p4486_p2 = pnand %p4484_p1, %p4481_p0 }
   0x8   :  { %4489 = shalt.err (!%p4486_p2)
}
   0x9   :  { %s4490_s13 = scalar_lea.vmem %s21_s25, 2048  ;;  %p4495_p4 = scmp.lt.s32.totalorder %s21_s25, %s21_s25 }
   0xa   :  { %p4491_p3 = scmp.ne.s32.totalorder %s21_s25, %s4490_s13  ;;  %p4496_p5 = scmp.lt.s32.totalorder %s4490_s13, %s4490_s13 }
   0xc   :  { %p4497_p6 = por %p4496_p5, %p4495_p4 }
   0xe   :  { %p4498_p7 = pnand %p4497_p6, %p4491_p3 }
  0x10   :  { %4501 = shalt.err (!%p4498_p7)
}
  0x11   :  { %s4543_s6 = smov 256   ;;  %s4544_s14 = smov 16  }
  0x12   :  { %26 = dma.hbm_to_vmem [thread:$0]  %s5923_s0, 2048, %s21_s25, [#allocation4], %s4543_s6, %s4543_s6, %s4544_s14  }
  0x13   :  { %s4502_s17 = scalar_lea.vmem %s44_s28, 16  ;;  %p4507_p9 = scmp.lt.s32.totalorder %s44_s28, %s44_s28 }
  0x14   :  { %p4503_p8 = scmp.ne.s32.totalorder %s44_s28, %s4502_s17  ;;  %p4508_p10 = scmp.lt.s32.totalorder %s4502_s17, %s4502_s17 }
  0x16   :  { %p4509_p11 = por %p4508_p10, %p4507_p9 }
  0x18   :  { %p4510_p12 = pnand %p4509_p11, %p4503_p8 }
  0x1a   :  { %4513 = shalt.err (!%p4510_p12)
}
  0x1b   :  { %s4545_s18 = smov [#allocation7]  }
  0x1c   :  { %46 = dma.vmem_to_smem %s44_s28, 16, %s4545_s18, [#allocation6]  }
  0x1d   :  { %4536 = dma.done.wait [#allocation4], 2048  }
  0x1e   :  { %4537 = vsyncadd [#allocation4], 4294965248 }
  0x1f   :  { %4538 = dma.done.wait [#allocation6], 16  }
  0x20   :  { %4539 = vsyncadd [#allocation6], 4294967280 }
  0x21   :  { %53 = sfence }
  0x22   :  { %v4623_v0 = vld [vmem:[#allocation3 + $0x40] sm:$0xff]  ;;  %v4625_v1 = vld [vmem:[#allocation3 + $0x48] sm:$0xff]  ;;  %v4633_v5 = vld [vmem:[#allocation3 + $0x50] sm:$0xff]  ;;  %vm258_vm0 = vcmask 1041409   ;;  %vm307_vm1 = vcmask 1043459   ;;  %vm1437_vm2 = vcmask 1045509  }
  0x23   :  { %v4627_v2 = vld [vmem:[#allocation3] sm:$0xff]  ;;  %v82_v3 = vadd.f32 %v4625_v1, %v4623_v0  ;;  %v4631_v4 = vld [vmem:[#allocation3 + $0x8] sm:$0xff]  ;;  %v4635_v6 = vld [vmem:[#allocation3 + $0x58] sm:$0xff]  ;;  %v145_v8 = vadd.f32 %v4633_v5, %v4623_v0  ;;  %v186_v13 = vmax.f32 %v4623_v0, %v4633_v5  ;;  %vm1439_vm3 = vcmask 1047559   ;;  %s4082_s0 = sld [smem:[#allocation7 + $0x8]]  ;;  %s4081_s19 = sld [smem:[#allocation7 + $0x7]] }
  0x24   :  { %v70_v7 = vadd.f32 %v4631_v4, %v4627_v2  ;;  %v154_v9 = vadd.f32 %v4635_v6, %v4625_v1  ;;  %v4643_v10 = vld [vmem:[#allocation3 + $0x10] sm:$0xff]  ;;  %v4645_v11 = vld [vmem:[#allocation3 + $0x18] sm:$0xff]  ;;  %v85_v12 = vadd.f32 %v4635_v6, %v4633_v5  ;;  %v195_v14 = vmax.f32 %v4625_v1, %v4635_v6  ;;  %v4659_v18 = vld [vmem:[#allocation3 + $0x60] sm:$0xff]  ;;  %s4084_s20 = sld [smem:[#allocation7 + $0xa]]  ;;  %s4083_s21 = sld [smem:[#allocation7 + $0x9]] }
  0x25   :  { %83 = vadd.xlane.f32.xlu1 %v82_v3  ;;  %v127_v15 = vadd.f32 %v4643_v10, %v4627_v2  ;;  %v73_v16 = vadd.f32 %v4645_v11, %v4643_v10  ;;  %v136_v17 = vadd.f32 %v4645_v11, %v4631_v4  ;;  %v4661_v19 = vld [vmem:[#allocation3 + $0x68] sm:$0xff]  ;;  %v146_v20 = vadd.f32 %v145_v8, %v4659_v18  ;;  %v4667_v24 = vld [vmem:[#allocation3 + $0x20] sm:$0xff]  ;;  %v4677_v30 = vld [vmem:[#allocation3 + $0x70] sm:$0xff]  ;;  %s4086_s22 = sld [smem:[#allocation7 + $0xc]]  ;;  %s4085_s23 = sld [smem:[#allocation7 + $0xb]] }
  0x26   :  { %71 = vadd.xlane.f32.xlu0 %v70_v7  ;;  %v155_v21 = vadd.f32 %v154_v9, %v4661_v19  ;;  %v187_v22 = vmax.f32 %v186_v13, %v4659_v18  ;;  %v196_v23 = vmax.f32 %v195_v14, %v4661_v19  ;;  %v4669_v25 = vld [vmem:[#allocation3 + $0x28] sm:$0xff]  ;;  %v168_v26 = vmax.f32 %v4627_v2, %v4643_v10  ;;  %v4679_v31 = vld [vmem:[#allocation3 + $0x78] sm:$0xff]  ;;  %v4688_v37 = vld [vmem:[#allocation3 + $0x30] sm:$0xff]  ;;  %s4088_s24 = sld [smem:[#allocation7 + $0xe]]  ;;  %s4087_s25 = sld [smem:[#allocation7 + $0xd]] }
  0x27   :  { %v177_v27 = vmax.f32 %v4631_v4, %v4645_v11  ;;  %v128_v28 = vadd.f32 %v127_v15, %v4667_v24  ;;  %v137_v29 = vadd.f32 %v136_v17, %v4669_v25  ;;  %v88_v32 = vadd.f32 %v4661_v19, %v4659_v18  ;;  %v4691_v41 = vld [vmem:[#allocation3 + $0x38] sm:$0xff]  ;;  %s4549_s26 = smov 112   ;;  %s4090_s27 = sld [smem:[#allocation7 + $0x10]] }
  0x28   :  { %v147_v33 = vadd.f32 %v146_v20, %v4677_v30  ;;  %v156_v34 = vadd.f32 %v155_v21, %v4679_v31  ;;  %v76_v35 = vadd.f32 %v4669_v25, %v4667_v24  ;;  %v188_v36 = vmax.f32 %v187_v22, %v4677_v30  ;;  %s4089_s28 = sld [smem:[#allocation7 + $0xf]]  ;;  %s4092_s29 = sld [smem:[#allocation7 + $0x12]] }
  0x29   :  { %86 = vadd.xlane.f32.xlu1 %v85_v12  ;;  %v197_v40 = vmax.f32 %v196_v23, %v4679_v31  ;;  %v129_v42 = vadd.f32 %v128_v28, %v4688_v37  ;;  %v169_v43 = vmax.f32 %v168_v26, %v4667_v24  ;;  %v178_v44 = vmax.f32 %v177_v27, %v4669_v25  ;;  %s4091_s30 = sld [smem:[#allocation7 + $0x11]]  ;;  %s4094_s8 = sld [smem:[#allocation7 + $0x14]] }
  0x2a   :  { %74 = vadd.xlane.f32.xlu0 %v73_v16  ;;  %v148_v38 = vrot.slane %v147_v33, 4  ;;  %v157_v39 = vrot.slane %v156_v34, 4  ;;  %v138_v45 = vadd.f32 %v137_v29, %v4691_v41  ;;  %v91_v46 = vadd.f32 %v4679_v31, %v4677_v30  ;;  %s4093_s9 = sld [smem:[#allocation7 + $0x13]]  ;;  %s4550_s10 = smov 96  }
  0x2b   :  { %v189_v47 = vrot.slane %v188_v36, 4  ;;  %v79_v48 = vadd.f32 %v4691_v41, %v4688_v37  ;;  %v198_v51 = vrot.slane %v197_v40, 4  ;;  %v130_v52 = vrot.slane %v129_v42, 4  ;;  %s4095_s13 = sld [smem:[#allocation7 + $0x15]]  ;;  %s4098_s15 = sld [smem:[#allocation7 + $0x18]] }
  0x2c   :  { %v149_v49 = vadd.f32 %v148_v38, %v147_v33  ;;  %v158_v50 = vadd.f32 %v157_v39, %v156_v34  ;;  %v139_v53 = vrot.slane %v138_v45, 4  ;;  %v170_v54 = vmax.f32 %v169_v43, %v4688_v37  ;;  %s4097_s16 = sld [smem:[#allocation7 + $0x17]]  ;;  %s4112_s11 = sld [smem:[#allocation7 + $0x26]] }
  0x2d   :  { %89 = vadd.xlane.f32.xlu1 %v88_v32  ;;  %v179_v55 = vmax.f32 %v178_v44, %v4691_v41  ;;  %v190_v56 = vmax.f32 %v188_v36, %v189_v47  ;;  %v199_v59 = vmax.f32 %v197_v40, %v198_v51  ;;  %v131_v60 = vadd.f32 %v130_v52, %v129_v42  ;;  %s4111_s12 = sld [smem:[#allocation7 + $0x25]]  ;;  %s4115_s17 = sld [smem:[#allocation7 + $0x29]] }
  0x2e   :  { %77 = vadd.xlane.f32.xlu0 %v76_v35  ;;  %v150_v57 = vrot.slane %v149_v49, 2  ;;  %v159_v58 = vrot.slane %v158_v50, 2  ;;  %v140_v61 = vadd.f32 %v139_v53, %v138_v45  ;;  %v171_v62 = vrot.slane %v170_v54, 4  ;;  %s4118_s18 = sld [smem:[#allocation7 + $0x2c]] }
  0x2f   :  { %v180_v63 = vrot.slane %v179_v55, 4  ;;  %v191_v3 = vrot.slane %v190_v56, 2  ;;  %v200_v9 = vrot.slane %v199_v59, 2  ;;  %v132_v12 = vrot.slane %v131_v60, 2 }
  0x30   :  { %v151_v7 = vadd.f32 %v150_v57, %v149_v49  ;;  %v160_v8 = vadd.f32 %v159_v58, %v158_v50  ;;  %v141_v13 = vrot.slane %v140_v61, 2  ;;  %v172_v14 = vmax.f32 %v170_v54, %v171_v62 }
  0x31   :  { %92 = vadd.xlane.f32.xlu1 %v91_v46  ;;  %v181_v15 = vmax.f32 %v179_v55, %v180_v63  ;;  %v106_v16 = vmax.f32 %v4643_v10, %v4645_v11  ;;  %v103_v17 = vmax.f32 %v4627_v2, %v4631_v4  ;;  %v192_v20 = vmax.f32 %v190_v56, %v191_v3 }
  0x32   :  { %80 = vadd.xlane.f32.xlu0 %v79_v48  ;;  %v118_v21 = vmax.f32 %v4633_v5, %v4635_v6  ;;  %v152_v22 = vrot.slane %v151_v7, 1  ;;  %v161_v23 = vrot.slane %v160_v8, 1  ;;  %v201_v26 = vmax.f32 %v199_v59, %v200_v9 }
  0x33   :  { %v115_v27 = vmax.f32 %v4623_v0, %v4625_v1  ;;  %v133_v28 = vadd.f32 %v132_v12, %v131_v60  ;;  %v142_v29 = vadd.f32 %v141_v13, %v140_v61  ;;  %v173_v32 = vrot.slane %v172_v14, 2 }
  0x34   :  { %v182_v33 = vrot.slane %v181_v15, 2  ;;  %v193_v10 = vrot.slane %v192_v20, 1  ;;  %v4546_v11 = vmov 1983009808   ;;  %v121_v2 = vmax.f32 %v4659_v18, %v4661_v19 }
  0x35   :  { %107 = vmax.xlane.f32.xlu1 %v106_v16  ;;  %v1416_v34 = vunpack.c.l.s4 %v4546_v11  ;;  %v153_v4 = vadd.f32 %v152_v22, %v151_v7  ;;  %v162_v5 = vadd.f32 %v161_v23, %v160_v8  ;;  %v202_v6 = vrot.slane %v201_v26, 1 }
  0x36   :  { %104 = vmax.xlane.f32.xlu0 %v103_v17  ;;  %v109_v35 = vmax.f32 %v4667_v24, %v4669_v25  ;;  %v134_v36 = vrot.slane %v133_v28, 1  ;;  %v143_v0 = vrot.slane %v142_v29, 1  ;;  %v174_v1 = vmax.f32 %v172_v14, %v173_v32 }
  0x37   :  { %v183_v38 = vmax.f32 %v181_v15, %v182_v33  ;;  %v212_v39 = vlaneseq  ;;  %v194_v40 = vmax.f32 %v192_v20, %v193_v10  ;;  %v1417_v42 = vunpack.c.0.s8 %v1416_v34 }
  0x38   :  { %v124_v43 = vmax.f32 %v4677_v30, %v4679_v31  ;;  %v166_v44 = vmul.f32 0.03125, %v153_v4  ;;  %v167_v18 = vmul.f32 0.03125, %v162_v5  ;;  %v203_v19 = vmax.f32 %v201_v26, %v202_v6 }
  0x39   :  { %119 = vmax.xlane.f32.xlu1 %v118_v21  ;;  %v112_v45 = vmax.f32 %v4688_v37, %v4691_v41  ;;  %v135_v46 = vadd.f32 %v134_v36, %v133_v28  ;;  %v144_v24 = vadd.f32 %v143_v0, %v142_v29  ;;  %v175_v25 = vrot.slane %v174_v1, 1 }
  0x3a   :  { %116 = vmax.xlane.f32.xlu0 %v115_v27  ;;  %v184_v47 = vrot.slane %v183_v38, 1  ;;  %v4720_v48 = vshrl.u32 %v212_v39, 7  ;;  %v1422_v50 = vcombine.low %v166_v44, %v167_v18  ;;  %v1455_v30 = vcombine.low %v194_v40, %v203_v19 }
  0x3b   :  { %v164_v31 = vmul.f32 0.03125, %v135_v46  ;;  %v165_v51 = vmul.f32 0.03125, %v144_v24  ;;  %v176_v52 = vmax.f32 %v174_v1, %v175_v25  ;;  %v5937_v62 = vmov 0.0  }
  0x3c   :  { %5970 = vst [vmem:[#allocation12_spill] sm:$0xff] %v4720_v48  ;;  %v4723_v49 = vsub.s32 %v1417_v42, %v4720_v48  ;;  %v185_v53 = vmax.f32 %v183_v38, %v184_v47  ;;  %1406 = vst [vmem:[#allocation2] sm:$0x3] %v5937_v62  ;;  %4216 = vmatprep.subr.mxu0 %v5937_v62  ;;  %vm4548_vm4 = vmmov 0   ;;  %v1539_v14 = vstv %s4082_s0  ;;  %s4100_s0 = sld [smem:[#allocation7 + $0x1a]] }
  0x3d   :  { %122 = vmax.xlane.f32.xlu1 %v121_v2  ;;  %v1414_v54 = vcombine.low %v164_v31, %v165_v51  ;;  %1407 = vst [vmem:[#allocation2 + $0x8] sm:$0x3] %v5937_v62  ;;  %1408 = vst [vmem:[#allocation2 + $0x6] sm:$0x3] %v5937_v62  ;;  %4218 = vmatprep.mubr.msk.f32.mxu0 %vm4548_vm4, %v5937_v62  ;;  %v1528_v16 = vstv %s4081_s19  ;;  %v1559_v17 = vstv %s4084_s20  ;;  %v1549_v21 = vstv %s4083_s21  ;;  %s4551_s19 = smov 80   ;;  %s4099_s20 = sld [smem:[#allocation7 + $0x19]] }
  0x3e   :  { %110 = vmax.xlane.f32.xlu0 %v109_v35  ;;  %5971 = vst [vmem:[#allocation13_spill] sm:$0xff] %v4723_v49  ;;  %v1429_v37 = vrot.slane %v1422_v50, %v4723_v49  ;;  %v1462_v41 = vrot.slane %v1455_v30, %v4723_v49  ;;  %v1447_v55 = vcombine.low %v176_v52, %v185_v53  ;;  %1409 = vst [vmem:[#allocation2 + $0xe] sm:$0x3] %v5937_v62  ;;  %vm313_vm5 = vcmask 261120   ;;  %v312_v50 = vld [vmem:[%s5925_s2] sm:$0x3] }
  0x3f   :  { %v1421_v58 = vrot.slane %v1414_v54, %v4723_v49  ;;  %v1579_v26 = vstv %s4086_s22  ;;  %v1569_v27 = vstv %s4085_s23  ;;  %v1599_v32 = vstv %s4088_s24  ;;  %s4096_s2 = sld [smem:[#allocation7 + $0x16]]  ;;  %s4102_s21 = sld [smem:[#allocation7 + $0x1c]] }
  0x40   :  { %v1434_v56 = vrot.slane %v1429_v37, 7  ;;  %v1465_v57 = vrot.slane %v1462_v41, 7  ;;  %v1454_v59 = vrot.slane %v1447_v55, %v4723_v49  ;;  %v1589_v33 = vstv %s4087_s25  ;;  %s4101_s22 = sld [smem:[#allocation7 + $0x1b]]  ;;  %s4104_s23 = sld [smem:[#allocation7 + $0x1e]] }
  0x41   :  { %125 = vmax.xlane.f32.xlu1 %v124_v43  ;;  %v1620_v34 = vstv %s4090_s27  ;;  %v1610_v2 = vstv %s4089_s28  ;;  %v1640_v6 = vstv %s4092_s29  ;;  %v1630_v35 = vstv %s4091_s30  ;;  %s4103_s24 = sld [smem:[#allocation7 + $0x1d]]  ;;  %s4106_s25 = sld [smem:[#allocation7 + $0x20]] }
  0x42   :  { %113 = vmax.xlane.f32.xlu0 %v112_v45  ;;  %v1435_v60 = vsel %vm258_vm0, %v1434_v56, %v1421_v58  ;;  %v1466_v61 = vsel %vm258_vm0, %v1465_v57, %v1454_v59  ;;  %v1660_v1 = vstv %s4094_s8  ;;  %v1650_v38 = vstv %s4093_s9  ;;  %s4552_s27 = smov 64   ;;  %s4105_s28 = sld [smem:[#allocation7 + $0x1f]] }
  0x43   :  { %v1436_v63 = vsel %vm307_vm1, %v1434_v56, %v1435_v60  ;;  %v1467_v3 = vsel %vm307_vm1, %v1465_v57, %v1466_v61  ;;  %v4755_v47 = vand.u32 127, %v212_v39  ;;  %v315_v52 = vsel %vm313_vm5, %v312_v50, 0  ;;  %s4108_s29 = sld [smem:[#allocation7 + $0x22]]  ;;  %s4107_s30 = sld [smem:[#allocation7 + $0x21]] }
  0x44   :  { %v1438_v7 = vsel %vm1437_vm2, %v1434_v56, %v1436_v63  ;;  %v1468_v8 = vsel %vm1437_vm2, %v1465_v57, %v1467_v3  ;;  %vm223_vm6 = vcmask 130112   ;;  %vm230_vm7 = vcmask 195712   ;;  %s4110_s8 = sld [smem:[#allocation7 + $0x24]]  ;;  %s4109_s9 = sld [smem:[#allocation7 + $0x23]] }
  0x45   :  { %v1440_v9 = vsel %vm1439_vm3, %v1434_v56, %v1438_v7  ;;  %v1469_v12 = vsel %vm1439_vm3, %v1465_v57, %v1468_v8  ;;  %5972 = vst [vmem:[#allocation14_spill] sm:$0xff] %v4755_v47  ;;  %v218_v30 = vadd.s32 4294967288, %v4755_v47  ;;  %v225_v31 = vadd.s32 4294967280, %v4755_v47 }
  0x46   :  { %1442 = vst [vmem:[#allocation2 + $0x2] sm:$0xf] %v1440_v9  ;;  %1472 = vst [vmem:[#allocation2 + $0xa] sm:$0xf] %v1469_v12  ;;  %v232_v53 = vadd.s32 4294967272, %v4755_v47  ;;  %v216_v41 = vsub.s32 %v4755_v47, %v4720_v48  ;;  %v4768_v56 = vand.u32 4294901760, %v315_v52 }
  0x47   :  { %v221_v39 = vsub.s32 %v218_v30, %v4720_v48  ;;  %v228_v55 = vsub.s32 %v225_v31, %v4720_v48  ;;  %vm237_vm8 = vcmask 261312   ;;  %vm310_vm9 = vcmask 1041408  }
  0x48   :  { %v235_v3 = vsub.s32 %v232_v53, %v4720_v48  ;;  %vm771_vm10 = vcmask 15360   ;;  %vm2682_vm11 = vcmask 64512   ;;  %vm1534_vm12 = vcmask 916480  }
  0x49   :  { %v5988_v49 = vmov 0.0   ;;  %vm1605_vm13 = vcmask 785408   ;;  %vm1677_vm14 = vcmask 654336   ;;  %vm1749_vm15 = vcmask 523264  }
  0x4a   :  { %vm2430_vm2 = vcmask 416768   ;;  %vm2498_vm3 = vcmask 400384  }
  0x4d   :  { %v1498_v13 = vld [vmem:[#allocation2] sm:$0x3f] }
  0x4e   :  { %v1540_v15 = vmul.f32 %v1539_v14, %v1498_v13  ;;  %v1529_v20 = vmul.f32 %v1528_v16, %v1498_v13  ;;  %v1560_v22 = vmul.f32 %v1559_v17, %v1498_v13  ;;  %v1550_v23 = vmul.f32 %v1549_v21, %v1498_v13 }
  0x4f   :  { %v1580_v28 = vmul.f32 %v1579_v26, %v1498_v13  ;;  %v1570_v29 = vmul.f32 %v1569_v27, %v1498_v13  ;;  %v1600_v10 = vmul.f32 %v1599_v32, %v1498_v13  ;;  %v1590_v11 = vmul.f32 %v1589_v33, %v1498_v13 }
  0x50   :  { %v1621_v4 = vmul.f32 %v1620_v34, %v1498_v13  ;;  %v1611_v5 = vmul.f32 %v1610_v2, %v1498_v13  ;;  %v1641_v36 = vmul.f32 %v1640_v6, %v1498_v13  ;;  %v1631_v0 = vmul.f32 %v1630_v35, %v1498_v13 }
  0x51   :  { %v1661_v40 = vmul.f32 %v1660_v1, %v1498_v13  ;;  %v1651_v42 = vmul.f32 %v1650_v38, %v1498_v13  ;;  %v387_v13 = vsub.f32 %v315_v52, %v4768_v56 }
  0x52   :  { %1542 = vrot.lane.b32.xlu1 %v1540_v15, %s4549_s26 }
  0x56   :  { %1562 = vrot.lane.b32.xlu1 %v1560_v22, %s4549_s26 }
  0x58   :  { %1531 = vrot.lane.b32.xlu0 %v1529_v20, %s4549_s26 }
  0x5a   :  { %1582 = vrot.lane.b32.xlu1 %v1580_v28, %s4549_s26 }
  0x5c   :  { %1552 = vrot.lane.b32.xlu0 %v1550_v23, %s4549_s26 }
  0x5e   :  { %1602 = vrot.lane.b32.xlu1 %v1600_v10, %s4550_s10 }
  0x60   :  { %1572 = vrot.lane.b32.xlu0 %v1570_v29, %s4549_s26 }
  0x62   :  { %1623 = vrot.lane.b32.xlu1 %v1621_v4, %s4550_s10 }
  0x64   :  { %1592 = vrot.lane.b32.xlu0 %v1590_v11, %s4549_s26 }
  0x66   :  { %1643 = vrot.lane.b32.xlu1 %v1641_v36, %s4550_s10 }
  0x68   :  { %1613 = vrot.lane.b32.xlu0 %v1611_v5, %s4550_s10  ;;  %v388_v5 = vand.u32 4294901760, %v387_v13 }
  0x6a   :  { %1663 = vrot.lane.b32.xlu1 %v1661_v40, %s4550_s10 }
  0x6c   :  { %1633 = vrot.lane.b32.xlu0 %v1631_v0, %s4550_s10 }
  0x70   :  { %1653 = vrot.lane.b32.xlu0 %v1651_v42, %s4550_s10 }
  0xb2   :  { %v84_v43 = vpop.xlane.xlu1 %83 }
  0xb3   :  { %v72_v44 = vpop.xlane.xlu0 %71  ;;  %v99_v57 = vmul.f32 0.00390625, %v84_v43 }
  0xb4   :  { %v95_v58 = vmul.f32 0.00390625, %v72_v44 }
  0xb5   :  { %v242_v14 = vrot.slane %v99_v57, %v216_v41 }
  0xb6   :  { %v87_v18 = vpop.xlane.xlu1 %86  ;;  %v217_v15 = vrot.slane %v95_v58, %v216_v41  ;;  %v767_v58 = vld [vmem:[%s5926_s3] sm:$0xff] }
  0xb7   :  { %v75_v19 = vpop.xlane.xlu0 %74  ;;  %v100_v54 = vmul.f32 0.00390625, %v87_v18 }
  0xb8   :  { %v96_v59 = vmul.f32 0.00390625, %v75_v19 }
  0xb9   :  { %v246_v12 = vrot.slane %v100_v54, %v221_v39  ;;  %v1671_v54 = vstv %s4095_s13  ;;  %s4553_s13 = smov 48  }
  0xba   :  { %v90_v45 = vpop.xlane.xlu1 %89  ;;  %v222_v16 = vrot.slane %v96_v59, %v221_v39 }
  0xbb   :  { %v78_v46 = vpop.xlane.xlu0 %77  ;;  %v101_v60 = vmul.f32 0.00390625, %v90_v45  ;;  %v247_v10 = vsel %vm223_vm6, %v246_v12, %v242_v14 }
  0xbc   :  { %v97_v63 = vmul.f32 0.00390625, %v78_v46  ;;  %v224_v34 = vsel %vm223_vm6, %v222_v16, %v217_v15  ;;  %v4825_v16 = vld [vmem:[#allocation2 + $0x2] sm:$0x3f] }
  0xbd   :  { %v251_v17 = vrot.slane %v101_v60, %v228_v55  ;;  %v1702_v60 = vstv %s4098_s15  ;;  %s4113_s15 = sld [smem:[#allocation7 + $0x27]] }
  0xbe   :  { %v93_v24 = vpop.xlane.xlu1 %92  ;;  %v229_v21 = vrot.slane %v97_v63, %v228_v55 }
  0xbf   :  { %v81_v25 = vpop.xlane.xlu0 %80  ;;  %v102_v7 = vmul.f32 0.00390625, %v93_v24  ;;  %v252_v2 = vsel %vm230_vm7, %v251_v17, %v247_v10  ;;  %v389_v24 = vsub.f32 %v387_v13, %v388_v5  ;;  %v1774_v10 = vstv %s4105_s28  ;;  %s4132_s28 = sld [smem:[#allocation7 + $0x3a]] }
  0xc0   :  { %v98_v9 = vmul.f32 0.00390625, %v81_v25  ;;  %v231_v6 = vsel %vm230_vm7, %v229_v21, %v224_v34  ;;  %v1732_v21 = vstv %s4101_s22  ;;  %v1804_v34 = vstv %s4108_s29  ;;  %s4130_s22 = sld [smem:[#allocation7 + $0x38]]  ;;  %s4121_s29 = sld [smem:[#allocation7 + $0x2f]] }
  0xc1   :  { %v256_v22 = vrot.slane %v102_v7, %v235_v3  ;;  %v390_v31 = vand.u32 4294901760, %v389_v24 }
  0xc2   :  { %v108_v51 = vpop.xlane.xlu1 %107  ;;  %v236_v28 = vrot.slane %v98_v9, %v235_v3  ;;  %v1722_v9 = vstv %s4100_s0  ;;  %s4117_s0 = sld [smem:[#allocation7 + $0x2b]] }
  0xc3   :  { %v105_v37 = vpop.xlane.xlu0 %104  ;;  %v276_v29 = vrot.slane %v108_v51, %v221_v39  ;;  %v257_v35 = vsel %vm237_vm8, %v256_v22, %v252_v2  ;;  %v1794_v2 = vstv %s4107_s30  ;;  %s4138_s30 = sld [smem:[#allocation7 + $0x40]] }
  0xc4   :  { %v272_v32 = vrot.slane %v105_v37, %v216_v41  ;;  %v238_v38 = vsel %vm237_vm8, %v236_v28, %v231_v6  ;;  %v1825_v6 = vstv %s4110_s8  ;;  %s4144_s8 = sld [smem:[#allocation7 + $0x46]] }
  0xc5   :  { %v259_v45 = vsel %vm258_vm0, %v257_v35, %v238_v38  ;;  %v1814_v35 = vstv %s4109_s9  ;;  %v1835_v38 = vstv %s4111_s12  ;;  %s4139_s9 = sld [smem:[#allocation7 + $0x41]]  ;;  %s4145_s12 = sld [smem:[#allocation7 + $0x47]]  ;;  %vm1820_vm0 = vcmask 392192  }
  0xc6   :  { %v120_v61 = vpop.xlane.xlu1 %119  ;;  %v277_v40 = vsel %vm223_vm6, %v276_v29, %v272_v32  ;;  %v1784_v32 = vstv %s4106_s25  ;;  %s4137_s25 = sld [smem:[#allocation7 + $0x3f]] }
  0xc7   :  { %v117_v8 = vpop.xlane.xlu0 %116  ;;  %v295_v23 = vrot.slane %v120_v61, %v221_v39  ;;  %v1682_v39 = vstv %s4096_s2  ;;  %v1692_v61 = vstv %s4097_s16  ;;  %s4114_s2 = sld [smem:[#allocation7 + $0x28]]  ;;  %s4116_s16 = sld [smem:[#allocation7 + $0x2a]] }
  0xc8   :  { %v291_v26 = vrot.slane %v117_v8, %v216_v41  ;;  %v1669_v41 = vld [vmem:[#allocation2] sm:$0xff] }
  0xc9   :  { %v1672_v57 = vmul.f32 %v1671_v54, %v1669_v41  ;;  %v1703_v63 = vmul.f32 %v1702_v60, %v1669_v41  ;;  %v1723_v12 = vmul.f32 %v1722_v9, %v1669_v41  ;;  %v2004_v60 = vstv %s4132_s28  ;;  %s4135_s28 = sld [smem:[#allocation7 + $0x3d]] }
  0xca   :  { %v123_v20 = vpop.xlane.xlu1 %122  ;;  %v296_v36 = vsel %vm223_vm6, %v295_v23, %v291_v26  ;;  %v1733_v23 = vmul.f32 %v1732_v21, %v1669_v41  ;;  %v1764_v26 = vstv %s4104_s23  ;;  %s4120_s23 = sld [smem:[#allocation7 + $0x2e]]  ;;  %v2064_v9 = vstv %s4138_s30  ;;  %s4153_s30 = sld [smem:[#allocation7 + $0x4f]] }
  0xcb   :  { %v111_v27 = vpop.xlane.xlu0 %110  ;;  %v300_v33 = vrot.slane %v123_v20, %v228_v55  ;;  %1674 = vrot.lane.b32.xlu0 %v1672_v57, %s4551_s19  ;;  %v1743_v20 = vstv %s4102_s21  ;;  %v1765_v28 = vmul.f32 %v1764_v26, %v4825_v16  ;;  %s4554_s21 = smov 32   ;;  %v2074_v26 = vstv %s4139_s9  ;;  %s4159_s9 = sld [smem:[#allocation7 + $0x55]] }
  0xcc   :  { %v281_v11 = vrot.slane %v111_v27, %v228_v55  ;;  %v1683_v55 = vmul.f32 %v1682_v39, %v1669_v41  ;;  %v1744_v22 = vmul.f32 %v1743_v20, %v4825_v16  ;;  %v1754_v27 = vstv %s4103_s24  ;;  %s4119_s24 = sld [smem:[#allocation7 + $0x2d]] }
  0xcd   :  { %v301_v42 = vsel %vm230_vm7, %v300_v33, %v296_v36  ;;  %v1755_v29 = vmul.f32 %v1754_v27, %v4825_v16  ;;  %v1785_v33 = vmul.f32 %v1784_v32, %v4825_v16  ;;  %v1826_v36 = vmul.f32 %v1825_v6, %v4825_v16 }
  0xce   :  { %v126_v4 = vpop.xlane.xlu1 %125  ;;  %v282_v44 = vsel %vm230_vm7, %v281_v11, %v277_v40  ;;  %1685 = vrot.lane.b32.xlu1 %v1683_v55, %s4551_s19  ;;  %v1775_v11 = vmul.f32 %v1774_v10, %v4825_v16  ;;  %v2125_v20 = vstv %s4144_s8  ;;  %s4147_s8 = sld [smem:[#allocation7 + $0x49]] }
  0xcf   :  { %v305_v0 = vrot.slane %v126_v4, %v235_v3  ;;  %v114_v1 = vpop.xlane.xlu0 %113  ;;  %v1805_v4 = vmul.f32 %v1804_v34, %v4825_v16 }
  0xd0   :  { %v286_v43 = vrot.slane %v114_v1, %v235_v3  ;;  %v1693_v3 = vmul.f32 %v1692_v61, %v1669_v41  ;;  %v1845_v1 = vstv %s4112_s11  ;;  %v1925_v54 = vstv %s4120_s23  ;;  %s4133_s11 = sld [smem:[#allocation7 + $0x3b]]  ;;  %s4140_s23 = sld [smem:[#allocation7 + $0x42]] }
  0xd1   :  { %v306_v18 = vsel %vm237_vm8, %v305_v0, %v301_v42  ;;  %v1815_v0 = vmul.f32 %v1814_v35, %v4825_v16  ;;  %v1846_v40 = vmul.f32 %v1845_v1, %v4825_v16  ;;  %v1836_v42 = vmul.f32 %v1835_v38, %v4825_v16 }
  0xd2   :  { %v287_v19 = vsel %vm237_vm8, %v286_v43, %v282_v44  ;;  %1705 = vrot.lane.b32.xlu1 %v1703_v63, %s4551_s19  ;;  %1695 = vrot.lane.b32.xlu0 %v1693_v3, %s4551_s19  ;;  %v1865_v43 = vstv %s4114_s2  ;;  %v1915_v55 = vstv %s4119_s24  ;;  %v1926_v57 = vmul.f32 %v1925_v54, %v4825_v16  ;;  %s4877_s2 = sld [smem:[#allocation7 + $0x3c]]  ;;  %s4152_s24 = sld [smem:[#allocation7 + $0x4e]] }
  0xd3   :  { %v308_v46 = vsel %vm307_vm1, %v306_v18, %v287_v19  ;;  %v1866_v44 = vmul.f32 %v1865_v43, %v4825_v16  ;;  %v1855_v18 = vstv %s4113_s15  ;;  %v1935_v3 = vstv %s4121_s29  ;;  %s4881_s15 = sld [smem:[#allocation7 + $0x30]]  ;;  %s4158_s29 = sld [smem:[#allocation7 + $0x54]] }
  0xd4   :  { %v311_v25 = vsel %vm310_vm9, %v259_v45, %v308_v46  ;;  %v1856_v19 = vmul.f32 %v1855_v18, %v4825_v16  ;;  %v1885_v45 = vstv %s4116_s16  ;;  %v1875_v46 = vstv %s4115_s17  ;;  %s4955_s16 = sld [smem:[#allocation7 + $0x5c]]  ;;  %s4964_s17 = sld [smem:[#allocation7 + $0x5b]] }
  0xd5   :  { %v318_v50 = vsel %vm313_vm5, %v311_v25, 0  ;;  %v1886_v24 = vmul.f32 %v1885_v45, %v4825_v16  ;;  %v1876_v25 = vmul.f32 %v1875_v46, %v4825_v16  ;;  %vm2464_vm1 = vcmask 408576  }
  0xd6   :  { %v321_v30 = vand.u32 4294901760, %v318_v50  ;;  %1725 = vrot.lane.b32.xlu1 %v1723_v12, %s4551_s19  ;;  %v1936_v12 = vmul.f32 %v1935_v3, %v4825_v16  ;;  %v2014_v27 = vstv %s4133_s11  ;;  %v2084_v38 = vstv %s4140_s23  ;;  %s4142_s11 = sld [smem:[#allocation7 + $0x44]]  ;;  %s5155_s23 = sld [smem:[#allocation7 + $0x53]] }
  0xd8   :  { %4217 = vmatpush3.xpose.msra.mxu0 %v321_v30  ;;  %v398_v51 = vsub.f32 %v318_v50, %v321_v30  ;;  %v1905_v50 = vstv %s4118_s18  ;;  %v2024_v10 = vstv %s4877_s2  ;;  %s4947_s2 = sld [smem:[#allocation7 + $0x56]]  ;;  %s5102_s18 = sld [smem:[#allocation7 + $0x4c]] }
  0xd9   :  { %4221 = vmatprep.subr.mxu0 %v5937_v62 }
  0xda   :  { %v399_v52 = vand.u32 4294901760, %v398_v51  ;;  %1746 = vrot.lane.b32.xlu1 %v1744_v22, %s4552_s27 }
  0xdb   :  { %4219 = vmatmul.mubr.f32.vlgmr.msra.gmra.mrb[0].mxu0 %v390_v31  ;;  %v1906_v31 = vmul.f32 %v1905_v50, %v4825_v16 }
  0xdc   :  { %v400_v53 = vsub.f32 %v398_v51, %v399_v52  ;;  %4223 = vmatprep.mubr.msk.f32.mxu0 %vm4548_vm4, %v5937_v62  ;;  %v2104_v54 = vstv %s4142_s11  ;;  %s5030_s11 = sld [smem:[#allocation7 + $0x4b]] }
  0xde   :  { %v401_v37 = vand.u32 4294901760, %v400_v53  ;;  %1767 = vrot.lane.b32.xlu1 %v1765_v28, %s4552_s27  ;;  %v2286_v3 = vstv %s4947_s2 }
  0xe0   :  { %4222 = vmatpush3.xpose.msra.mxu0 %v401_v37 }
  0xe1   :  { %4226 = vmatprep.subr.mxu0 %v5937_v62 }
  0xe2   :  { %1787 = vrot.lane.b32.xlu1 %v1785_v33, %s4552_s27 }
  0xe3   :  { %4224 = vmatmul.mubr.f32.vlgmr.msra.gmra.mrb[0].mxu0 %v4768_v56 }
  0xe4   :  { %4227 = vmatpush3.xpose.msra.mxu0 %v398_v51  ;;  %4228 = vmatprep.mubr.msk.f32.mxu0 %vm4548_vm4, %v5937_v62 }
  0xe5   :  { %4231 = vmatprep.subr.mxu0 %v5937_v62 }
  0xe6   :  { %1807 = vrot.lane.b32.xlu1 %v1805_v4, %s4552_s27 }
  0xea   :  { %1828 = vrot.lane.b32.xlu1 %v1826_v36, %s4553_s13  ;;  %v4921_v36 = vpop.permute.xlu1 %1542 }
  0xeb   :  { %4229 = vmatmul.mubr.f32.vlgmr.msra.gmra.mrb[0].mxu0 %v387_v13  ;;  %v1712_v13 = vstv %s4099_s20  ;;  %s4131_s20 = sld [smem:[#allocation7 + $0x39]] }
  0xec   :  { %4232 = vmatpush3.xpose.msra.mxu0 %v321_v30  ;;  %4233 = vmatprep.mubr.msk.f32.mxu0 %vm4548_vm4, %v5937_v62  ;;  %v1713_v15 = vmul.f32 %v1712_v13, %v1669_v41  ;;  %v1984_v41 = vstv %s4130_s22  ;;  %s4146_s22 = sld [smem:[#allocation7 + $0x48]] }
  0xed   :  { %4236 = vmatprep.subr.mxu0 %v5937_v62 }
  0xee   :  { %1715 = vrot.lane.b32.xlu0 %v1713_v15, %s4551_s19  ;;  %1848 = vrot.lane.b32.xlu1 %v1846_v40, %s4553_s13  ;;  %v4891_v15 = vld [vmem:[%s5924_s1] sm:$0xff]  ;;  %v2206_v40 = vstv %s4152_s24  ;;  %v4931_v18 = vpop.permute.xlu1 %1562  ;;  %s5157_s24 = sld [smem:[#allocation7]] }
  0xef   :  { %v4901_v22 = vand.u32 4294901760, %v4891_v15  ;;  %v1564_v48 = vrot.slane %v4931_v18, 2 }
  0xf1   :  { %v1994_v53 = vstv %s4131_s20  ;;  %s4151_s20 = sld [smem:[#allocation7 + $0x4d]] }
  0xf2   :  { %1735 = vrot.lane.b32.xlu0 %v1733_v23, %s4551_s19  ;;  %1868 = vrot.lane.b32.xlu1 %v1866_v44, %s4553_s13  ;;  %v2145_v6 = vstv %s4146_s22  ;;  %v2034_v44 = vstv %s4135_s28  ;;  %s5146_s22 = sld [smem:[#allocation7 + $0x59]]  ;;  %s5166_s28 = sld [smem:[#allocation7 + $0x3]] }
  0xf3   :  { %4234 = vmatmul.mubr.f32.vlgmr.msra.gmra.mrb[0].mxu0 %v388_v5  ;;  %v1795_v5 = vmul.f32 %v1794_v2, %v4825_v16  ;;  %v4915_v2 = vld [vmem:[#allocation2 + $0xa] sm:$0x3f] }
  0xf4   :  { %4237 = vmatpush3.xpose.msra.mxu0 %v399_v52  ;;  %4238 = vmatprep.mubr.msk.f32.mxu0 %vm4548_vm4, %v5937_v62  ;;  %v4861_v52 = vld [vmem:[#allocation2 + $0x8] sm:$0x3f] }
  0xf5   :  { %4241 = vmatprep.subr.mxu0 %v5937_v62  ;;  %5973 = vst [vmem:[#allocation15_spill] sm:$0xff] %v4861_v52  ;;  %v1995_v37 = vmul.f32 %v1994_v53, %v4861_v52  ;;  %v1985_v39 = vmul.f32 %v1984_v41, %v4861_v52  ;;  %v2005_v63 = vmul.f32 %v2004_v60, %v4861_v52  ;;  %v2155_v53 = vstv %s4147_s8  ;;  %v2655_v60 = vld [vmem:[%s5927_s4 + $0x8] sm:$0xff]  ;;  %s5205_s8 = sld [smem:[#allocation7 + $0x5]] }
  0xf6   :  { %1757 = vrot.lane.b32.xlu0 %v1755_v29, %s4552_s27  ;;  %1888 = vrot.lane.b32.xlu1 %v1886_v24, %s4554_s21  ;;  %v2065_v13 = vmul.f32 %v2064_v9, %v4861_v52  ;;  %v2075_v28 = vmul.f32 %v2074_v26, %v4861_v52  ;;  %v2135_v29 = vstv %s4145_s12  ;;  %v2015_v32 = vmul.f32 %v2014_v27, %v4861_v52  ;;  %s4939_s12 = sld [smem:[#allocation7 + $0x3e]]  ;;  %v2657_v9 = vld [vmem:[%s5927_s4 + $0x18] sm:$0xff] }
  0xf7   :  { %v2025_v34 = vmul.f32 %v2024_v10, %v4861_v52  ;;  %v2035_v46 = vmul.f32 %v2034_v44, %v4861_v52  ;;  %v2266_v24 = vstv %s4158_s29  ;;  %s4983_s29 = sld [smem:[#allocation7 + $0x45]]  ;;  %v2693_v10 = vsel %vm2682_vm11, %v2657_v9, 0 }
  0xf8   :  { %v2267_v50 = vmul.f32 %v2266_v24, %v4915_v2  ;;  %v2316_v47 = vstv %s5146_s22  ;;  %s4559_s22 = smov 49  }
  0xfa   :  { %1777 = vrot.lane.b32.xlu0 %v1775_v11, %s4552_s27  ;;  %1908 = vrot.lane.b32.xlu1 %v1906_v31, %s4554_s21  ;;  %v1945_v11 = vstv %s4881_s15  ;;  %s4951_s15 = sld [smem:[#allocation7 + $0x4a]] }
  0xfb   :  { %4239 = vmatmul.mubr.f32.vlgmr.msra.gmra.mrb[0].mxu0 %v4768_v56  ;;  %v1946_v4 = vmul.f32 %v1945_v11, %v4825_v16  ;;  %v768_v11 = vld [vmem:[%s5926_s3 + $0x8] sm:$0xff] }
  0xfc   :  { %4242 = vmatpush3.xpose.msra.mxu0 %v321_v30  ;;  %4243 = vmatprep.mubr.msk.f32.mxu0 %vm4548_vm4, %v5937_v62  ;;  %v1895_v30 = vstv %s4117_s0  ;;  %s5132_s0 = sld [smem:[#allocation7 + $0x58]] }
  0xfd   :  { %v1896_v51 = vmul.f32 %v1895_v30, %v4825_v16  ;;  %v4943_v30 = vpop.permute.xlu1 %1582 }
  0xfe   :  { %1797 = vrot.lane.b32.xlu0 %v1795_v5, %s4552_s27  ;;  %1997 = vrot.lane.b32.xlu1 %v1995_v37, %s4549_s26  ;;  %v2196_v5 = vstv %s4151_s20  ;;  %v2276_v37 = vstv %s4159_s9  ;;  %s5022_s9 = sld [smem:[#allocation7 + $0x51]] }
  0xff   :  { %v2197_v35 = vmul.f32 %v2196_v5, %v4915_v2  ;;  %v2346_v5 = vstv %s4955_s16  ;;  %s5074_s16 = sld [smem:[#allocation7 + $0x5d]]  ;;  %s5135_s20 = sld [smem:[#allocation7 + $0x1]] }
 0x100   :  { %v2165_v26 = vstv %s4951_s15  ;;  %v2347_v24 = vmul.f32 %v2346_v5, %v4915_v2 }
 0x102   :  { %1817 = vrot.lane.b32.xlu0 %v1815_v0, %s4553_s13  ;;  %1928 = vrot.lane.b32.xlu1 %v1926_v57, %s4554_s21  ;;  %v4923_v0 = vpop.permute.xlu0 %1531  ;;  %v4960_v57 = vpop.permute.xlu1 %1602 }
 0x103   :  { %4244 = vmatmul.mubr.f32.vlgmr.msra.gmra.mrb[0].mxu0 %v4768_v56  ;;  %v773_v56 = vsel %vm771_vm10, %v767_v58, 0  ;;  %v1916_v58 = vmul.f32 %v1915_v55, %v4825_v16  ;;  %v2085_v16 = vmul.f32 %v2084_v38, %v4861_v52  ;;  %v2044_v55 = vstv %s4939_s12  ;;  %s5407_s12 = sld [smem:[#allocation7 + $0x34]] }
 0x104   :  { %2761 = vmatprep.mubr.f32.mxu0 %v5937_v62  ;;  %v4813_v59 = vand.u32 4294901760, %v773_v56 }
 0x106   :  { %v4816_v7 = vsub.f32 %v773_v56, %v4813_v59  ;;  %1838 = vrot.lane.b32.xlu0 %v1836_v42, %s4553_s13  ;;  %v2054_v56 = vstv %s4137_s25  ;;  %s4141_s25 = sld [smem:[#allocation7 + $0x43]]  ;;  %v2207_v42 = vmul.f32 %v2206_v40, %v4915_v2 }
 0x107   :  { %v2055_v61 = vmul.f32 %v2054_v56, %v4861_v52  ;;  %v2654_v56 = vld [vmem:[%s5927_s4] sm:$0xff] }
 0x108   :  { %v5932_v8 = vand.u32 4294901760, %v4816_v7 }
 0x109   :  { %2057 = vrot.lane.b32.xlu1 %v2055_v61, %s4550_s10  ;;  %v2656_v61 = vld [vmem:[%s5927_s4 + $0x10] sm:$0xff]  ;;  %s5195_s4 = sld [smem:[#allocation7 + $0x5f]] }
 0x10a   :  { %v856_v14 = vsub.f32 %v4816_v7, %v5932_v8  ;;  %1858 = vrot.lane.b32.xlu0 %v1856_v19, %s4553_s13  ;;  %v4933_v19 = vpop.permute.xlu0 %1552 }
 0x10c   :  { %v857_v17 = vand.u32 4294901760, %v856_v14  ;;  %v4886_v14 = vld [vmem:[%s5924_s1 + $0x8] sm:$0xff]  ;;  %v2094_v43 = vstv %s4141_s25  ;;  %s5159_s25 = sld [smem:[#allocation7 + $0x6]] }
 0x10d   :  { %1938 = vrot.lane.b32.xlu1 %v1936_v12, %s4554_s21  ;;  %v4898_v21 = vand.u32 4294901760, %v4886_v14  ;;  %v2095_v45 = vmul.f32 %v2094_v43, %v4861_v52  ;;  %v2045_v12 = vmul.f32 %v2044_v55, %v4861_v52  ;;  %v2114_v55 = vstv %s4983_s29  ;;  %s5176_s29 = sld [smem:[#allocation7 + $0x2]] }
 0x10e   :  { %4248 = vmatprep.mubr.f32.mxu1 %v857_v17  ;;  %1878 = vrot.lane.b32.xlu0 %v1876_v25, %s4553_s13  ;;  %v4893_v17 = vld [vmem:[#allocation2 + $0x8] sm:$0xff]  ;;  %v2216_v25 = vstv %s4153_s30  ;;  %v4945_v31 = vpop.permute.xlu0 %1572  ;;  %s4990_s30 = sld [smem:[#allocation7 + $0x50]] }
 0x10f   :  { %5974 = vst [vmem:[#allocation16_spill] sm:$0xff] %v4898_v21  ;;  %v2126_v23 = vmul.f32 %v2125_v20, %v4893_v17  ;;  %2696 = vmatprep.subr.mxu0 %v4898_v21  ;;  %v2136_v33 = vmul.f32 %v2135_v29, %v4893_v17  ;;  %v2146_v1 = vmul.f32 %v2145_v6, %v4893_v17  ;;  %v2684_v20 = vsel %vm2682_vm11, %v2654_v56, 0 }
 0x110   :  { %2698 = vmatpush1.msra.mxu0 %v4901_v22  ;;  %v2156_v41 = vmul.f32 %v2155_v53, %v4893_v17  ;;  %v4992_v27 = vand.u32 4294901760, %v2684_v20  ;;  %v2690_v29 = vsel %vm2682_vm11, %v2656_v61, 0 }
 0x111   :  { %2128 = vrot.lane.b32.xlu1 %v2126_v23, %s4551_s19  ;;  %v2687_v23 = vsel %vm2682_vm11, %v2655_v60, 0  ;;  %vm2595_vm11 = vcmask 375808  }
 0x112   :  { %1898 = vrot.lane.b32.xlu0 %v1896_v51, %s4554_s21  ;;  %v2217_v51 = vmul.f32 %v2216_v25, %v4915_v2  ;;  %5975 = vst [vmem:[#allocation17_spill] sm:$0xff] %v4992_v27  ;;  %v5013_v6 = vsub.f32 %v2684_v20, %v4992_v27 }
 0x114   :  { %v5033_v43 = vand.u32 4294901760, %v5013_v6 }
 0x115   :  { %2017 = vrot.lane.b32.xlu1 %v2015_v32, %s4549_s26  ;;  %v2287_v32 = vmul.f32 %v2286_v3, %v4915_v2  ;;  %v2226_v3 = vstv %s4990_s30  ;;  %s5181_s30 = sld [smem:[#allocation7 + $0x5a]] }
 0x116   :  { %1987 = vrot.lane.b32.xlu0 %v1985_v39, %s4549_s26  ;;  %v2277_v39 = vmul.f32 %v2276_v37, %v4915_v2  ;;  %v2765_v53 = vsub.f32 %v5013_v6, %v5033_v43  ;;  %v2227_v5 = vmul.f32 %v2226_v3, %v4915_v2  ;;  %v2356_v3 = vstv %s5074_s16 }
 0x118   :  { %v5076_v9 = vand.u32 4294901760, %v2765_v53 }
 0x119   :  { %2027 = vrot.lane.b32.xlu1 %v2025_v34, %s4549_s26  ;;  %v5007_v34 = vpop.permute.xlu1 %1623 }
 0x11a   :  { %1918 = vrot.lane.b32.xlu0 %v1916_v58, %s4554_s21  ;;  %v4962_v58 = vpop.permute.xlu0 %1592  ;;  %5980 = vst [vmem:[#allocation22_spill] sm:$0xff] %v5076_v9  ;;  %2767 = vmatmul.mubr.f32.vlgmr.msra.gmra.mrb[2].mxu0 %v5076_v9  ;;  %v1524_v9 = vstv %s5159_s25 }
 0x11b   :  { %2772 = vmatprep.mubr.f32.mxu0 %v5937_v62 }
 0x11d   :  { %2199 = vrot.lane.b32.xlu1 %v2197_v35, %s4552_s27  ;;  %v5069_v61 = vpop.permute.xlu1 %1643 }
 0x11e   :  { %2007 = vrot.lane.b32.xlu0 %v2005_v63, %s4549_s26  ;;  %v2105_v63 = vmul.f32 %v2104_v54, %v4861_v52 }
 0x121   :  { %2087 = vrot.lane.b32.xlu1 %v2085_v16, %s4550_s10 }
 0x122   :  { %2067 = vrot.lane.b32.xlu0 %v2065_v13, %s4550_s10  ;;  %v4987_v13 = vsub.f32 %v4891_v15, %v4901_v22  ;;  %v5001_v15 = vsub.f32 %v4886_v14, %v4898_v21  ;;  %v2166_v14 = vmul.f32 %v2165_v26, %v4893_v17  ;;  %v2115_v26 = vmul.f32 %v2114_v55, %v4861_v52 }
 0x124   :  { %v5935_v40 = vand.u32 4294901760, %v5001_v15  ;;  %v5934_v16 = vand.u32 4294901760, %v4987_v13 }
 0x125   :  { %2097 = vrot.lane.b32.xlu1 %v2095_v45, %s4550_s10  ;;  %v776_v45 = vsel %vm771_vm10, %v768_v11, 0 }
 0x126   :  { %2077 = vrot.lane.b32.xlu0 %v2075_v28, %s4550_s10  ;;  %v4994_v28 = vand.u32 4294901760, %v2687_v23  ;;  %v2809_v25 = vsub.f32 %v5001_v15, %v5935_v40  ;;  %v5078_v20 = vand.u32 4294901760, %v776_v45  ;;  %v1533_v40 = vrot.slane %v4923_v0, 2 }
 0x128   :  { %5976 = vst [vmem:[#allocation18_spill] sm:$0xff] %v4994_v28  ;;  %v5016_v35 = vsub.f32 %v2687_v23, %v4994_v28  ;;  %v2810_v56 = vand.u32 4294901760, %v2809_v25  ;;  %v5109_v25 = vpop.permute.xlu1 %1663 }
 0x129   :  { %2269 = vrot.lane.b32.xlu1 %v2267_v50, %s4553_s13  ;;  %v2815_v50 = vsub.f32 %v4987_v13, %v5934_v16 }
 0x12a   :  { %2138 = vrot.lane.b32.xlu0 %v2136_v33, %s4551_s19  ;;  %v4997_v33 = vand.u32 4294901760, %v2690_v29  ;;  %v5036_v44 = vand.u32 4294901760, %v5016_v35  ;;  %2811 = vmatprep.subr.mxu0 %v2810_v56 }
 0x12c   :  { %5977 = vst [vmem:[#allocation19_spill] sm:$0xff] %v4997_v33  ;;  %v5025_v38 = vsub.f32 %v2690_v29, %v4997_v33  ;;  %5978 = vst [vmem:[#allocation20_spill] sm:$0xff] %v5036_v44  ;;  %v2776_v37 = vsub.f32 %v5016_v35, %v5036_v44  ;;  %v2326_v44 = vstv %s5181_s30 }
 0x12d   :  { %2158 = vrot.lane.b32.xlu1 %v2156_v41, %s4551_s19 }
 0x12e   :  { %1948 = vrot.lane.b32.xlu0 %v1946_v4, %s4554_s21  ;;  %v5009_v4 = vpop.permute.xlu0 %1613  ;;  %v5058_v41 = vand.u32 4294901760, %v5025_v38  ;;  %v5084_v29 = vand.u32 4294901760, %v2776_v37 }
 0x130   :  { %5979 = vst [vmem:[#allocation21_spill] sm:$0xff] %v5058_v41  ;;  %5981 = vst [vmem:[#allocation23_spill] sm:$0xff] %v5084_v29  ;;  %2778 = vmatmul.mubr.f32.gmra.mrb[4].mxu0 %v5084_v29  ;;  %v5218_v29 = vld [vmem:[#allocation2] sm:$0x3f] }
 0x131   :  { %2107 = vrot.lane.b32.xlu1 %v2105_v63, %s4550_s10  ;;  %2783 = vmatprep.mubr.f32.mxu0 %v5937_v62 }
 0x132   :  { %2148 = vrot.lane.b32.xlu0 %v2146_v1, %s4551_s19  ;;  %v5018_v1 = vand.u32 4294901760, %v2693_v10  ;;  %v5071_v63 = vpop.permute.xlu0 %1633 }
 0x135   :  { %2289 = vrot.lane.b32.xlu1 %v2287_v32, %s4553_s13  ;;  %v2787_v32 = vsub.f32 %v5025_v38, %v5058_v41  ;;  %v1508_v41 = vstv %s5176_s29 }
 0x136   :  { %2209 = vrot.lane.b32.xlu0 %v2207_v42, %s4552_s27  ;;  %v2336_v42 = vstv %s4964_s17  ;;  %s5096_s17 = sld [smem:[#allocation7 + $0x52]] }
 0x137   :  { %v2337_v54 = vmul.f32 %v2336_v42, %v4915_v2  ;;  %v5115_v53 = vand.u32 4294901760, %v2787_v32 }
 0x139   :  { %2349 = vrot.lane.b32.xlu1 %v2347_v24, %s4554_s21  ;;  %v5106_v24 = vsub.f32 %v776_v45, %v5078_v20  ;;  %5984 = vst [vmem:[#allocation26_spill] sm:$0xff] %v5115_v53  ;;  %2789 = vmatmul.mubr.f32.gmra.mrb[6].mxu0 %v5115_v53  ;;  %v2256_v53 = vstv %s5155_s23  ;;  %s4560_s23 = smov 47  }
 0x13a   :  { %2037 = vrot.lane.b32.xlu0 %v2035_v46, %s4549_s26  ;;  %v769_v46 = vld [vmem:[%s5926_s3 + $0x10] sm:$0xff]  ;;  %2794 = vmatprep.mubr.f32.mxu0 %v5937_v62 }
 0x13b   :  { %v779_v60 = vsel %vm771_vm10, %v769_v46, 0  ;;  %v2175_v46 = vstv %s5030_s11  ;;  %5983 = vst [vmem:[#allocation25_spill] sm:$0xff] %v5106_v24  ;;  %s5370_s11 = sld [smem:[#allocation7 + $0x33]] }
 0x13c   :  { %v5091_v11 = vand.u32 4294901760, %v779_v60  ;;  %v2176_v45 = vmul.f32 %v2175_v46, %v4893_v17 }
 0x13d   :  { %2117 = vrot.lane.b32.xlu1 %v2115_v26, %s4550_s10  ;;  %s5125_s10 = sld [smem:[#allocation7 + $0x5e]] }
 0x13e   :  { %2219 = vrot.lane.b32.xlu0 %v2217_v51, %s4552_s27  ;;  %v770_v51 = vld [vmem:[%s5926_s3 + $0x18] sm:$0xff]  ;;  %s5066_s3 = sld [smem:[#allocation7 + $0x57]] }
 0x13f   :  { %v782_v23 = vsel %vm771_vm10, %v770_v51, 0 }
 0x140   :  { %v5099_v42 = vand.u32 4294901760, %v782_v23  ;;  %v5150_v46 = vpop.permute.xlu1 %1685 }
 0x142   :  { %2279 = vrot.lane.b32.xlu0 %v2277_v39, %s4553_s13  ;;  %v5061_v39 = vsub.f32 %v2693_v10, %v5018_v1  ;;  %v5129_v56 = vsub.f32 %v782_v23, %v5099_v42  ;;  %v2357_v23 = vmul.f32 %v2356_v3, %v4915_v2 }
 0x143   :  { %v2366_v8 = vstv %s5125_s10  ;;  %s5689_s10 = sld [smem:[#allocation7 + $0x61]] }
 0x144   :  { %v5089_v10 = vand.u32 4294901760, %v5061_v39  ;;  %v2296_v55 = vstv %s5066_s3  ;;  %5986 = vst [vmem:[#allocation28_spill] sm:$0xff] %v5129_v56 }
 0x146   :  { %2047 = vrot.lane.b32.xlu0 %v2045_v12, %s4549_s26  ;;  %v2816_v12 = vand.u32 4294901760, %v2815_v50  ;;  %5982 = vst [vmem:[#allocation24_spill] sm:$0xff] %v5089_v10  ;;  %v5111_v50 = vpop.permute.xlu0 %1653  ;;  %v2798_v37 = vsub.f32 %v5061_v39, %v5089_v10  ;;  %v1565_v10 = vsel %vm1534_vm12, %v4931_v18, %v1564_v48  ;;  %s5403_s26 = sld [smem:[#allocation7 + $0x35]] }
 0x148   :  { %2817 = vmatpush1.msra.mxu0 %v2816_v12  ;;  %v2297_v12 = vmul.f32 %v2296_v55, %v4915_v2  ;;  %v5140_v26 = vand.u32 4294901760, %v2798_v37  ;;  %v2185_v37 = vstv %s5102_s18  ;;  %s5666_s18 = sld [smem:[#allocation7 + $0x60]] }
 0x149   :  { %2911 = vmatprep.subr.mxu0 %v5001_v15 }
 0x14a   :  { %2168 = vrot.lane.b32.xlu0 %v2166_v14, %s4551_s19  ;;  %v2236_v14 = vstv %s5022_s9  ;;  %5987 = vst [vmem:[#allocation29_spill] sm:$0xff] %v5140_v26  ;;  %2800 = vmatmul.mubr.f32.gmra.mrb[8].mxu0 %v5140_v26  ;;  %v1594_v26 = vrot.slane %v4962_v58, 2  ;;  %s5368_s9 = sld [smem:[#allocation7 + $0x32]] }
 0x14b   :  { %v2237_v51 = vmul.f32 %v2236_v14, %v4915_v2  ;;  %v5936_v14 = vand.u32 4294901760, %v5129_v56  ;;  %2880 = vmatprep.mubr.f32.mxu0 %v5937_v62 }
 0x14c   :  { %v1595_v18 = vsel %vm1534_vm12, %v4962_v58, %v1594_v26  ;;  %v1604_v58 = vrot.slane %v4960_v57, 2 }
 0x14d   :  { %2239 = vrot.lane.b32.xlu1 %v2237_v51, %s4552_s27  ;;  %v5152_v51 = vpop.permute.xlu0 %1674 }
 0x14e   :  { %2339 = vrot.lane.b32.xlu0 %v2337_v54, %s4554_s21  ;;  %v5120_v54 = vsub.f32 %v779_v60, %v5091_v11  ;;  %v5931_v60 = vand.u32 4294901760, %v5106_v24  ;;  %2882 = vmatmul.mubr.f32.vlgmr.msra.gmra.mrb[2].mxu0 %v4992_v27  ;;  %v1554_v27 = vrot.slane %v4933_v19, 2 }
 0x14f   :  { %2887 = vmatprep.mubr.f32.mxu0 %v5988_v49  ;;  %2914 = vmatpush1.msra.mxu0 %v4987_v13 }
 0x150   :  { %5985 = vst [vmem:[#allocation27_spill] sm:$0xff] %v5120_v54  ;;  %v5933_v32 = vand.u32 4294901760, %v5120_v54  ;;  %3011 = vmatprep.subr.mxu0 %v4898_v21 }
 0x151   :  { %2299 = vrot.lane.b32.xlu1 %v2297_v12, %s4553_s13  ;;  %v5187_v12 = vsub.f32 %v5129_v56, %v5936_v14  ;;  %v5192_v16 = vpop.permute.xlu0 %1695  ;;  %v2367_v14 = vmul.f32 %v2366_v8, %v4915_v2  ;;  %v2257_v56 = vmul.f32 %v2256_v53, %v4915_v2  ;;  %v1665_v53 = vrot.slane %v5109_v25, 2 }
 0x152   :  { %2229 = vrot.lane.b32.xlu0 %v2227_v5, %s4552_s27  ;;  %v2246_v5 = vstv %s5096_s17  ;;  %v5174_v3 = vsub.f32 %v5120_v54, %v5933_v32  ;;  %v5190_v32 = vpop.permute.xlu1 %1705  ;;  %2889 = vmatmul.mubr.f32.gmra.mrb[4].mxu0 %v4994_v28  ;;  %v2376_v28 = vstv %s5195_s4  ;;  %v1509_v54 = vmul.f32 %v5218_v29, %v1508_v41  ;;  %s5454_s17 = sld [smem:[#allocation7 + $0x36]] }
 0x153   :  { %v2247_v55 = vmul.f32 %v2246_v5, %v4915_v2  ;;  %v1544_v5 = vrot.slane %v4921_v36, 2  ;;  %2894 = vmatprep.mubr.f32.mxu0 %v5988_v49  ;;  %v2377_v41 = vmul.f32 %v2376_v28, %v4915_v2 }
 0x155   :  { %2249 = vrot.lane.b32.xlu1 %v2247_v55, %s4552_s27  ;;  %v1545_v55 = vsel %vm1534_vm12, %v4921_v36, %v1544_v5  ;;  %v1535_v36 = vsel %vm1534_vm12, %v4923_v0, %v1533_v40  ;;  %v1512_v5 = vstv %s5166_s28  ;;  %v1525_v40 = vmul.f32 %v5218_v29, %v1524_v9 }
 0x156   :  { %2178 = vrot.lane.b32.xlu0 %v2176_v45, %s4551_s19  ;;  %v5164_v45 = vsub.f32 %v5106_v24, %v5931_v60  ;;  %v2186_v60 = vmul.f32 %v2185_v37, %v4893_v17  ;;  %v1504_v37 = vstv %s5135_s20  ;;  %v5214_v62 = vpop.permute.xlu1 %1725  ;;  %v1513_v48 = vmul.f32 %v5218_v29, %v1512_v5  ;;  %2896 = vmatmul.mubr.f32.gmra.mrb[6].mxu0 %v4997_v33  ;;  %s4556_s20 = smov 51  }
 0x157   :  { %v2327_v9 = vmul.f32 %v2326_v44, %v4915_v2  ;;  %2901 = vmatprep.mubr.f32.mxu0 %v5988_v49  ;;  %v1635_v44 = vrot.slane %v5071_v63, 2  ;;  %v1666_v33 = vsel %vm1605_vm13, %v5109_v25, %v1665_v53  ;;  %v1606_v25 = vsel %vm1605_vm13, %v4960_v57, %v1604_v58 }
 0x159   :  { %2369 = vrot.lane.b32.xlu1 %v2367_v14, %s4554_s21 }
 0x15a   :  { %2359 = vrot.lane.b32.xlu0 %v2357_v23, %s4554_s21  ;;  %v2306_v23 = vstv %s5132_s0  ;;  %v5244_v14 = vpop.permute.xlu1 %1746  ;;  %2903 = vmatmul.mubr.f32.gmra.mrb[8].mxu0 %v5018_v1  ;;  %s4555_s0 = smov 126  }
 0x15b   :  { %v2307_v17 = vmul.f32 %v2306_v23, %v4915_v2  ;;  %v1500_v23 = vstv %s5157_s24  ;;  %2977 = vmatprep.mubr.f32.mxu0 %v5988_v49  ;;  %s4562_s24 = smov 45  }
 0x15c   :  { %v1501_v0 = vmul.f32 %v5218_v29, %v1500_v23  ;;  %v1555_v23 = vsel %vm1534_vm12, %v4933_v19, %v1554_v27  ;;  %v1597_v19 = vadd.f32 %v1595_v18, %v1525_v40  ;;  %v1567_v40 = vadd.f32 %v1565_v10, %v1513_v48 }
 0x15d   :  { %v5273_v18 = vadd.f32 %v1555_v23, %v1509_v54  ;;  %v1707_v48 = vrot.slane %v5190_v32, 2 }
 0x15e   :  { %2188 = vrot.lane.b32.xlu0 %v2186_v60, %s4551_s19  ;;  %v1505_v60 = vmul.f32 %v5218_v29, %v1504_v37  ;;  %v2317_v37 = vmul.f32 %v2316_v47, %v4915_v2  ;;  %v1615_v47 = vrot.slane %v5009_v4, 2  ;;  %s5259_s19 = sld [smem:[#allocation7 + $0x4]]  ;;  %v5268_v26 = vpop.permute.xlu1 %1767  ;;  %v1668_v54 = vadd.f32 %v1666_v33, %v1597_v19  ;;  %2980 = vmatmul.mubr.f32.vlgmr.msra.gmra.mrb[2].mxu0 %v5013_v6 }
 0x15f   :  { %v1676_v33 = vrot.slane %v5152_v51, 2  ;;  %2985 = vmatprep.mubr.f32.mxu0 %v5988_v49  ;;  %3013 = vmatpush1.msra.mxu0 %v4901_v22 }
 0x160   :  { %v5224_v8 = vpop.permute.xlu0 %1715  ;;  %v1547_v52 = vadd.f32 %v1545_v55, %v1505_v60  ;;  %2319 = vrot.lane.b32.xlu1 %v2317_v37, %s4553_s13  ;;  %v1520_v55 = vstv %s5205_s8  ;;  %v1584_v60 = vrot.slane %v4943_v30, 2  ;;  %v1616_v27 = vsel %vm1605_vm13, %v5009_v4, %v1615_v47 }
 0x161   :  { %v1537_v37 = vadd.f32 %v1535_v36, %v1501_v0  ;;  %v1521_v4 = vmul.f32 %v5218_v29, %v1520_v55  ;;  %v1655_v47 = vrot.slane %v5111_v50, 2 }
 0x162   :  { %2309 = vrot.lane.b32.xlu0 %v2307_v17, %s4553_s13  ;;  %v1585_v36 = vsel %vm1534_vm12, %v4943_v30, %v1584_v60  ;;  %v1618_v0 = vadd.f32 %v1616_v27, %v1547_v52  ;;  %v5289_v30 = vpop.permute.xlu1 %1787  ;;  %v1727_v27 = vrot.slane %v5214_v62, 2  ;;  %2988 = vmatmul.mubr.f32.gmra.mrb[4].mxu0 %v5016_v35 }
 0x163   :  { %v1587_v55 = vadd.f32 %v1585_v36, %v1521_v4  ;;  %v1608_v60 = vadd.f32 %v1606_v25, %v1537_v37  ;;  %v5989_v37 = vand.u32 4294901760, %v5164_v45  ;;  %v5990_v36 = vand.u32 4294901760, %v5001_v15  ;;  %2993 = vmatprep.mubr.f32.mxu0 %v5988_v49 }
 0x164   :  { %v1736_v17 = vpop.permute.xlu0 %1735  ;;  %2329 = vrot.lane.b32.xlu1 %v2327_v9, %s4553_s13  ;;  %v1574_v25 = vrot.slane %v4945_v31, 2  ;;  %v1697_v15 = vrot.slane %v5192_v16, 2 }
 0x165   :  { %v1737_v21 = vrot.slane %v1736_v17, 2  ;;  %3116 = vmatprep.subr.mxu0 %v5990_v36 }
 0x166   :  { %2259 = vrot.lane.b32.xlu0 %v2257_v56, %s4552_s27  ;;  %v1687_v56 = vrot.slane %v5150_v46, 2  ;;  %2996 = vmatmul.mubr.f32.gmra.mrb[6].mxu0 %v5025_v38  ;;  %s5351_s27 = sld [smem:[#allocation7 + $0x31]] }
 0x167   :  { %v1738_v53 = vsel %vm1677_vm14, %v1736_v17, %v1737_v21  ;;  %v1656_v21 = vsel %vm1605_vm13, %v5111_v50, %v1655_v47  ;;  %v1708_v17 = vsel %vm1677_vm14, %v5190_v32, %v1707_v48  ;;  %v5991_v32 = vand.u32 4294901760, %v5174_v3  ;;  %3001 = vmatprep.mubr.f32.mxu0 %v5988_v49 }
 0x168   :  { %v1758_v2 = vpop.permute.xlu0 %1757  ;;  %v1688_v52 = vsel %vm1677_vm14, %v5150_v46, %v1687_v56  ;;  %v1678_v47 = vsel %vm1677_vm14, %v5152_v51, %v1676_v33 }
 0x169   :  { %v1759_v23 = vrot.slane %v1758_v2, 6  ;;  %v1690_v46 = vadd.f32 %v1688_v52, %v1618_v0  ;;  %v1658_v0 = vadd.f32 %v1656_v21, %v1587_v55  ;;  %v5992_v52 = vand.u32 4294901760, %v5187_v12 }
 0x16a   :  { %2379 = vrot.lane.b32.xlu0 %v2377_v41, %s4554_s21  ;;  %v1516_v41 = vstv %s5259_s19  ;;  %v1645_v12 = vrot.slane %v5069_v61, 2  ;;  %3004 = vmatmul.mubr.f32.gmra.mrb[8].mxu0 %v5061_v39 }
 0x16b   :  { %v1760_v50 = vsel %vm1749_vm15, %v1759_v23, %v1758_v2  ;;  %3076 = vmatprep.mubr.f32.mxu0 %v5988_v49 }
 0x16c   :  { %v1778_v9 = vpop.permute.xlu0 %1777 }
 0x16e   :  { %3080 = vmatmul.mubr.f32.vlgmr.msra.gmra.mrb[2].mxu0 %v5033_v43 }
 0x16f   :  { %3085 = vmatprep.mubr.f32.mxu0 %v5988_v49 }
 0x170   :  { %v1798_v4 = vpop.permute.xlu0 %1797 }
 0x171   :  { %v1799_v55 = vrot.slane %v1798_v4, 6 }
 0x174   :  { %v1818_v33 = vpop.permute.xlu0 %1817 }
 0x1d6   :  { %v762_v5 = vpop.f32.mrb[0].mxu0 }
 0x1d7   :  { %v766_v28 = vmax.f32 %v762_v5, 0.0  ;;  %v4245_v24 = vpop.f32.mrb[1].mxu0  ;;  %v1808_v5 = vpop.permute.xlu1 %1807 }
 0x1d8   :  { %v1636_v24 = vsel %vm1605_vm13, %v5071_v63, %v1635_v44  ;;  %v1625_v63 = vrot.slane %v5007_v34, 2  ;;  %v1740_v44 = vadd.f32 %v1738_v53, %v1668_v54  ;;  %v1762_v54 = vadd.f32 %v1760_v50, %v1690_v46 }
 0x1d9   :  { %v785_v10 = vsel %vm310_vm9, %v766_v28, 0  ;;  %v1638_v19 = vadd.f32 %v1636_v24, %v1567_v40  ;;  %v1779_v28 = vrot.slane %v1778_v9, 6  ;;  %v1809_v40 = vrot.slane %v1808_v5, 6 }
 0x1da   :  { %v5291_v57 = vand.u32 4294901760, %v785_v10  ;;  %v1626_v45 = vsel %vm1605_vm13, %v5007_v34, %v1625_v63  ;;  %v1728_v24 = vsel %vm1677_vm14, %v5214_v62, %v1727_v27  ;;  %v1748_v34 = vrot.slane %v5244_v14, 6 }
 0x1db   :  { %v1810_v3 = vsel %vm1749_vm15, %v1809_v40, %v1808_v5  ;;  %v1829_v51 = vpop.permute.xlu1 %1828  ;;  %v1780_v23 = vsel %vm1749_vm15, %v1779_v28, %v1778_v9  ;;  %v1575_v62 = vsel %vm1534_vm12, %v4945_v31, %v1574_v25  ;;  %v1628_v21 = vadd.f32 %v1626_v45, %v5273_v18 }
 0x1dc   :  { %v5300_v58 = vsub.f32 %v785_v10, %v5291_v57  ;;  %4246 = vmatprep.subr.mxu1 %v5291_v57  ;;  %v1710_v10 = vadd.f32 %v1708_v17, %v1638_v19  ;;  %v5336_v48 = vadd.f32 %v1810_v3, %v1740_v44  ;;  %v1830_v63 = vrot.slane %v1829_v51, 6 }
 0x1dd   :  { %4247 = vmatpush3.msra.mxu1 %v5291_v57  ;;  %v1517_v19 = vmul.f32 %v5218_v29, %v1516_v41  ;;  %v1680_v46 = vadd.f32 %v1678_v47, %v1608_v60  ;;  %v1698_v9 = vsel %vm1677_vm14, %v5192_v16, %v1697_v15  ;;  %v1730_v29 = vadd.f32 %v1728_v24, %v1658_v0 }
 0x1de   :  { %4249 = vmatmul.mubr.f32.vlgmr.msra.gmra.mrb[0].mxu1 %v5989_v37  ;;  %v5315_v56 = vand.u32 4294901760, %v5300_v58  ;;  %v1831_v17 = vsel %vm1820_vm0, %v1830_v63, %v1829_v51  ;;  %v1750_v31 = vsel %vm1749_vm15, %v1748_v34, %v5244_v14  ;;  %v1782_v18 = vadd.f32 %v1780_v23, %v1710_v10  ;;  %v1839_v37 = vpop.permute.xlu0 %1838 }
 0x1df   :  { %4251 = vmatprep.mubr.f32.mxu1 %v5991_v32  ;;  %v5356_v41 = vadd.f32 %v1831_v17, %v1762_v54  ;;  %v1849_v27 = vpop.permute.xlu1 %1848  ;;  %v1769_v16 = vrot.slane %v5268_v26, 6  ;;  %v1800_v60 = vsel %vm1749_vm15, %v1799_v55, %v1798_v4  ;;  %v1819_v44 = vrot.slane %v1818_v33, 6  ;;  %v5998_v17 = vld [vmem:[#allocation20_spill] sm:$0xff] }
 0x1e0   :  { %v897_v2 = vsub.f32 %v5300_v58, %v5315_v56  ;;  %v1850_v5 = vrot.slane %v1849_v27, 6  ;;  %v1577_v14 = vadd.f32 %v1575_v62, %v1517_v19  ;;  %v1646_v50 = vsel %vm1605_vm13, %v5069_v61, %v1645_v12  ;;  %v5995_v19 = vld [vmem:[#allocation16_spill] sm:$0xff]  ;;  %v5996_v62 = vld [vmem:[#allocation27_spill] sm:$0xff]  ;;  %3089 = vmatmul.mubr.f32.gmra.mrb[4].mxu0 %v5998_v17 }
 0x1e1   :  { %v1700_v28 = vadd.f32 %v1698_v9, %v1628_v21  ;;  %v1752_v4 = vadd.f32 %v1750_v31, %v1680_v46  ;;  %v1802_v36 = vadd.f32 %v1800_v60, %v1730_v29  ;;  %v1770_v61 = vsel %vm1749_vm15, %v1769_v16, %v5268_v26  ;;  %v5997_v21 = vld [vmem:[#allocation15_spill] sm:$0xff]  ;;  %v2653_v60 = vld [vmem:[%s5924_s1 + $0x18] sm:$0xff]  ;;  %3094 = vmatprep.mubr.f32.mxu0 %v5988_v49 }
 0x1e2   :  { %4252 = vmatmul.mubr.f32.gmra.mrb[2].mxu1 %v5992_v52  ;;  %v898_v53 = vand.u32 4294901760, %v897_v2  ;;  %v1851_v40 = vsel %vm1820_vm0, %v1850_v5, %v1849_v27  ;;  %v1821_v45 = vsel %vm1820_vm0, %v1819_v44, %v1818_v33  ;;  %v1840_v0 = vrot.slane %v1839_v37, 6  ;;  %v1859_v2 = vpop.permute.xlu0 %1858  ;;  %v5994_v52 = vld [vmem:[#allocation25_spill] sm:$0xff]  ;;  %v5999_v44 = vld [vmem:[#allocation28_spill] sm:$0xff] }
 0x1e3   :  { %4256 = vmatprep.mubr.f32.mxu1 %v4813_v59  ;;  %v5374_v32 = vadd.f32 %v1851_v40, %v1782_v18  ;;  %v1869_v25 = vpop.permute.xlu1 %1868  ;;  %v1648_v10 = vadd.f32 %v1646_v50, %v1577_v14  ;;  %v1956_v3 = vstv %s5351_s27  ;;  %v1772_v24 = vadd.f32 %v1770_v61, %v1700_v28 }
 0x1e4   :  { %4254 = vmatprep.subr.mxu1 %v898_v53  ;;  %v1870_v47 = vrot.slane %v1869_v25, 6  ;;  %v1823_v34 = vadd.f32 %v1821_v45, %v1752_v4  ;;  %v5993_v26 = vand.u32 4294901760, %v4987_v13  ;;  %v1789_v23 = vrot.slane %v5289_v30, 6 }
 0x1e5   :  { %4255 = vmatpush3.msra.mxu1 %v898_v53  ;;  %v1841_v55 = vsel %vm1820_vm0, %v1840_v0, %v1839_v37  ;;  %v1957_v12 = vmul.f32 %v1956_v3, %v5997_v21  ;;  %v1964_v9 = vstv %s5370_s11  ;;  %v1860_v37 = vrot.slane %v1859_v2, 6 }
 0x1e6   :  { %4257 = vmatmul.mubr.f32.vlgmr.msra.gmra.mrb[0].mxu1 %v5078_v20  ;;  %4262 = vmatprep.subr.mxu1 %v5300_v58  ;;  %v1871_v15 = vsel %vm1820_vm0, %v1870_v47, %v1869_v25  ;;  %v1879_v33 = vpop.permute.xlu0 %1878  ;;  %v1843_v31 = vadd.f32 %v1841_v55, %v1772_v24  ;;  %v1790_v5 = vsel %vm1749_vm15, %v1789_v23, %v5289_v30  ;;  %v6000_v40 = vand.u32 4294901760, %v4816_v7  ;;  %v6001_v30 = vld [vmem:[#allocation21_spill] sm:$0xff] }
 0x1e7   :  { %4263 = vmatpush3.msra.mxu1 %v5300_v58  ;;  %4259 = vmatprep.mubr.f32.mxu1 %v5091_v11  ;;  %v1717_v58 = vrot.slane %v5224_v8, 2  ;;  %v5385_v54 = vadd.f32 %v1871_v15, %v1802_v36  ;;  %v1889_v51 = vpop.permute.xlu1 %1888  ;;  %v1880_v13 = vrot.slane %v1879_v33, 6  ;;  %v1965_v36 = vmul.f32 %v1964_v9, %v5997_v21 }
 0x1e8   :  { %4270 = vmatprep.subr.mxu1 %v5291_v57  ;;  %3120 = vmatpush1.msra.mxu0 %v5993_v26  ;;  %v1890_v63 = vrot.slane %v1889_v51, 6  ;;  %v5426_v45 = vand.u32 4294901760, %v2653_v60  ;;  %v1861_v15 = vsel %vm1820_vm0, %v1860_v37, %v1859_v2  ;;  %v2652_v2 = vld [vmem:[%s5924_s1 + $0x10] sm:$0xff]  ;;  %v1968_v55 = vstv %s5407_s12  ;;  %s4129_s1 = sld [smem:[#allocation7 + $0x37]] }
 0x1e9   :  { %v1718_v53 = vsel %vm1677_vm14, %v5224_v8, %v1717_v58  ;;  %3213 = vmatprep.subr.mxu0 %v5995_v19  ;;  %v1960_v8 = vstv %s5368_s9  ;;  %v1881_v27 = vsel %vm1820_vm0, %v1880_v13, %v1879_v33  ;;  %3098 = vmatmul.mubr.f32.gmra.mrb[6].mxu0 %v6001_v30  ;;  %v5462_v13 = vld [vmem:[#allocation2 + $0x8] sm:$0x3f]  ;;  %vm2561_vm9 = vcmask 384000  }
 0x1ea   :  { %4260 = vmatmul.mubr.f32.gmra.mrb[2].mxu1 %v5099_v42  ;;  %v1891_v46 = vsel %vm313_vm5, %v1890_v63, %v1889_v51  ;;  %v1720_v29 = vadd.f32 %v1718_v53, %v1648_v10  ;;  %v5417_v14 = vadd.f32 %v1881_v27, %v5336_v48  ;;  %v1899_v28 = vpop.permute.xlu0 %1898  ;;  %v1961_v61 = vmul.f32 %v1960_v8, %v5997_v21 }
 0x1eb   :  { %4264 = vmatprep.mubr.f32.mxu1 %v4816_v7  ;;  %v1893_v18 = vadd.f32 %v1891_v46, %v1823_v34  ;;  %v1909_v16 = vpop.permute.xlu1 %1908  ;;  %v1900_v58 = vrot.slane %v1899_v28, 6  ;;  %3103 = vmatprep.mubr.f32.mxu0 %v5988_v49  ;;  %v6002_v10 = vand.u32 4294901760, %v5994_v52  ;;  %v6003_v34 = vand.u32 4294901760, %v5996_v62 }
 0x1ec   :  { %v1910_v50 = vrot.slane %v1909_v16, 6  ;;  %v1792_v48 = vadd.f32 %v1790_v5, %v1720_v29  ;;  %v6005_v63 = vand.u32 4294901760, %v5999_v44  ;;  %v1969_v8 = vmul.f32 %v5462_v13, %v1968_v55  ;;  %v6006_v29 = vld [vmem:[#allocation17_spill] sm:$0xff] }
 0x1ed   :  { %v5421_v4 = vadd.f32 %v1957_v12, %v1893_v18  ;;  %v1901_v47 = vsel %vm313_vm5, %v1900_v58, %v1899_v28  ;;  %v5465_v12 = vand.u32 4294901760, %v2652_v2 }
 0x1ee   :  { %4265 = vmatmul.mubr.f32.vlgmr.msra.gmra.mrb[0].mxu1 %v5994_v52  ;;  %v1911_v25 = vsel %vm313_vm5, %v1910_v50, %v1909_v16  ;;  %v1903_v3 = vadd.f32 %v1901_v47, %v5356_v41  ;;  %v5437_v24 = vpop.permute.xlu0 %1987  ;;  %v1972_v52 = vstv %s5403_s26  ;;  %v5452_v41 = vsub.f32 %v2653_v60, %v5426_v45  ;;  %v6007_v50 = vld [vmem:[#allocation18_spill] sm:$0xff] }
 0x1ef   :  { %4271 = vmatpush3.msra.mxu1 %v5291_v57  ;;  %4267 = vmatprep.mubr.f32.mxu1 %v5996_v62  ;;  %v1913_v0 = vadd.f32 %v1911_v25, %v1843_v31  ;;  %v5430_v7 = vpop.permute.xlu1 %1997  ;;  %v1863_v53 = vadd.f32 %v1861_v15, %v1792_v48  ;;  %v1973_v21 = vmul.f32 %v5462_v13, %v1972_v52  ;;  %v6008_v48 = vld [vmem:[#allocation19_spill] sm:$0xff] }
 0x1f0   :  { %4278 = vmatprep.subr.mxu1 %v5315_v56  ;;  %v5445_v26 = vadd.f32 %v1961_v61, %v1903_v3  ;;  %v3420_v9 = vand.u32 4294901760, %v5452_v41  ;;  %v5486_v5 = vsub.f32 %v2652_v2, %v5465_v12  ;;  %v6009_v2 = vld [vmem:[#allocation29_spill] sm:$0xff] }
 0x1f1   :  { %v5442_v51 = vadd.f32 %v1965_v36, %v1913_v0 }
 0x1f2   :  { %4268 = vmatmul.mubr.f32.gmra.mrb[2].mxu1 %v5999_v44  ;;  %v1919_v19 = vpop.permute.xlu0 %1918  ;;  %v3426_v58 = vand.u32 4294901760, %v5486_v5 }
 0x1f3   :  { %4272 = vmatprep.mubr.f32.mxu1 %v6000_v40  ;;  %v1929_v23 = vpop.permute.xlu1 %1928  ;;  %v1920_v62 = vrot.slane %v1919_v19, 6 }
 0x1f4   :  { %v1930_v33 = vrot.slane %v1929_v23, 6 }
 0x1f5   :  { %v1921_v18 = vsel %vm313_vm5, %v1920_v62, %v1919_v19 }
 0x1f6   :  { %4273 = vmatmul.mubr.f32.vlgmr.msra.gmra.mrb[0].mxu1 %v6002_v10  ;;  %v1931_v46 = vsel %vm313_vm5, %v1930_v33, %v1929_v23  ;;  %v1923_v16 = vadd.f32 %v1921_v18, %v5374_v32  ;;  %v5478_v60 = vpop.permute.xlu0 %2007  ;;  %v1976_v32 = vstv %s5454_s17 }
 0x1f7   :  { %4279 = vmatpush3.msra.mxu1 %v5315_v56  ;;  %4275 = vmatprep.mubr.f32.mxu1 %v6003_v34  ;;  %v6004_v56 = vld [vmem:[#allocation24_spill] sm:$0xff]  ;;  %v1933_v31 = vadd.f32 %v1931_v46, %v1863_v53  ;;  %v5472_v27 = vpop.permute.xlu1 %2057  ;;  %v1977_v36 = vmul.f32 %v5462_v13, %v1976_v32  ;;  %v1980_v34 = vstv %s4129_s1  ;;  %v6011_v32 = vld [vmem:[#allocation23_spill] sm:$0xff] }
 0x1f8   :  { %4286 = vmatprep.subr.mxu1 %v5291_v57  ;;  %3107 = vmatmul.mubr.f32.gmra.mrb[8].mxu0 %v6004_v56  ;;  %v5488_v37 = vadd.f32 %v1969_v8, %v1923_v16  ;;  %v6010_v8 = vld [vmem:[#allocation22_spill] sm:$0xff] }
 0x1f9   :  { %3183 = vmatprep.mubr.f32.mxu0 %v5988_v49  ;;  %v5483_v44 = vadd.f32 %v1973_v21, %v1933_v31 }
 0x1fa   :  { %4276 = vmatmul.mubr.f32.gmra.mrb[2].mxu1 %v6005_v63  ;;  %v5498_v40 = vpop.permute.xlu0 %2067 }
 0x1fb   :  { %4280 = vmatprep.mubr.f32.mxu1 %v4813_v59  ;;  %v1939_v28 = vpop.permute.xlu1 %1938 }
 0x1fc   :  { %3185 = vmatmul.mubr.f32.vlgmr.msra.gmra.mrb[2].mxu0 %v6006_v29 }
 0x1fd   :  { %3190 = vmatprep.mubr.f32.mxu0 %v5988_v49  ;;  %3215 = vmatpush1.msra.mxu0 %v4901_v22  ;;  %v3421_v22 = vsub.f32 %v5452_v41, %v3420_v9 }
 0x1fe   :  { %4281 = vmatmul.mubr.f32.vlgmr.msra.gmra.mrb[0].mxu1 %v5078_v20  ;;  %3308 = vmatprep.subr.mxu0 %v5426_v45  ;;  %v5510_v10 = vpop.permute.xlu0 %2077 }
 0x1ff   :  { %4287 = vmatpush3.msra.mxu1 %v5291_v57  ;;  %4283 = vmatprep.mubr.f32.mxu1 %v5091_v11  ;;  %v1940_v57 = vrot.slane %v1939_v28, 6  ;;  %v3422_v61 = vand.u32 4294901760, %v3421_v22  ;;  %v5506_v47 = vpop.permute.xlu1 %2128 }
 0x200   :  { %4294 = vmatprep.subr.mxu1 %v5426_v45  ;;  %3192 = vmatmul.mubr.f32.gmra.mrb[4].mxu0 %v6007_v50 }
 0x201   :  { %3197 = vmatprep.mubr.f32.mxu0 %v5988_v49  ;;  %v1941_v25 = vsel %vm313_vm5, %v1940_v57, %v1939_v28 }
 0x202   :  { %4284 = vmatmul.mubr.f32.gmra.mrb[2].mxu1 %v5099_v42  ;;  %v1943_v0 = vadd.f32 %v1941_v25, %v5385_v54 }
 0x203   :  { %4288 = vmatprep.mubr.f32.mxu1 %v4813_v59  ;;  %v3427_v59 = vsub.f32 %v5486_v5, %v3426_v58  ;;  %v5518_v54 = vpop.permute.xlu1 %2017 }
 0x204   :  { %3199 = vmatmul.mubr.f32.gmra.mrb[6].mxu0 %v6008_v48  ;;  %v1978_v15 = vadd.f32 %v1977_v36, %v1943_v0  ;;  %v6012_v36 = vld [vmem:[#allocation26_spill] sm:$0xff] }
 0x205   :  { %3204 = vmatprep.mubr.f32.mxu0 %v5988_v49 }
 0x206   :  { %4289 = vmatmul.mubr.f32.vlgmr.msra.gmra.mrb[0].mxu1 %v5078_v20  ;;  %v5522_v20 = vpop.permute.xlu0 %2138 }
 0x207   :  { %4291 = vmatprep.mubr.f32.mxu1 %v5091_v11  ;;  %4295 = vmatpush1.msra.mxu1 %v5465_v12  ;;  %v3428_v11 = vand.u32 4294901760, %v3427_v59  ;;  %v5526_v3 = vpop.permute.xlu1 %2027 }
 0x208   :  { %3423 = vmatprep.subr.mxu1 %v3422_v61  ;;  %3206 = vmatmul.mubr.f32.gmra.mrb[8].mxu0 %v5018_v1 }
 0x209   :  { %3278 = vmatprep.mubr.f32.mxu0 %v5988_v49 }
 0x20a   :  { %4292 = vmatmul.mubr.f32.gmra.mrb[2].mxu1 %v5099_v42  ;;  %v1949_v52 = vpop.permute.xlu0 %1948  ;;  %v1981_v42 = vmul.f32 %v5462_v13, %v1980_v34 }
 0x20b   :  { %3406 = vmatprep.mubr.f32.mxu1 %v5988_v49  ;;  %v1950_v53 = vrot.slane %v1949_v52, 6  ;;  %v5536_v55 = vpop.permute.xlu1 %2199 }
 0x20c   :  { %3280 = vmatmul.mubr.f32.vlgmr.msra.gmra.mrb[2].mxu0 %v6006_v29 }
 0x20d   :  { %3285 = vmatprep.mubr.f32.mxu0 %v5988_v49  ;;  %3310 = vmatpush1.msra.mxu0 %v5465_v12  ;;  %v1951_v23 = vsel %vm313_vm5, %v1950_v53, %v1949_v52 }
 0x20e   :  { %3412 = vmatmul.mubr.f32.vlgmr.msra.gmra.mrb[4].mxu1 %v6009_v2  ;;  %v1953_v63 = vadd.f32 %v1951_v23, %v5417_v14  ;;  %v5540_v33 = vpop.permute.xlu0 %2148 }
 0x20f   :  { %3429 = vmatpush1.msra.mxu1 %v3428_v11  ;;  %3492 = vmatprep.mubr.f32.mxu1 %v5988_v49  ;;  %v5547_v62 = vpop.permute.xlu1 %2087 }
 0x210   :  { %3523 = vmatprep.subr.mxu1 %v5452_v41  ;;  %3287 = vmatmul.mubr.f32.gmra.mrb[4].mxu0 %v6007_v50  ;;  %v1982_v19 = vadd.f32 %v1981_v42, %v1953_v63 }
 0x211   :  { %3292 = vmatprep.mubr.f32.mxu0 %v5988_v49 }
 0x212   :  { %3494 = vmatmul.mubr.f32.vlgmr.msra.gmra.mrb[6].mxu1 %v6006_v29  ;;  %v5550_v13 = vpop.permute.xlu0 %2209 }
 0x213   :  { %3499 = vmatprep.mubr.f32.mxu1 %v5988_v49  ;;  %3526 = vmatpush1.msra.mxu1 %v5486_v5  ;;  %v5555_v14 = vpop.permute.xlu1 %2097 }
 0x214   :  { %3623 = vmatprep.subr.mxu1 %v5426_v45  ;;  %3294 = vmatmul.mubr.f32.gmra.mrb[6].mxu0 %v6008_v48 }
 0x215   :  { %3299 = vmatprep.mubr.f32.mxu0 %v5988_v49 }
 0x216   :  { %3501 = vmatmul.mubr.f32.gmra.mrb[8].mxu1 %v6007_v50  ;;  %v2038_v21 = vpop.permute.xlu0 %2037 }
 0x217   :  { %3506 = vmatprep.mubr.f32.mxu1 %v5988_v49  ;;  %v2039_v46 = vrot.slane %v2038_v21, 2  ;;  %v5562_v18 = vpop.permute.xlu1 %2269 }
 0x218   :  { %3301 = vmatmul.mubr.f32.gmra.mrb[8].mxu0 %v5018_v1 }
 0x219   :  { %3373 = vmatprep.mubr.f32.mxu0 %v5988_v49  ;;  %v2040_v31 = vsel %vm1534_vm12, %v2038_v21, %v2039_v46 }
 0x21a   :  { %3508 = vmatmul.mubr.f32.gmra.mrb[10].mxu1 %v6008_v48  ;;  %v2042_v16 = vadd.f32 %v2040_v31, %v1978_v15  ;;  %v5565_v22 = vpop.permute.xlu0 %2219 }
 0x21b   :  { %3513 = vmatprep.mubr.f32.mxu1 %v5988_v49  ;;  %v5570_v28 = vpop.permute.xlu1 %2158 }
 0x21c   :  { %3379 = vmatmul.mubr.f32.vlgmr.msra.gmra.mrb[10].mxu0 %v6010_v8 }
 0x21d   :  { %3384 = vmatprep.mubr.f32.mxu0 %v5988_v49 }
 0x21e   :  { %3515 = vmatmul.mubr.f32.gmra.mrb[4].mxu1 %v5018_v1  ;;  %v5573_v57 = vpop.permute.xlu0 %2279 }
 0x21f   :  { %3589 = vmatprep.mubr.f32.mxu1 %v5988_v49  ;;  %v2108_v25 = vpop.permute.xlu1 %2107 }
 0x220   :  { %3390 = vmatmul.mubr.f32.gmra.mrb[12].mxu0 %v6011_v32  ;;  %v2109_v61 = vrot.slane %v2108_v25, 2 }
 0x221   :  { %3395 = vmatprep.mubr.f32.mxu0 %v5988_v49 }
 0x222   :  { %3592 = vmatmul.mubr.f32.vlgmr.msra.gmra.mrb[6].mxu1 %v5013_v6  ;;  %v2048_v0 = vpop.permute.xlu0 %2047  ;;  %v2110_v15 = vsel %vm1605_vm13, %v2108_v25, %v2109_v61 }
 0x223   :  { %3597 = vmatprep.mubr.f32.mxu1 %v5988_v49  ;;  %3625 = vmatpush1.msra.mxu1 %v5465_v12  ;;  %v2049_v59 = vrot.slane %v2048_v0, 2  ;;  %v2112_v6 = vadd.f32 %v2110_v15, %v2042_v16  ;;  %v5585_v34 = vpop.permute.xlu1 %2289 }
 0x224   :  { %3728 = vmatprep.subr.mxu1 %v3420_v9  ;;  %3401 = vmatmul.mubr.f32.gmra.mrb[14].mxu0 %v6012_v36 }
 0x225   :  { %v2050_v11 = vsel %vm1534_vm12, %v2048_v0, %v2049_v59  ;;  %v1999_v59 = vrot.slane %v5430_v7, 2 }
 0x226   :  { %3600 = vmatmul.mubr.f32.gmra.mrb[8].mxu1 %v5016_v35  ;;  %v2052_v52 = vadd.f32 %v2050_v11, %v1982_v19  ;;  %v5587_v41 = vpop.permute.xlu0 %2168  ;;  %v2009_v11 = vrot.slane %v5478_v60, 2 }
 0x227   :  { %3605 = vmatprep.mubr.f32.mxu1 %v5988_v49  ;;  %v5591_v9 = vpop.permute.xlu1 %2349 }
 0x22a   :  { %3608 = vmatmul.mubr.f32.gmra.mrb[10].mxu1 %v5025_v38  ;;  %v5593_v35 = vpop.permute.xlu0 %2339 }
 0x22b   :  { %3613 = vmatprep.mubr.f32.mxu1 %v5988_v49  ;;  %v2118_v2 = vpop.permute.xlu1 %2117 }
 0x22c   :  { %v2119_v53 = vrot.slane %v2118_v2, 2 }
 0x22e   :  { %3616 = vmatmul.mubr.f32.gmra.mrb[4].mxu1 %v5061_v39  ;;  %v5597_v42 = vpop.permute.xlu0 %2229  ;;  %v2120_v38 = vsel %vm1605_vm13, %v2118_v2, %v2119_v53  ;;  %v2201_v53 = vrot.slane %v5536_v55, 6 }
 0x22f   :  { %3688 = vmatprep.mubr.f32.mxu1 %v5988_v49  ;;  %v2122_v23 = vadd.f32 %v2120_v38, %v2052_v52  ;;  %v5605_v63 = vpop.permute.xlu1 %2239  ;;  %v2079_v38 = vrot.slane %v5510_v10, 2 }
 0x232   :  { %3692 = vmatmul.mubr.f32.vlgmr.msra.gmra.mrb[6].mxu1 %v5033_v43  ;;  %v2179_v39 = vpop.permute.xlu0 %2178 }
 0x233   :  { %3697 = vmatprep.mubr.f32.mxu1 %v5988_v49  ;;  %3732 = vmatpush1.msra.mxu1 %v3426_v58  ;;  %v2180_v19 = vrot.slane %v2179_v39, 2  ;;  %v5610_v21 = vpop.permute.xlu1 %2299 }
 0x234   :  { %3825 = vmatprep.subr.mxu1 %v5426_v45 }
 0x235   :  { %v2181_v43 = vsel %vm1677_vm14, %v2179_v39, %v2180_v19  ;;  %v2019_v39 = vrot.slane %v5518_v54, 2  ;;  %v2211_v19 = vrot.slane %v5550_v13, 6 }
 0x236   :  { %3701 = vmatmul.mubr.f32.gmra.mrb[8].mxu1 %v5998_v17  ;;  %v2183_v46 = vadd.f32 %v2181_v43, %v2112_v6  ;;  %v5612_v5 = vpop.permute.xlu0 %2359  ;;  %v2271_v43 = vrot.slane %v5562_v18, 6 }
 0x237   :  { %3706 = vmatprep.mubr.f32.mxu1 %v5988_v49  ;;  %v2250_v45 = vpop.permute.xlu1 %2249 }
 0x238   :  { %v2251_v58 = vrot.slane %v2250_v45, 6 }
 0x23a   :  { %3710 = vmatmul.mubr.f32.gmra.mrb[10].mxu1 %v6001_v30  ;;  %v2189_v8 = vpop.permute.xlu0 %2188  ;;  %v2252_v31 = vsel %vm1749_vm15, %v2251_v58, %v2250_v45  ;;  %v2150_v45 = vrot.slane %v5540_v33, 2  ;;  %v2020_v58 = vsel %vm1534_vm12, %v5518_v54, %v2019_v39 }
 0x23b   :  { %3715 = vmatprep.mubr.f32.mxu1 %v5988_v49  ;;  %v2190_v17 = vrot.slane %v2189_v8, 2  ;;  %v5619_v16 = vadd.f32 %v2252_v31, %v2183_v46  ;;  %v2080_v46 = vsel %vm1605_vm13, %v5510_v10, %v2079_v38  ;;  %v2272_v31 = vsel %vm1820_vm0, %v2271_v43, %v5562_v18 }
 0x23c   :  { %v2341_v10 = vrot.slane %v5593_v35, 6  ;;  %v2022_v54 = vadd.f32 %v2020_v58, %v5488_v37  ;;  %v2351_v37 = vrot.slane %v5591_v9, 6  ;;  %v2301_v43 = vrot.slane %v5610_v21, 6 }
 0x23d   :  { %v2191_v32 = vsel %vm1677_vm14, %v2189_v8, %v2190_v17  ;;  %v2089_v17 = vrot.slane %v5547_v62, 2 }
 0x23e   :  { %3719 = vmatmul.mubr.f32.gmra.mrb[4].mxu1 %v6004_v56  ;;  %v2193_v36 = vadd.f32 %v2191_v32, %v2122_v23  ;;  %v5622_v25 = vpop.permute.xlu0 %2309 }
 0x23f   :  { %3795 = vmatprep.mubr.f32.mxu1 %v5988_v49  ;;  %v2090_v18 = vsel %vm1605_vm13, %v5547_v62, %v2089_v17  ;;  %v2241_v17 = vrot.slane %v5605_v63, 6 }
 0x242   :  { %3797 = vmatmul.mubr.f32.vlgmr.msra.gmra.mrb[6].mxu1 %v6006_v29  ;;  %v2260_v30 = vpop.permute.xlu0 %2259 }
 0x243   :  { %3802 = vmatprep.mubr.f32.mxu1 %v5988_v49  ;;  %3827 = vmatpush1.msra.mxu1 %v5465_v12  ;;  %v2261_v56 = vrot.slane %v2260_v30, 6  ;;  %v1989_v12 = vrot.slane %v5437_v24, 2 }
 0x245   :  { %v2262_v61 = vsel %vm1749_vm15, %v2261_v56, %v2260_v30  ;;  %v1990_v15 = vsel %vm1534_vm12, %v5437_v24, %v1989_v12  ;;  %v2151_v30 = vsel %vm1677_vm14, %v5540_v33, %v2150_v45  ;;  %v2221_v56 = vrot.slane %v5565_v22, 6 }
 0x246   :  { %3804 = vmatmul.mubr.f32.gmra.mrb[8].mxu1 %v6007_v50  ;;  %v5630_v0 = vadd.f32 %v2262_v61, %v2193_v36  ;;  %v1992_v6 = vadd.f32 %v1990_v15, %v5421_v4  ;;  %v2029_v36 = vrot.slane %v5526_v3, 2  ;;  %v2342_v33 = vsel %vm313_vm5, %v2341_v10, %v5593_v35 }
 0x247   :  { %3809 = vmatprep.mubr.f32.mxu1 %v5988_v49  ;;  %v2222_v35 = vsel %vm1749_vm15, %v2221_v56, %v5565_v22  ;;  %v4557_v10 = vmov 0  }
 0x248   :  { %v2030_v62 = vsel %vm1534_vm12, %v5526_v3, %v2029_v36  ;;  %4446 = vset.pattern.permute.xlu0 %v4557_v10  ;;  %4445 = vset.pattern.permute.xlu1 %v4557_v10 }
 0x249   :  { %v2032_v22 = vadd.f32 %v2030_v62, %v5483_v44 }
 0x24a   :  { %3811 = vmatmul.mubr.f32.gmra.mrb[10].mxu1 %v6008_v48 }
 0x24b   :  { %3816 = vmatprep.mubr.f32.mxu1 %v5988_v49 }
 0x24e   :  { %3818 = vmatmul.mubr.f32.gmra.mrb[4].mxu1 %v5018_v1 }
 0x24f   :  { %3890 = vmatprep.mubr.f32.mxu1 %v5988_v49 }
 0x252   :  { %3892 = vmatmul.mubr.f32.vlgmr.msra.gmra.mrb[6].mxu1 %v6006_v29  ;;  %v2059_v29 = vrot.slane %v5472_v27, 2 }
 0x253   :  { %3897 = vmatprep.mubr.f32.mxu1 %v5988_v49 }
 0x256   :  { %3899 = vmatmul.mubr.f32.gmra.mrb[8].mxu1 %v6007_v50  ;;  %v2000_v50 = vsel %vm1534_vm12, %v5430_v7, %v1999_v59  ;;  %v2140_v7 = vrot.slane %v5522_v20, 2  ;;  %v2160_v59 = vrot.slane %v5570_v28, 2 }
 0x257   :  { %3904 = vmatprep.mubr.f32.mxu1 %v5988_v49  ;;  %v2002_v52 = vadd.f32 %v2000_v50, %v5445_v26  ;;  %v4479_v50 = vld [vmem:[#allocation2 + $0xa] sm:$0x3f] }
 0x25a   :  { %3906 = vmatmul.mubr.f32.gmra.mrb[10].mxu1 %v6008_v48  ;;  %v2060_v48 = vsel %vm1605_vm13, %v5472_v27, %v2059_v29  ;;  %v2010_v27 = vsel %vm1534_vm12, %v5478_v60, %v2009_v11  ;;  %v2161_v11 = vsel %vm1677_vm14, %v5570_v28, %v2160_v59  ;;  %v2396_v28 = vstv %s5689_s10 }
 0x25b   :  { %3911 = vmatprep.mubr.f32.mxu1 %v5988_v49  ;;  %v2069_v49 = vrot.slane %v5498_v40, 2  ;;  %v2062_v2 = vadd.f32 %v2060_v48, %v1992_v6  ;;  %v2012_v60 = vadd.f32 %v2010_v27, %v5442_v51  ;;  %v2281_v51 = vrot.slane %v5573_v57, 6 }
 0x25d   :  { %v2070_v24 = vsel %vm1605_vm13, %v5498_v40, %v2069_v49  ;;  %v2141_v40 = vsel %vm1677_vm14, %v5522_v20, %v2140_v7  ;;  %v2082_v32 = vadd.f32 %v2080_v46, %v2012_v60  ;;  %v2282_v29 = vsel %vm1820_vm0, %v2281_v51, %v5573_v57 }
 0x25e   :  { %3913 = vmatmul.mubr.f32.gmra.mrb[4].mxu1 %v5018_v1  ;;  %v2130_v1 = vrot.slane %v5506_v47, 2  ;;  %v2072_v23 = vadd.f32 %v2070_v24, %v2002_v52  ;;  %v2092_v49 = vadd.f32 %v2090_v18, %v2022_v54  ;;  %v2231_v7 = vrot.slane %v5597_v42, 6 }
 0x25f   :  { %v2153_v57 = vadd.f32 %v2151_v30, %v2082_v32  ;;  %v2361_v60 = vrot.slane %v5612_v5, 6 }
 0x260   :  { %v2131_v4 = vsel %vm1677_vm14, %v5506_v47, %v2130_v1  ;;  %v2202_v47 = vsel %vm1749_vm15, %v2201_v53, %v5536_v55  ;;  %v2143_v8 = vadd.f32 %v2141_v40, %v2072_v23  ;;  %v2212_v55 = vsel %vm1749_vm15, %v2211_v19, %v5550_v13 }
 0x261   :  { %v2133_v26 = vadd.f32 %v2131_v4, %v2062_v2  ;;  %v2386_v13 = vstv %s5666_s18  ;;  %v2099_v1 = vrot.slane %v5555_v14, 2  ;;  %v2291_v2 = vrot.slane %v5585_v34, 6 }
 0x262   :  { %v2214_v61 = vadd.f32 %v2212_v55, %v2143_v8  ;;  %v2387_v48 = vmul.f32 %v4479_v50, %v2386_v13  ;;  %v2352_v4 = vsel %vm313_vm5, %v2351_v37, %v5591_v9  ;;  %v2224_v38 = vadd.f32 %v2222_v35, %v2153_v57  ;;  %v2380_v13 = vpop.permute.xlu0 %2379 }
 0x263   :  { %v2204_v20 = vadd.f32 %v2202_v47, %v2133_v26  ;;  %v2100_v27 = vsel %vm1605_vm13, %v5555_v14, %v2099_v1  ;;  %v2163_v23 = vadd.f32 %v2161_v11, %v2092_v49  ;;  %v2170_v26 = vrot.slane %v5587_v41, 2  ;;  %v6013_v47 = vld [vmem:[#allocation13_spill] sm:$0xff] }
 0x264   :  { %v2284_v52 = vadd.f32 %v2282_v29, %v2214_v61  ;;  %v2292_v9 = vsel %vm1820_vm0, %v2291_v2, %v5585_v34  ;;  %v2232_v44 = vsel %vm1749_vm15, %v2231_v7, %v5597_v42  ;;  %v2397_v14 = vmul.f32 %v4479_v50, %v2396_v28 }
 0x265   :  { %v2274_v12 = vadd.f32 %v2272_v31, %v2204_v20  ;;  %v2102_v46 = vadd.f32 %v2100_v27, %v2032_v22  ;;  %v2294_v45 = vadd.f32 %v2292_v9, %v2224_v38  ;;  %v2171_v34 = vsel %vm1677_vm14, %v5587_v41, %v2170_v26  ;;  %v2370_v20 = vpop.permute.xlu1 %2369 }
 0x266   :  { %v2354_v39 = vadd.f32 %v2352_v4, %v2284_v52  ;;  %v2234_v42 = vadd.f32 %v2232_v44, %v2163_v23  ;;  %v2302_v55 = vsel %vm1820_vm0, %v2301_v43, %v5610_v21  ;;  %v2362_v31 = vsel %vm313_vm5, %v2361_v60, %v5612_v5 }
 0x267   :  { %v2344_v3 = vadd.f32 %v2342_v33, %v2274_v12  ;;  %v2371_v51 = vrot.slane %v2370_v20, 6  ;;  %v2173_v32 = vadd.f32 %v2171_v34, %v2102_v46  ;;  %v2364_v30 = vadd.f32 %v2362_v31, %v2294_v45 }
 0x268   :  { %v2449_v58 = vrot.slane %v2354_v39, %v6013_v47  ;;  %v2304_v54 = vadd.f32 %v2302_v55, %v2234_v42  ;;  %v2242_v21 = vsel %vm1749_vm15, %v2241_v17, %v5605_v63  ;;  %v2311_v5 = vrot.slane %v5622_v25, 6 }
 0x269   :  { %v2408_v40 = vcombine.high %v2344_v3, %v2344_v3  ;;  %v2415_v19 = vrot.slane %v2344_v3, %v6013_v47  ;;  %v2372_v56 = vsel %vm313_vm5, %v2371_v51, %v2370_v20  ;;  %v2442_v18 = vcombine.high %v2354_v39, %v2354_v39  ;;  %v2320_v45 = vpop.permute.xlu1 %2319 }
 0x26a   :  { %v2457_v36 = vcombine.high %v2449_v58, %v2449_v58  ;;  %v2244_v61 = vadd.f32 %v2242_v21, %v2173_v32  ;;  %v2476_v12 = vcombine.high %v2364_v30, %v2364_v30  ;;  %v2483_v59 = vrot.slane %v2364_v30, %v6013_v47 }
 0x26b   :  { %v2422_v8 = vrot.slane %v2408_v40, %v6013_v47  ;;  %v2423_v41 = vcombine.high %v2415_v19, %v2415_v19  ;;  %v2374_v29 = vadd.f32 %v2372_v56, %v2304_v54  ;;  %v2312_v37 = vsel %vm1820_vm0, %v2311_v5, %v5622_v25 }
 0x26c   :  { %v2381_v33 = vrot.slane %v2380_v13, 6  ;;  %v2456_v63 = vrot.slane %v2442_v18, %v6013_v47  ;;  %v2490_v62 = vrot.slane %v2476_v12, %v6013_v47  ;;  %v2491_v49 = vcombine.high %v2483_v59, %v2483_v59 }
 0x26d   :  { %v2515_v50 = vrot.slane %v2374_v29, %v6013_v47  ;;  %v2508_v25 = vcombine.high %v2374_v29, %v2374_v29  ;;  %v2330_v34 = vpop.permute.xlu1 %2329 }
 0x26e   :  { %v2382_v57 = vsel %vm313_vm5, %v2381_v33, %v2380_v13  ;;  %v2331_v21 = vrot.slane %v2330_v34, 6 }
 0x26f   :  { %v2523_v1 = vcombine.high %v2515_v50, %v2515_v50  ;;  %v2522_v2 = vrot.slane %v2508_v25, %v6013_v47  ;;  %v2658_v25 = vld [vmem:[%s5928_s5] sm:$0xff] }
 0x270   :  { %v2332_v18 = vsel %vm1820_vm0, %v2331_v21, %v2330_v34 }
 0x2d9   :  { %v5699_v15 = vpop.f32.mrb[0].mxu1 }
 0x2da   :  { %1368 = vrot.lane.b32.xlu1 %v5699_v15, %s4555_s0  ;;  %v5708_v6 = vpop.f32.mrb[1].mxu1 }
 0x2db   :  { %1366 = vrot.lane.b32.xlu0 %v5708_v6, %s4555_s0 }
 0x2dd   :  { %v5720_v24 = vpop.f32.mrb[2].mxu1 }
 0x2de   :  { %1372 = vrot.lane.b32.xlu1 %v5720_v24, %s4555_s0  ;;  %v5727_v53 = vpop.f32.mrb[3].mxu1 }
 0x2df   :  { %2389 = vrot.lane.b32.xlu0 %v2387_v48, %s4554_s21  ;;  %v2314_v48 = vadd.f32 %v2312_v37, %v2244_v61  ;;  %v5773_v7 = vpop.f32.mrb[2].mxu0 }
 0x2e0   :  { %v5775_v22 = vpop.f32.mrb[3].mxu0 }
 0x2e1   :  { %v2384_v35 = vadd.f32 %v2382_v57, %v2314_v48 }
 0x2e2   :  { %1370 = vrot.lane.b32.xlu1 %v5727_v53, %s4555_s0 }
 0x2e3   :  { %2424 = vrot.lane.b32.xlu0 %v2415_v19, %s4556_s20  ;;  %v2539_v11 = vcombine.high %v2384_v35, %v2384_v35  ;;  %v2546_v52 = vrot.slane %v2384_v35, %v6013_v47  ;;  %v5777_v28 = vpop.f32.mrb[4].mxu0 }
 0x2e4   :  { %v5779_v27 = vpop.f32.mrb[5].mxu0 }
 0x2e5   :  { %v2553_v3 = vrot.slane %v2539_v11, %v6013_v47  ;;  %v2554_v4 = vcombine.high %v2546_v52, %v2546_v52 }
 0x2e6   :  { %2399 = vrot.lane.b32.xlu1 %v2397_v14, %s4554_s21  ;;  %s4558_s21 = smov 50  }
 0x2e7   :  { %2428 = vrot.lane.b32.xlu0 %v2422_v8, %s4556_s20  ;;  %v5781_v38 = vpop.f32.mrb[6].mxu0 }
 0x2e8   :  { %v5783_v23 = vpop.f32.mrb[7].mxu0 }
 0x2ea   :  { %2426 = vrot.lane.b32.xlu1 %v2423_v41, %s4556_s20 }
 0x2eb   :  { %2460 = vrot.lane.b32.xlu0 %v2457_v36, %s4558_s21  ;;  %v5785_v26 = vpop.f32.mrb[8].mxu0 }
 0x2ec   :  { %v5787_v9 = vpop.f32.mrb[9].mxu0 }
 0x2ee   :  { %2458 = vrot.lane.b32.xlu1 %v2449_v58, %s4558_s21  ;;  %v2321_v58 = vrot.slane %v2320_v45, 6 }
 0x2ef   :  { %2492 = vrot.lane.b32.xlu0 %v2483_v59, %s4559_s22 }
 0x2f0   :  { %v2322_v31 = vsel %vm1820_vm0, %v2321_v58, %v2320_v45 }
 0x2f1   :  { %v2324_v30 = vadd.f32 %v2322_v31, %v5619_v16  ;;  %v2334_v16 = vadd.f32 %v2332_v18, %v5630_v0  ;;  %v4563_v31 = vmov 1  }
 0x2f2   :  { %2462 = vrot.lane.b32.xlu1 %v2456_v63, %s4558_s21 }
 0x2f3   :  { %2496 = vrot.lane.b32.xlu0 %v2490_v62, %s4559_s22 }
 0x2f6   :  { %2494 = vrot.lane.b32.xlu1 %v2491_v49, %s4559_s22 }
 0x2f7   :  { %2526 = vrot.lane.b32.xlu0 %v2523_v1, %s4553_s13 }
 0x2fa   :  { %2524 = vrot.lane.b32.xlu1 %v2515_v50, %s4553_s13 }
 0x2fb   :  { %2555 = vrot.lane.b32.xlu0 %v2546_v52, %s4560_s23  ;;  %v2659_v52 = vld [vmem:[%s5928_s5 + $0x8] sm:$0xff] }
 0x2fe   :  { %2528 = vrot.lane.b32.xlu1 %v2522_v2, %s4553_s13  ;;  %s4561_s13 = smov 46   ;;  %v5825_v2 = vpop.f32.mrb[10].mxu0 }
 0x2ff   :  { %2559 = vrot.lane.b32.xlu0 %v2553_v3, %s4560_s23 }
 0x302   :  { %2557 = vrot.lane.b32.xlu1 %v2554_v4, %s4560_s23  ;;  %v5827_v4 = vpop.f32.mrb[11].mxu0 }
 0x303   :  { %v5832_v34 = vpop.f32.mrb[12].mxu0 }
 0x304   :  { %v5834_v58 = vpop.f32.mrb[13].mxu0 }
 0x325   :  { %v5789_v39 = vpop.f32.mrb[6].mxu1 }
 0x326   :  { %v5791_v40 = vpop.f32.mrb[7].mxu1 }
 0x329   :  { %v5793_v19 = vpop.f32.mrb[8].mxu1 }
 0x32a   :  { %v5795_v44 = vpop.f32.mrb[9].mxu1 }
 0x32d   :  { %v5797_v43 = vpop.f32.mrb[10].mxu1 }
 0x32e   :  { %v5799_v60 = vpop.f32.mrb[11].mxu1 }
 0x331   :  { %v5801_v14 = vpop.f32.mrb[4].mxu1 }
 0x332   :  { %v5803_v46 = vpop.f32.mrb[5].mxu1 }
 0x34c   :  { %v1369_v8 = vpop.permute.xlu1 %1368 }
 0x34d   :  { %v1379_v42 = vadd.f32 %v5699_v15, %v1369_v8  ;;  %v1367_v20 = vpop.permute.xlu0 %1366 }
 0x34e   :  { %v1378_v17 = vadd.f32 %v1367_v20, %v5708_v6 }
 0x34f   :  { %v4072_v55 = vmul.f32 -1.442695, %v1379_v42  ;;  %v5836_v42 = vpop.f32.mrb[14].mxu0 }
 0x350   :  { %v4071_v51 = vmul.f32 -1.442695, %v1378_v17  ;;  %v1373_v41 = vpop.permute.xlu1 %1372  ;;  %v5838_v20 = vpop.f32.mrb[15].mxu0 }
 0x351   :  { %4453 = vpow2.f32 %v4072_v55  ;;  %v2390_v32 = vpop.permute.xlu0 %2389  ;;  %v1381_v36 = vadd.f32 %v5720_v24, %v1373_v41 }
 0x352   :  { %4455 = vpow2.f32 %v4071_v51  ;;  %v2391_v54 = vrot.slane %v2390_v32, 6 }
 0x353   :  { %v4074_v13 = vmul.f32 -1.442695, %v1381_v36 }
 0x354   :  { %v2392_v56 = vsel %vm313_vm5, %v2391_v54, %v2390_v32  ;;  %v1371_v15 = vpop.permute.xlu1 %1370  ;;  %v2661_v32 = vld [vmem:[%s5928_s5 + $0x18] sm:$0xff] }
 0x355   :  { %v2394_v5 = vadd.f32 %v2392_v56, %v2324_v30  ;;  %v1380_v6 = vadd.f32 %v1371_v15, %v5727_v53  ;;  %4457 = vpow2.f32 %v4074_v13  ;;  %v2425_v36 = vpop.permute.xlu0 %2424 }
 0x357   :  { %v2573_v61 = vcombine.high %v2394_v5, %v2394_v5  ;;  %v2580_v12 = vrot.slane %v2394_v5, %v6013_v47  ;;  %v4073_v59 = vmul.f32 -1.442695, %v1380_v6 }
 0x358   :  { %v2400_v29 = vpop.permute.xlu1 %2399 }
 0x359   :  { %v2588_v37 = vcombine.high %v2580_v12, %v2580_v12  ;;  %v2401_v24 = vrot.slane %v2400_v29, 6  ;;  %2589 = vrot.lane.b32.xlu1 %v2580_v12, %s4561_s13  ;;  %v2587_v63 = vrot.slane %v2573_v61, %v6013_v47  ;;  %4459 = vpow2.f32 %v4073_v59  ;;  %v2429_v30 = vpop.permute.xlu0 %2428  ;;  %v6014_v12 = vld [vmem:[#allocation14_spill] sm:$0xff] }
 0x35a   :  { %v1473_v59 = vadd.s32 128, %v6014_v12 }
 0x35b   :  { %v4454_v33 = vpop.eup %4453  ;;  %v2402_v53 = vsel %vm313_vm5, %v2401_v24, %v2400_v29  ;;  %2591 = vrot.lane.b32.xlu0 %v2588_v37, %s4561_s13  ;;  %v1478_v29 = vand.u32 15, %v6014_v12 }
 0x35c   :  { %v4456_v62 = vpop.eup %4455  ;;  %v2404_v50 = vadd.f32 %v2402_v53, %v2334_v16  ;;  %v1395_v48 = vadd.f32 1.0, %v4454_v33  ;;  %v2427_v54 = vpop.permute.xlu1 %2426  ;;  %v1485_v16 = vand.u32 15, %v1473_v59 }
 0x35d   :  { %2593 = vrot.lane.b32.xlu1 %v2587_v63, %s4561_s13  ;;  %v1394_v1 = vadd.f32 1.0, %v4456_v62  ;;  %v2461_v56 = vpop.permute.xlu0 %2460  ;;  %vm2439_vm4 = vcmp.ge.s32.totalorder %v1478_v29, 2  ;;  %vm2405_vm5 = vcmp.ge.s32.totalorder %v1478_v29, 3  ;;  %v2431_v33 = vsel %vm2430_vm2, %v2425_v36, %v2427_v54 }
 0x35e   :  { %v2607_v57 = vcombine.high %v2404_v50, %v2404_v50  ;;  %v2614_v49 = vrot.slane %v2404_v50, %v6013_v47  ;;  %4461 = vrcp.f32 %v1395_v48  ;;  %vm2473_vm6 = vcmp.ge.s32.totalorder %v1478_v29, 1 }
 0x35f   :  { %4463 = vrcp.f32 %v1394_v1  ;;  %v4458_v11 = vpop.eup %4457  ;;  %vm2440_vm7 = vcmp.ge.s32.totalorder %v1485_v16, 2  ;;  %vm2406_vm8 = vcmp.ge.s32.totalorder %v1485_v16, 3  ;;  %v2432_v1 = vsel %vm2430_vm2, %v2427_v54, %v2429_v30 }
 0x360   :  { %v2622_v35 = vcombine.high %v2614_v49, %v2614_v49  ;;  %2623 = vrot.lane.b32.xlu0 %v2614_v49, %s4562_s24  ;;  %v2621_v0 = vrot.slane %v2607_v57, %v6013_v47  ;;  %v1397_v45 = vadd.f32 1.0, %v4458_v11  ;;  %v2660_v47 = vld [vmem:[%s5928_s5 + $0x10] sm:$0xff]  ;;  %v2459_v21 = vpop.permute.xlu1 %2458  ;;  %v2435_v57 = vsel %vm2405_vm5, %v2431_v33, 0.0  ;;  %s4564_s5 = smov [#allocation8]  }
 0x361   :  { %v2493_v5 = vpop.permute.xlu0 %2492  ;;  %v2465_v24 = vsel %vm2464_vm1, %v2459_v21, %v2461_v56  ;;  %vm2474_vm10 = vcmp.ge.s32.totalorder %v1485_v16, 1  ;;  %vm2536_vm12 = vcmp.lt.s32.totalorder %v1478_v29, 15  ;;  %vm2537_vm13 = vcmp.lt.s32.totalorder %v1485_v16, 15  ;;  %s4058_s9 = sshll.u32 %s4564_s5, 4  ;;  %s4059_s9 = int_to_ptr.vmem [resolvable:$true] %s4058_s9 }
 0x362   :  { %2625 = vrot.lane.b32.xlu1 %v2622_v35, %s4562_s24  ;;  %4465 = vrcp.f32 %v1397_v45  ;;  %v2469_v62 = vsel %vm2439_vm4, %v2465_v24, 0.0  ;;  %vm2570_vm14 = vcmp.lt.s32.totalorder %v1478_v29, 14  ;;  %vm2571_vm15 = vcmp.lt.s32.totalorder %v1485_v16, 14  ;;  %s4514_s11 = scalar_lea.vmem %s4059_s9, 2048  ;;  %p4519_p0 = scmp.lt.s32.totalorder %s4059_s9, %s4059_s9 }
 0x363   :  { %v4460_v3 = vpop.eup %4459  ;;  %v2471_v35 = vadd.f32 %v2469_v62, %v2435_v57  ;;  %vm2604_vm2 = vcmp.lt.s32.totalorder %v1478_v29, 13  ;;  %p4515_p13 = scmp.ne.s32.totalorder %s4059_s9, %s4514_s11  ;;  %p4520_p1 = scmp.lt.s32.totalorder %s4514_s11, %s4514_s11 }
 0x364   :  { %2627 = vrot.lane.b32.xlu0 %v2621_v0, %s4562_s24  ;;  %v1396_v8 = vadd.f32 1.0, %v4460_v3  ;;  %v2463_v15 = vpop.permute.xlu1 %2462 }
 0x365   :  { %v2497_v13 = vpop.permute.xlu0 %2496  ;;  %v2466_v50 = vsel %vm2464_vm1, %v2461_v56, %v2463_v15  ;;  %vm2629_vm1 = vcmask 367616   ;;  %p4521_p2 = por %p4520_p1, %p4519_p0 }
 0x366   :  { %2664 = vperm.xlu1 %4445, %v2658_v25   ;;  %4467 = vrcp.f32 %v1396_v8  ;;  %v2470_v11 = vsel %vm2440_vm7, %v2466_v50, 0.0 }
 0x367   :  { %p4522_p3 = pnand %p4521_p2, %p4515_p13 }
 0x368   :  { %2669 = vperm.xlu0 %4446, %v2659_v52   ;;  %v4462_v17 = vpop.eup %4461  ;;  %v2495_v6 = vpop.permute.xlu1 %2494 }
 0x369   :  { %v4464_v55 = vpop.eup %4463  ;;  %v2527_v18 = vpop.permute.xlu0 %2526  ;;  %v2499_v63 = vsel %vm2498_vm3, %v2493_v5, %v2495_v6  ;;  %v2500_v0 = vsel %vm2498_vm3, %v2495_v6, %v2497_v13  ;;  %vm2605_vm3 = vcmp.lt.s32.totalorder %v1485_v16, 13 }
 0x36a   :  { %2674 = vperm.xlu1 %4445, %v2660_v47   ;;  %v2503_v49 = vsel %vm2473_vm6, %v2499_v63, 0.0  ;;  %v2436_v47 = vsel %vm2406_vm8, %v2432_v1, 0.0  ;;  %v2504_v8 = vsel %vm2474_vm10, %v2500_v0, 0.0 }
 0x36b   :  { %v2505_v52 = vadd.f32 %v2503_v49, %v2471_v35 }
 0x36c   :  { %3934 = vperm.xlu0 %4446, %v4462_v17   ;;  %v4466_v51 = vpop.eup %4465 }
 0x36d   :  { %v2556_v37 = vpop.permute.xlu0 %2555 }
 0x36e   :  { %3929 = vperm.xlu1 %4445, %v4464_v55  }
 0x370   :  { %4447 = vset.pattern.permute.xlu0 %v4563_v31  ;;  %v4468_v41 = vpop.eup %4467 }
 0x371   :  { %4001 = vperm.xlu0 %4447, %v4462_v17   ;;  %v2560_v48 = vpop.permute.xlu0 %2559 }
 0x372   :  { %4448 = vset.pattern.permute.xlu1 %v4563_v31 }
 0x373   :  { %3997 = vperm.xlu1 %4448, %v4464_v55   ;;  %v2472_v55 = vadd.f32 %v2470_v11, %v2436_v47 }
 0x375   :  { %4449 = vset.pattern.permute.xlu0 %v4557_v10  ;;  %v2506_v54 = vadd.f32 %v2504_v8, %v2472_v55 }
 0x376   :  { %3944 = vperm.xlu0 %4449, %v4466_v51  }
 0x377   :  { %4450 = vset.pattern.permute.xlu1 %v4557_v10  ;;  %v2525_v10 = vpop.permute.xlu1 %2524 }
 0x378   :  { %3939 = vperm.xlu1 %4450, %v4468_v41   ;;  %v2530_v17 = vsel %vm1820_vm0, %v2525_v10, %v2527_v18 }
 0x379   :  { %v2534_v30 = vadd.f32 %v2530_v17, %v2505_v52 }
 0x37a   :  { %2679 = vperm.xlu0 %4449, %v2661_v32  }
 0x37b   :  { %v2529_v61 = vpop.permute.xlu1 %2528 }
 0x37c   :  { %4451 = vset.pattern.permute.xlu1 %v4563_v31  ;;  %v2531_v32 = vsel %vm1820_vm0, %v2527_v18, %v2529_v61 }
 0x37d   :  { %4005 = vperm.xlu1 %4451, %v4468_v41   ;;  %v2535_v6 = vadd.f32 %v2531_v32, %v2506_v54 }
 0x37e   :  { %4452 = vset.pattern.permute.xlu0 %v4563_v31 }
 0x37f   :  { %v2558_v53 = vpop.permute.xlu1 %2557 }
 0x380   :  { %v2562_v3 = vsel %vm2561_vm9, %v2556_v37, %v2558_v53  ;;  %v2563_v31 = vsel %vm2561_vm9, %v2558_v53, %v2560_v48 }
 0x381   :  { %4009 = vperm.xlu1 %4451, %v4466_v51   ;;  %v2566_v36 = vsel %vm2536_vm12, %v2562_v3, 0.0  ;;  %v2567_v56 = vsel %vm2537_vm13, %v2563_v31, 0.0 }
 0x382   :  { %v2568_v13 = vadd.f32 %v2566_v36, %v2534_v30  ;;  %v2569_v59 = vadd.f32 %v2567_v56, %v2535_v6  ;;  %v3990_v6 = vld [vmem:[#allocation3 + $0x50] sm:$0xff] }
 0x3cb   :  { %v2590_v25 = vpop.permute.xlu1 %2589 }
 0x3cd   :  { %v2592_v45 = vpop.permute.xlu0 %2591 }
 0x3ce   :  { %v2596_v51 = vsel %vm2595_vm11, %v2590_v25, %v2592_v45 }
 0x3cf   :  { %v2594_v41 = vpop.permute.xlu1 %2593  ;;  %v2600_v15 = vsel %vm2570_vm14, %v2596_v51, 0.0 }
 0x3d0   :  { %v2597_v21 = vsel %vm2595_vm11, %v2592_v45, %v2594_v41  ;;  %v2602_v37 = vadd.f32 %v2600_v15, %v2568_v13 }
 0x3d1   :  { %v2601_v10 = vsel %vm2571_vm15, %v2597_v21, 0.0  ;;  %v3921_v21 = vld [vmem:[#allocation3 + $0x10] sm:$0xff] }
 0x3d2   :  { %v2624_v5 = vpop.permute.xlu0 %2623  ;;  %v2603_v33 = vadd.f32 %v2601_v10, %v2569_v59  ;;  %v3988_v10 = vld [vmem:[#allocation3 + $0x40] sm:$0xff] }
 0x3d4   :  { %v2626_v12 = vpop.permute.xlu1 %2625 }
 0x3d5   :  { %v2630_v24 = vsel %vm2629_vm1, %v2624_v5, %v2626_v12 }
 0x3d6   :  { %v2634_v18 = vsel %vm2604_vm2, %v2630_v24, 0.0  ;;  %v2628_v61 = vpop.permute.xlu0 %2627  ;;  %v3920_v24 = vld [vmem:[#allocation3 + $0x8] sm:$0xff] }
 0x3d7   :  { %v2636_v63 = vadd.f32 %v2634_v18, %v2602_v37  ;;  %v2631_v53 = vsel %vm2629_vm1, %v2626_v12, %v2628_v61  ;;  %v3922_v37 = vld [vmem:[#allocation3 + $0x18] sm:$0xff] }
 0x3d8   :  { %v2635_v62 = vsel %vm2605_vm3, %v2631_v53, 0.0  ;;  %v3991_v53 = vld [vmem:[#allocation3 + $0x58] sm:$0xff] }
 0x3d9   :  { %v4172_v50 = vmul.f32 -1.442695, %v2636_v63  ;;  %v2637_v48 = vadd.f32 %v2635_v62, %v2603_v33  ;;  %v3989_v62 = vld [vmem:[#allocation3 + $0x48] sm:$0xff] }
 0x3db   :  { %4469 = vpow2.f32 %v4172_v50  ;;  %v4173_v57 = vmul.f32 -1.442695, %v2637_v48 }
 0x3dd   :  { %4471 = vpow2.f32 %v4173_v57 }
 0x3e5   :  { %v4470_v49 = vpop.eup %4469  ;;  %v2665_v1 = vpop.permute.xlu1 %2664 }
 0x3e6   :  { %v2644_v29 = vadd.f32 1.0, %v4470_v49  ;;  %v3381_v35 = vadd.f32 %v5825_v2, %v2665_v1  ;;  %v3383_v25 = vadd.f32 %v5827_v4, %v2665_v1 }
 0x3e7   :  { %v4472_v0 = vpop.eup %4471  ;;  %v2670_v16 = vpop.permute.xlu0 %2669 }
 0x3e8   :  { %4473 = vrcp.f32 %v2644_v29  ;;  %v2645_v11 = vadd.f32 1.0, %v4472_v0  ;;  %v3392_v52 = vadd.f32 %v5832_v34, %v2670_v16  ;;  %v3394_v3 = vadd.f32 %v5834_v58, %v2670_v16 }
 0x3e9   :  { %v5861_v45 = vpop.permute.xlu1 %2674  ;;  %v4305_v47 = vadd.f32 %v5789_v39, %v3381_v35  ;;  %v5865_v8 = vadd.f32 %v5791_v40, %v3383_v25  ;;  %v6015_v40 = vld [vmem:[#allocation12_spill] sm:$0xff]  ;;  %v4298_v30 = vadd.f32 %v5777_v28, %v2670_v16  ;;  %v4299_v59 = vadd.f32 %v5779_v27, %v2670_v16 }
 0x3ea   :  { %4475 = vrcp.f32 %v2645_v11  ;;  %v3403_v2 = vadd.f32 %v5836_v42, %v5861_v45  ;;  %v3405_v4 = vadd.f32 %v5838_v20, %v5861_v45  ;;  %v4309_v55 = vadd.f32 %v5793_v19, %v3392_v52 }
 0x3eb   :  { %v3935_v17 = vpop.permute.xlu0 %3934  ;;  %v4311_v34 = vadd.f32 %v5795_v44, %v3394_v3  ;;  %v3949_v51 = vsub.s32 0, %v6015_v40  ;;  %v4014_v41 = vsub.s32 1, %v6015_v40  ;;  %v4296_v44 = vadd.f32 %v5773_v7, %v2665_v1  ;;  %v3925_v3 = vld [vmem:[#allocation3 + $0x30] sm:$0xff] }
 0x3ec   :  { %v5874_v58 = vadd.f32 %v5797_v43, %v3403_v2  ;;  %v5877_v39 = vadd.f32 %v5799_v60, %v3405_v4  ;;  %v4297_v43 = vadd.f32 %v5775_v22, %v2665_v1  ;;  %v3919_v60 = vld [vmem:[#allocation3] sm:$0xff]  ;;  %v3926_v2 = vld [vmem:[#allocation3 + $0x38] sm:$0xff] }
 0x3ed   :  { %v3930_v31 = vpop.permute.xlu1 %3929 }
 0x3f0   :  { %v4002_v42 = vpop.permute.xlu0 %4001 }
 0x3f2   :  { %v4474_v32 = vpop.eup %4473  ;;  %v3998_v36 = vpop.permute.xlu1 %3997 }
 0x3f3   :  { %v3950_v20 = vrot.slane %v4474_v32, %v3949_v51  ;;  %v5881_v54 = vrot.slane %v4474_v32, %v4014_v41 }
 0x3f4   :  { %v4476_v19 = vpop.eup %4475 }
 0x3f5   :  { %v3954_v56 = vrot.slane %v4476_v19, %v3949_v51  ;;  %v3957_v15 = vadd.f32 %v3950_v20, %v3935_v17  ;;  %v3955_v5 = vadd.f32 %v3950_v20, %v3930_v31  ;;  %v5886_v13 = vrot.slane %v4476_v19, %v4014_v41  ;;  %v3945_v12 = vpop.permute.xlu0 %3944  ;;  %v3923_v41 = vld [vmem:[#allocation3 + $0x20] sm:$0xff] }
 0x3f6   :  { %v4022_v7 = vadd.f32 %v5881_v54, %v4002_v42  ;;  %v4020_v22 = vadd.f32 %v5881_v54, %v3998_v36  ;;  %v3961_v18 = vadd.f32 %v3950_v20, %v3945_v12 }
 0x3f7   :  { %v3958_v28 = vadd.f32 %v3954_v56, %v3935_v17  ;;  %v3965_v61 = vmul.f32 %v3957_v15, %v3921_v21  ;;  %v3956_v33 = vadd.f32 %v3954_v56, %v3930_v31  ;;  %v3963_v63 = vmul.f32 %v3955_v5, %v3919_v60  ;;  %v3940_v50 = vpop.permute.xlu1 %3939  ;;  %v3992_v21 = vld [vmem:[#allocation3 + $0x60] sm:$0xff]  ;;  %v3993_v15 = vld [vmem:[#allocation3 + $0x68] sm:$0xff] }
 0x3f8   :  { %v4023_v48 = vadd.f32 %v5886_v13, %v4002_v42  ;;  %v4030_v57 = vmul.f32 %v4022_v7, %v3990_v6  ;;  %v4021_v49 = vadd.f32 %v5886_v13, %v3998_v36  ;;  %v4028_v27 = vmul.f32 %v4020_v22, %v3988_v10  ;;  %v3924_v42 = vld [vmem:[#allocation3 + $0x28] sm:$0xff] }
 0x3f9   :  { %v3966_v1 = vmul.f32 %v3958_v28, %v3922_v37  ;;  %v3973_v29 = vadd.f32 %v4298_v30, %v3965_v61  ;;  %v3964_v35 = vmul.f32 %v3956_v33, %v3920_v24  ;;  %v3971_v0 = vadd.f32 %v4296_v44, %v3963_v63  ;;  %v2680_v4 = vpop.permute.xlu0 %2679 }
 0x3fa   :  { %v4031_v25 = vmul.f32 %v4023_v48, %v3991_v53  ;;  %v4038_v16 = vadd.f32 %v4309_v55, %v4030_v57  ;;  %v4029_v11 = vmul.f32 %v4021_v49, %v3989_v62  ;;  %v4036_v52 = vadd.f32 %v4305_v47, %v4028_v27 }
 0x3fb   :  { %v4300_v17 = vadd.f32 %v5781_v38, %v5861_v45  ;;  %v3974_v31 = vadd.f32 %v4299_v59, %v3966_v1  ;;  %3981 = vst [vmem:[#allocation8 + $0x10] sm:$0xff] %v3973_v29  ;;  %v3972_v40 = vadd.f32 %v4297_v43, %v3964_v35  ;;  %3979 = vst [vmem:[#allocation8] sm:$0xff] %v3971_v0  ;;  %v3994_v59 = vld [vmem:[#allocation3 + $0x70] sm:$0xff] }
 0x3fc   :  { %v3962_v51 = vadd.f32 %v3954_v56, %v3945_v12  ;;  %v4039_v32 = vadd.f32 %v4311_v34, %v4031_v25  ;;  %4047 = vst [vmem:[#allocation8 + $0x50] sm:$0xff] %v4038_v16  ;;  %v4037_v36 = vadd.f32 %v5865_v8, %v4029_v11  ;;  %4045 = vst [vmem:[#allocation8 + $0x40] sm:$0xff] %v4036_v52  ;;  %v4006_v19 = vpop.permute.xlu1 %4005 }
 0x3fd   :  { %v3959_v55 = vadd.f32 %v3950_v20, %v3940_v50  ;;  %v3960_v47 = vadd.f32 %v3954_v56, %v3940_v50  ;;  %3982 = vst [vmem:[#allocation8 + $0x18] sm:$0xff] %v3974_v31  ;;  %3980 = vst [vmem:[#allocation8 + $0x8] sm:$0xff] %v3972_v40  ;;  %v3969_v44 = vmul.f32 %v3961_v18, %v3925_v3 }
 0x3fe   :  { %v3970_v30 = vmul.f32 %v3962_v51, %v3926_v2  ;;  %v4302_v38 = vadd.f32 %v5785_v26, %v2680_v4  ;;  %v4303_v43 = vadd.f32 %v5787_v9, %v2680_v4  ;;  %v4301_v60 = vadd.f32 %v5783_v23, %v5861_v45  ;;  %4048 = vst [vmem:[#allocation8 + $0x58] sm:$0xff] %v4039_v32  ;;  %v3995_v9 = vld [vmem:[#allocation3 + $0x78] sm:$0xff] }
 0x3ff   :  { %4046 = vst [vmem:[#allocation8 + $0x48] sm:$0xff] %v4037_v36  ;;  %v3967_v34 = vmul.f32 %v3959_v55, %v3923_v41  ;;  %v3968_v8 = vmul.f32 %v3960_v47, %v3924_v42  ;;  %v4024_v20 = vadd.f32 %v5881_v54, %v4006_v19  ;;  %v4025_v6 = vadd.f32 %v5886_v13, %v4006_v19 }
 0x400   :  { %v3977_v56 = vadd.f32 %v4302_v38, %v3969_v44  ;;  %v3978_v5 = vadd.f32 %v4303_v43, %v3970_v30  ;;  %v4010_v37 = vpop.permute.xlu1 %4009  ;;  %v4316_v7 = vadd.f32 %v5801_v14, %v2680_v4  ;;  %v4317_v18 = vadd.f32 %v5803_v46, %v2680_v4 }
 0x401   :  { %v3975_v10 = vadd.f32 %v4300_v17, %v3967_v34  ;;  %v3976_v12 = vadd.f32 %v4301_v60, %v3968_v8  ;;  %v4032_v26 = vmul.f32 %v4024_v20, %v3992_v21  ;;  %v4033_v23 = vmul.f32 %v4025_v6, %v3993_v15 }
 0x402   :  { %3985 = vst [vmem:[#allocation8 + $0x30] sm:$0xff] %v3977_v56  ;;  %3986 = vst [vmem:[#allocation8 + $0x38] sm:$0xff] %v3978_v5  ;;  %v4026_v45 = vadd.f32 %v5881_v54, %v4010_v37  ;;  %v4027_v24 = vadd.f32 %v5886_v13, %v4010_v37 }
 0x403   :  { %3983 = vst [vmem:[#allocation8 + $0x20] sm:$0xff] %v3975_v10  ;;  %3984 = vst [vmem:[#allocation8 + $0x28] sm:$0xff] %v3976_v12  ;;  %v4040_v22 = vadd.f32 %v5874_v58, %v4032_v26  ;;  %v4041_v28 = vadd.f32 %v5877_v39, %v4033_v23 }
 0x404   :  { %v4034_v61 = vmul.f32 %v4026_v45, %v3994_v59  ;;  %v4035_v33 = vmul.f32 %v4027_v24, %v3995_v9 }
 0x405   :  { %4049 = vst [vmem:[#allocation8 + $0x60] sm:$0xff] %v4040_v22  ;;  %4050 = vst [vmem:[#allocation8 + $0x68] sm:$0xff] %v4041_v28 }
 0x406   :  { %v4042_v63 = vadd.f32 %v4316_v7, %v4034_v61  ;;  %v4043_v54 = vadd.f32 %v4317_v18, %v4035_v33 }
 0x408   :  { %4051 = vst [vmem:[#allocation8 + $0x70] sm:$0xff] %v4042_v63  ;;  %4052 = vst [vmem:[#allocation8 + $0x78] sm:$0xff] %v4043_v54 }
 0x409   :  { %4525 = shalt.err (!%p4522_p3)
}
 0x40a   :  { %s4526_s2 = scalar_lea.hbm %s5930_s7, 2048 }
 0x40b   :  { %p4527_p4 = scmp.ne.s32.totalorder %s5930_s7, %s4526_s2  ;;  %p4530_p5 = scmp.lt.u32.totalorder %s4526_s2, %s5930_s7 }
 0x40d   :  { %p4532_p6 = pnand %p4530_p5, %p4527_p4 }
 0x40f   :  { %4535 = shalt.err (!%p4532_p6)
}
 0x410   :  { %4064 = dma.vmem_to_hbm [thread:$0]  %s4059_s9, 2048, %s5930_s7, [#allocation5], %s4543_s6, %s4543_s6, %s4544_s14  }
 0x411   :  { %4540 = dma.done.wait [#allocation5], 2048  }
 0x412   :  { %4541 = vsyncadd [#allocation5], 4294965248 }
 0x413   :  { %4068 = vsyncpa [#allocation4], 1 }
 0x414   :  { %4069 = vsyncpa [#allocation5], 1 }
 0x415   :  { %4070 = vsyncpa [#allocation6], 1 }

</bundles_post_ra>
